<compile_context>
chip_gen: v7x
topology: tpu7x:2x2x1
jax: 0.10.0
libtpu: 0.0.40
codegen_flags: <defaults>
</compile_context>

<pallas_src>
import functools

import jax
import jax.numpy as jnp
from jax.experimental import pallas as pl
from jax.experimental.pallas import tpu as pltpu


N_CH = 8            # Conv1d output channels
L_IN = 1440         # input length implied by Linear(2880, ...)
L_OUT = L_IN // 4   # 360 positions after conv(stride 2) + pool(stride 2)
H1, H2, N_CLS = 256, 32, 4


# ----------------------------------------------------------------------------
# Fused kernel: Conv1d(1->8,k2,s2) + MaxPool(2,2) + BN(eval) + ReLU
#               -> Linear(2880,256)+ReLU -> Linear(256,32)+ReLU
#               -> Linear(32,4) -> Softmax
# ----------------------------------------------------------------------------
def fused_kernel(p_ref, x4_ref, w1_ref, b1_ref, w2_ref, b2_ref, w3_ref, b3_ref,
                 out_ref):
    # p_ref : SMEM (5, 8)   rows = [w_k0, w_k1, conv_bias, bn_scale, bn_shift]
    # x4_ref: VMEM (4, TB, 360)  with x4[k, b, t] = x[b, 0, 4*t + k]
    # w1_ref: VMEM (8, 360, 256) = lin1_w.T.reshape(8, 360, 256)
    # out   : VMEM (TB, 4)
    r0 = x4_ref[0]          # samples 4t      -> (TB, 360)
    r1 = x4_ref[1]          # samples 4t + 1
    r2 = x4_ref[2]          # samples 4t + 2
    r3 = x4_ref[3]          # samples 4t + 3

    acc = None
    for c in range(N_CH):
        w0c = p_ref[0, c]
        w1c = p_ref[1, c]
        cbc = p_ref[2, c]
        scc = p_ref[3, c]
        shc = p_ref[4, c]
        # Conv outputs at pre-pool positions 2t and 2t+1, then MaxPool(2,2),
        # BatchNorm (eval affine) + ReLU.  All 2-D (TB, 360), lane-dense.
        y0 = w0c * r0 + w1c * r1 + cbc
        y1 = w0c * r2 + w1c * r3 + cbc
        hc = jnp.maximum(jnp.maximum(y0, y1) * scc + shc, 0.0)
        # Channel slice of the first Linear (channel-major flatten folded into
        # the pre-reshaped weight): accumulate (TB,360) @ (360,256).
        d = jnp.dot(hc, w1_ref[c], preferred_element_type=jnp.float32)
        acc = d if acc is None else acc + d

    a1 = jnp.maximum(acc + b1_ref[...], 0.0)                       # (TB, 256)
    a2 = jnp.maximum(
        jnp.dot(a1, w2_ref[...], preferred_element_type=jnp.float32)
        + b2_ref[...], 0.0)                                        # (TB, 32)
    logits = (jnp.dot(a2, w3_ref[...], preferred_element_type=jnp.float32)
              + b3_ref[...])                                       # (TB, 4)

    # Softmax over classes (exact, row-wise).
    m = jnp.max(logits, axis=1, keepdims=True)
    e = jnp.exp(logits - m)
    out_ref[...] = e / jnp.sum(e, axis=1, keepdims=True)


# ----------------------------------------------------------------------------
# One-time parameter preparation (hoisted out of the per-call forward path).
# ----------------------------------------------------------------------------
def prepare_params(params):
    f32 = jnp.float32
    conv_w = params["conv_w"].astype(f32)                      # (8, 1, 2)
    bn_scale = params["bn_gamma"] / jnp.sqrt(params["bn_var"] + 1e-5)
    bn_shift = params["bn_beta"] - params["bn_mean"] * bn_scale
    p = jnp.stack(
        [conv_w[:, 0, 0], conv_w[:, 0, 1], params["conv_b"], bn_scale, bn_shift],
        axis=0,
    ).astype(f32)                                               # (5, 8)
    # PyTorch flatten of (B, 8, 360) is channel-major: col = c*360 + t, so
    # lin1_w.T (2880, 256) reshaped to (8, 360, 256) gives w1[c, t, n].
    w1 = params["lin1_w"].astype(f32).T.reshape(N_CH, L_OUT, H1)
    w2 = params["lin2_w"].astype(f32).T                         # (256, 32)
    w3 = params["lin3_w"].astype(f32).T                         # (32, 4)
    b1 = params["lin1_b"].astype(f32)[None, :]                  # (1, 256)
    b2 = params["lin2_b"].astype(f32)[None, :]                  # (1, 32)
    b3 = params["lin3_b"].astype(f32)[None, :]                  # (1, 4)
    return dict(p=p, w1=w1, b1=b1, w2=w2, b2=b2, w3=w3, b3=b3)


# ----------------------------------------------------------------------------
# Forward: one fused pallas_call with a batch grid.
# ----------------------------------------------------------------------------
@functools.partial(jax.jit, static_argnames=("block_b",))
def extempconvlg_forward(x, prep, block_b=256):
    """x: (B, 1, 1440) float32.  Returns (B, 4) softmax probabilities."""
    B, C, L = x.shape
    assert C == 1 and L == L_IN and block_b % 8 == 0
    Lout = L // 4                                               # 360

    # Glue: de-interleave so conv/pool are stride-free 2-D ops in-kernel.
    # x4[k, b, t] = x[b, 0, 4*t + k]
    x4 = x.reshape(B, Lout, 4).transpose(2, 0, 1)               # (4, B, 360)

    # Batch tile: full batch if small, else a multiple-of-8 tile (Mosaic
    # (8,128) constraint) small enough to keep VMEM modest on every chip gen.
    TB = B if B <= block_b else block_b
    grid = (pl.cdiv(B, TB),)

    in_specs = [
        # Conv/BN scalar table -> SMEM (cheap scalar reads, no DMA per step).
        pl.BlockSpec(memory_space=pltpu.MemorySpace.SMEM),
        # Activations: streamed per batch tile.
        pl.BlockSpec((4, TB, Lout), lambda i: (0, i, 0)),
        # Weights/biases: constant index_map -> resident across grid steps.
        pl.BlockSpec((N_CH, Lout, H1), lambda i: (0, 0, 0)),
        pl.BlockSpec((1, H1), lambda i: (0, 0)),
        pl.BlockSpec((H1, H2), lambda i: (0, 0)),
        pl.BlockSpec((1, H2), lambda i: (0, 0)),
        pl.BlockSpec((H2, N_CLS), lambda i: (0, 0)),
        pl.BlockSpec((1, N_CLS), lambda i: (0, 0)),
    ]
    out_specs = pl.BlockSpec((TB, N_CLS), lambda i: (i, 0))

    return pl.pallas_call(
        fused_kernel,
        out_shape=jax.ShapeDtypeStruct((B, N_CLS), jnp.float32),
        grid=grid,
        in_specs=in_specs,
        out_specs=out_specs,
        compiler_params=pltpu.CompilerParams(
            dimension_semantics=("parallel",),   # v7x: shard batch over 2 TCs
        ),
    )(prep["p"], x4, prep["w1"], prep["b1"], prep["w2"], prep["b2"],
      prep["w3"], prep["b3"])


# ----------------------------------------------------------------------------
# Pure-JAX reference (mirrors PyTorch eval-mode forward) for validation.
# ----------------------------------------------------------------------------
def reference_forward(x, params):
    B, _, L = x.shape
    xs = x[:, 0, :]                                              # (B, L)
    w = params["conv_w"]                                         # (8, 1, 2)
    y = (xs[:, 0::2][:, None, :] * w[None, :, 0, 0, None]
         + xs[:, 1::2][:, None, :] * w[None, :, 0, 1, None]
         + params["conv_b"][None, :, None])                      # (B, 8, L/2)
    z = jnp.maximum(y[:, :, 0::2], y[:, :, 1::2])                # (B, 8, L/4)
    sc = params["bn_gamma"] / jnp.sqrt(params["bn_var"] + 1e-5)
    sh = params["bn_beta"] - params["bn_mean"] * sc
    h = jnp.maximum(z * sc[None, :, None] + sh[None, :, None], 0.0)
    h = h.reshape(B, -1)                                         # (B, 2880)
    a1 = jnp.maximum(h @ params["lin1_w"].T + params["lin1_b"], 0.0)
    a2 = jnp.maximum(a1 @ params["lin2_w"].T + params["lin2_b"], 0.0)
    logits = a2 @ params["lin3_w"].T + params["lin3_b"]
    return jax.nn.softmax(logits, axis=1)


def init_params(key):
    ks = jax.random.split(key, 12)
    f32 = jnp.float32
    return {
        "conv_w": 0.5 * jax.random.normal(ks[0], (8, 1, 2), f32),
        "conv_b": 0.1 * jax.random.normal(ks[1], (8,), f32),
        "bn_gamma": 1.0 + 0.1 * jax.random.normal(ks[2], (8,), f32),
        "bn_beta": 0.1 * jax.random.normal(ks[3], (8,), f32),
        "bn_mean": 0.05 * jax.random.normal(ks[4], (8,), f32),
        "bn_var": 1.0 + 0.1 * jax.random.uniform(ks[5], (8,), f32),
        "lin1_w": 0.02 * jax.random.normal(ks[6], (256, 2880), f32),
        "lin1_b": 0.01 * jax.random.normal(ks[7], (256,), f32),
        "lin2_w": 0.05 * jax.random.normal(ks[8], (32, 256), f32),
        "lin2_b": 0.01 * jax.random.normal(ks[9], (32,), f32),
        "lin3_w": 0.1 * jax.random.normal(ks[10], (4, 32), f32),
        "lin3_b": 0.01 * jax.random.normal(ks[11], (4,), f32),
    }


if __name__ == "__main__":
    key = jax.random.PRNGKey(0)
    pkey, xkey = jax.random.split(key)
    params = init_params(pkey)

    # One-time parameter preparation (hoisted out of the forward path).
    prep = prepare_params(params)
    prep = jax.block_until_ready(prep)

    # Input: (batch=2, channels=1, length=1440) — length forced by Linear(2880, ...)
    x = jax.random.normal(xkey, (2, 1, 1440), jnp.float32)

    out = extempconvlg_forward(x, prep)
    out = jax.block_until_ready(out)

    ref = reference_forward(x, params)
    assert out.shape == (2, 4)
    assert jnp.allclose(jnp.sum(out, axis=1), 1.0, atol=1e-5)
    assert jnp.allclose(out, ref, rtol=1e-4, atol=1e-6), (out, ref)

    print("KERNEL_OK")
</pallas_src>

<mosaic_0001>
module attributes {stable_mosaic.version = 11 : i64} {
  func.func @fused_kernel(%arg0: i32, %arg1: memref<5x8xf32, #tpu.memory_space<smem>>, %arg2: memref<4x2x360xf32, #tpu.memory_space<vmem>>, %arg3: memref<8x360x256xf32, #tpu.memory_space<vmem>>, %arg4: memref<1x256xf32, #tpu.memory_space<vmem>>, %arg5: memref<256x32xf32, #tpu.memory_space<vmem>>, %arg6: memref<1x32xf32, #tpu.memory_space<vmem>>, %arg7: memref<32x4xf32, #tpu.memory_space<vmem>>, %arg8: memref<1x4xf32, #tpu.memory_space<vmem>>, %arg9: memref<2x4xf32, #tpu.memory_space<vmem>>) attributes {dimension_semantics = [#tpu.dimension_semantics<parallel>], iteration_bounds = array<i64: 1>, scalar_prefetch = 0 : i64, scratch_operands = 0 : i64, tpu.core_type = #tpu.core_type<tc>, window_params = [{transform_indices = @transform_0, window_bounds = array<i64: 5, 8>}, {transform_indices = @transform_1, window_bounds = array<i64: 4, 2, 360>}, {pipeline_mode = #tpu.pipeline_mode<synchronous>, transform_indices = @transform_2, window_bounds = array<i64: 8, 360, 256>}, {pipeline_mode = #tpu.pipeline_mode<synchronous>, transform_indices = @transform_3, window_bounds = array<i64: 1, 256>}, {pipeline_mode = #tpu.pipeline_mode<synchronous>, transform_indices = @transform_4, window_bounds = array<i64: 256, 32>}, {pipeline_mode = #tpu.pipeline_mode<synchronous>, transform_indices = @transform_5, window_bounds = array<i64: 1, 32>}, {pipeline_mode = #tpu.pipeline_mode<synchronous>, transform_indices = @transform_6, window_bounds = array<i64: 32, 4>}, {pipeline_mode = #tpu.pipeline_mode<synchronous>, transform_indices = @transform_7, window_bounds = array<i64: 1, 4>}, {transform_indices = @transform_8, window_bounds = array<i64: 2, 4>}]} {
    %c0 = arith.constant 0 : index
    %c0_0 = arith.constant 0 : index
    %c0_1 = arith.constant 0 : index
    %0 = vector.load %arg2[%c0, %c0_0, %c0_1] : memref<4x2x360xf32, #tpu.memory_space<vmem>>, vector<1x2x360xf32>
    %1 = vector.shape_cast %0 : vector<1x2x360xf32> to vector<2x360xf32>
    %c1 = arith.constant 1 : index
    %c0_2 = arith.constant 0 : index
    %c0_3 = arith.constant 0 : index
    %2 = vector.load %arg2[%c1, %c0_2, %c0_3] : memref<4x2x360xf32, #tpu.memory_space<vmem>>, vector<1x2x360xf32>
    %3 = vector.shape_cast %2 : vector<1x2x360xf32> to vector<2x360xf32>
    %c2 = arith.constant 2 : index
    %c0_4 = arith.constant 0 : index
    %c0_5 = arith.constant 0 : index
    %4 = vector.load %arg2[%c2, %c0_4, %c0_5] : memref<4x2x360xf32, #tpu.memory_space<vmem>>, vector<1x2x360xf32>
    %5 = vector.shape_cast %4 : vector<1x2x360xf32> to vector<2x360xf32>
    %c3 = arith.constant 3 : index
    %c0_6 = arith.constant 0 : index
    %c0_7 = arith.constant 0 : index
    %6 = vector.load %arg2[%c3, %c0_6, %c0_7] : memref<4x2x360xf32, #tpu.memory_space<vmem>>, vector<1x2x360xf32>
    %7 = vector.shape_cast %6 : vector<1x2x360xf32> to vector<2x360xf32>
    %c0_8 = arith.constant 0 : index
    %c0_9 = arith.constant 0 : index
    %8 = memref.load %arg1[%c0_8, %c0_9] : memref<5x8xf32, #tpu.memory_space<smem>>
    %c1_10 = arith.constant 1 : index
    %c0_11 = arith.constant 0 : index
    %9 = memref.load %arg1[%c1_10, %c0_11] : memref<5x8xf32, #tpu.memory_space<smem>>
    %c2_12 = arith.constant 2 : index
    %c0_13 = arith.constant 0 : index
    %10 = memref.load %arg1[%c2_12, %c0_13] : memref<5x8xf32, #tpu.memory_space<smem>>
    %c3_14 = arith.constant 3 : index
    %c0_15 = arith.constant 0 : index
    %11 = memref.load %arg1[%c3_14, %c0_15] : memref<5x8xf32, #tpu.memory_space<smem>>
    %c4 = arith.constant 4 : index
    %c0_16 = arith.constant 0 : index
    %12 = memref.load %arg1[%c4, %c0_16] : memref<5x8xf32, #tpu.memory_space<smem>>
    %13 = vector.broadcast %8 : f32 to vector<2x360xf32>
    %14 = arith.mulf %13, %1 : vector<2x360xf32>
    %15 = vector.broadcast %9 : f32 to vector<2x360xf32>
    %16 = arith.mulf %15, %3 : vector<2x360xf32>
    %17 = arith.addf %14, %16 : vector<2x360xf32>
    %18 = vector.broadcast %10 : f32 to vector<2x360xf32>
    %19 = arith.addf %17, %18 : vector<2x360xf32>
    %20 = vector.broadcast %8 : f32 to vector<2x360xf32>
    %21 = arith.mulf %20, %5 : vector<2x360xf32>
    %22 = vector.broadcast %9 : f32 to vector<2x360xf32>
    %23 = arith.mulf %22, %7 : vector<2x360xf32>
    %24 = arith.addf %21, %23 : vector<2x360xf32>
    %25 = vector.broadcast %10 : f32 to vector<2x360xf32>
    %26 = arith.addf %24, %25 : vector<2x360xf32>
    %27 = arith.maximumf %19, %26 : vector<2x360xf32>
    %28 = vector.broadcast %11 : f32 to vector<2x360xf32>
    %29 = arith.mulf %27, %28 : vector<2x360xf32>
    %30 = vector.broadcast %12 : f32 to vector<2x360xf32>
    %31 = arith.addf %29, %30 : vector<2x360xf32>
    %cst = arith.constant 0.000000e+00 : f32
    %32 = vector.broadcast %cst : f32 to vector<2x360xf32>
    %33 = arith.maximumf %31, %32 : vector<2x360xf32>
    %c0_17 = arith.constant 0 : index
    %c0_18 = arith.constant 0 : index
    %c0_19 = arith.constant 0 : index
    %34 = vector.load %arg3[%c0_17, %c0_18, %c0_19] : memref<8x360x256xf32, #tpu.memory_space<vmem>>, vector<1x360x256xf32>
    %35 = vector.shape_cast %34 : vector<1x360x256xf32> to vector<360x256xf32>
    %cst_20 = arith.constant dense<0.000000e+00> : vector<2x256xf32>
    %36 = tpu.matmul %33, %35, %cst_20 {dimension_numbers = #tpu.dot_dimension_numbers<[1], [0], [0], [1], [0, 0, 1, 1], [], []>} : vector<2x360xf32>, vector<360x256xf32>, vector<2x256xf32> -> vector<2x256xf32>
    %c0_21 = arith.constant 0 : index
    %c1_22 = arith.constant 1 : index
    %37 = memref.load %arg1[%c0_21, %c1_22] : memref<5x8xf32, #tpu.memory_space<smem>>
    %c1_23 = arith.constant 1 : index
    %c1_24 = arith.constant 1 : index
    %38 = memref.load %arg1[%c1_23, %c1_24] : memref<5x8xf32, #tpu.memory_space<smem>>
    %c2_25 = arith.constant 2 : index
    %c1_26 = arith.constant 1 : index
    %39 = memref.load %arg1[%c2_25, %c1_26] : memref<5x8xf32, #tpu.memory_space<smem>>
    %c3_27 = arith.constant 3 : index
    %c1_28 = arith.constant 1 : index
    %40 = memref.load %arg1[%c3_27, %c1_28] : memref<5x8xf32, #tpu.memory_space<smem>>
    %c4_29 = arith.constant 4 : index
    %c1_30 = arith.constant 1 : index
    %41 = memref.load %arg1[%c4_29, %c1_30] : memref<5x8xf32, #tpu.memory_space<smem>>
    %42 = vector.broadcast %37 : f32 to vector<2x360xf32>
    %43 = arith.mulf %42, %1 : vector<2x360xf32>
    %44 = vector.broadcast %38 : f32 to vector<2x360xf32>
    %45 = arith.mulf %44, %3 : vector<2x360xf32>
    %46 = arith.addf %43, %45 : vector<2x360xf32>
    %47 = vector.broadcast %39 : f32 to vector<2x360xf32>
    %48 = arith.addf %46, %47 : vector<2x360xf32>
    %49 = vector.broadcast %37 : f32 to vector<2x360xf32>
    %50 = arith.mulf %49, %5 : vector<2x360xf32>
    %51 = vector.broadcast %38 : f32 to vector<2x360xf32>
    %52 = arith.mulf %51, %7 : vector<2x360xf32>
    %53 = arith.addf %50, %52 : vector<2x360xf32>
    %54 = vector.broadcast %39 : f32 to vector<2x360xf32>
    %55 = arith.addf %53, %54 : vector<2x360xf32>
    %56 = arith.maximumf %48, %55 : vector<2x360xf32>
    %57 = vector.broadcast %40 : f32 to vector<2x360xf32>
    %58 = arith.mulf %56, %57 : vector<2x360xf32>
    %59 = vector.broadcast %41 : f32 to vector<2x360xf32>
    %60 = arith.addf %58, %59 : vector<2x360xf32>
    %cst_31 = arith.constant 0.000000e+00 : f32
    %61 = vector.broadcast %cst_31 : f32 to vector<2x360xf32>
    %62 = arith.maximumf %60, %61 : vector<2x360xf32>
    %c1_32 = arith.constant 1 : index
    %c0_33 = arith.constant 0 : index
    %c0_34 = arith.constant 0 : index
    %63 = vector.load %arg3[%c1_32, %c0_33, %c0_34] : memref<8x360x256xf32, #tpu.memory_space<vmem>>, vector<1x360x256xf32>
    %64 = vector.shape_cast %63 : vector<1x360x256xf32> to vector<360x256xf32>
    %cst_35 = arith.constant dense<0.000000e+00> : vector<2x256xf32>
    %65 = tpu.matmul %62, %64, %cst_35 {dimension_numbers = #tpu.dot_dimension_numbers<[1], [0], [0], [1], [0, 0, 1, 1], [], []>} : vector<2x360xf32>, vector<360x256xf32>, vector<2x256xf32> -> vector<2x256xf32>
    %66 = arith.addf %36, %65 : vector<2x256xf32>
    %c0_36 = arith.constant 0 : index
    %c2_37 = arith.constant 2 : index
    %67 = memref.load %arg1[%c0_36, %c2_37] : memref<5x8xf32, #tpu.memory_space<smem>>
    %c1_38 = arith.constant 1 : index
    %c2_39 = arith.constant 2 : index
    %68 = memref.load %arg1[%c1_38, %c2_39] : memref<5x8xf32, #tpu.memory_space<smem>>
    %c2_40 = arith.constant 2 : index
    %c2_41 = arith.constant 2 : index
    %69 = memref.load %arg1[%c2_40, %c2_41] : memref<5x8xf32, #tpu.memory_space<smem>>
    %c3_42 = arith.constant 3 : index
    %c2_43 = arith.constant 2 : index
    %70 = memref.load %arg1[%c3_42, %c2_43] : memref<5x8xf32, #tpu.memory_space<smem>>
    %c4_44 = arith.constant 4 : index
    %c2_45 = arith.constant 2 : index
    %71 = memref.load %arg1[%c4_44, %c2_45] : memref<5x8xf32, #tpu.memory_space<smem>>
    %72 = vector.broadcast %67 : f32 to vector<2x360xf32>
    %73 = arith.mulf %72, %1 : vector<2x360xf32>
    %74 = vector.broadcast %68 : f32 to vector<2x360xf32>
    %75 = arith.mulf %74, %3 : vector<2x360xf32>
    %76 = arith.addf %73, %75 : vector<2x360xf32>
    %77 = vector.broadcast %69 : f32 to vector<2x360xf32>
    %78 = arith.addf %76, %77 : vector<2x360xf32>
    %79 = vector.broadcast %67 : f32 to vector<2x360xf32>
    %80 = arith.mulf %79, %5 : vector<2x360xf32>
    %81 = vector.broadcast %68 : f32 to vector<2x360xf32>
    %82 = arith.mulf %81, %7 : vector<2x360xf32>
    %83 = arith.addf %80, %82 : vector<2x360xf32>
    %84 = vector.broadcast %69 : f32 to vector<2x360xf32>
    %85 = arith.addf %83, %84 : vector<2x360xf32>
    %86 = arith.maximumf %78, %85 : vector<2x360xf32>
    %87 = vector.broadcast %70 : f32 to vector<2x360xf32>
    %88 = arith.mulf %86, %87 : vector<2x360xf32>
    %89 = vector.broadcast %71 : f32 to vector<2x360xf32>
    %90 = arith.addf %88, %89 : vector<2x360xf32>
    %cst_46 = arith.constant 0.000000e+00 : f32
    %91 = vector.broadcast %cst_46 : f32 to vector<2x360xf32>
    %92 = arith.maximumf %90, %91 : vector<2x360xf32>
    %c2_47 = arith.constant 2 : index
    %c0_48 = arith.constant 0 : index
    %c0_49 = arith.constant 0 : index
    %93 = vector.load %arg3[%c2_47, %c0_48, %c0_49] : memref<8x360x256xf32, #tpu.memory_space<vmem>>, vector<1x360x256xf32>
    %94 = vector.shape_cast %93 : vector<1x360x256xf32> to vector<360x256xf32>
    %cst_50 = arith.constant dense<0.000000e+00> : vector<2x256xf32>
    %95 = tpu.matmul %92, %94, %cst_50 {dimension_numbers = #tpu.dot_dimension_numbers<[1], [0], [0], [1], [0, 0, 1, 1], [], []>} : vector<2x360xf32>, vector<360x256xf32>, vector<2x256xf32> -> vector<2x256xf32>
    %96 = arith.addf %66, %95 : vector<2x256xf32>
    %c0_51 = arith.constant 0 : index
    %c3_52 = arith.constant 3 : index
    %97 = memref.load %arg1[%c0_51, %c3_52] : memref<5x8xf32, #tpu.memory_space<smem>>
    %c1_53 = arith.constant 1 : index
    %c3_54 = arith.constant 3 : index
    %98 = memref.load %arg1[%c1_53, %c3_54] : memref<5x8xf32, #tpu.memory_space<smem>>
    %c2_55 = arith.constant 2 : index
    %c3_56 = arith.constant 3 : index
    %99 = memref.load %arg1[%c2_55, %c3_56] : memref<5x8xf32, #tpu.memory_space<smem>>
    %c3_57 = arith.constant 3 : index
    %c3_58 = arith.constant 3 : index
    %100 = memref.load %arg1[%c3_57, %c3_58] : memref<5x8xf32, #tpu.memory_space<smem>>
    %c4_59 = arith.constant 4 : index
    %c3_60 = arith.constant 3 : index
    %101 = memref.load %arg1[%c4_59, %c3_60] : memref<5x8xf32, #tpu.memory_space<smem>>
    %102 = vector.broadcast %97 : f32 to vector<2x360xf32>
    %103 = arith.mulf %102, %1 : vector<2x360xf32>
    %104 = vector.broadcast %98 : f32 to vector<2x360xf32>
    %105 = arith.mulf %104, %3 : vector<2x360xf32>
    %106 = arith.addf %103, %105 : vector<2x360xf32>
    %107 = vector.broadcast %99 : f32 to vector<2x360xf32>
    %108 = arith.addf %106, %107 : vector<2x360xf32>
    %109 = vector.broadcast %97 : f32 to vector<2x360xf32>
    %110 = arith.mulf %109, %5 : vector<2x360xf32>
    %111 = vector.broadcast %98 : f32 to vector<2x360xf32>
    %112 = arith.mulf %111, %7 : vector<2x360xf32>
    %113 = arith.addf %110, %112 : vector<2x360xf32>
    %114 = vector.broadcast %99 : f32 to vector<2x360xf32>
    %115 = arith.addf %113, %114 : vector<2x360xf32>
    %116 = arith.maximumf %108, %115 : vector<2x360xf32>
    %117 = vector.broadcast %100 : f32 to vector<2x360xf32>
    %118 = arith.mulf %116, %117 : vector<2x360xf32>
    %119 = vector.broadcast %101 : f32 to vector<2x360xf32>
    %120 = arith.addf %118, %119 : vector<2x360xf32>
    %cst_61 = arith.constant 0.000000e+00 : f32
    %121 = vector.broadcast %cst_61 : f32 to vector<2x360xf32>
    %122 = arith.maximumf %120, %121 : vector<2x360xf32>
    %c3_62 = arith.constant 3 : index
    %c0_63 = arith.constant 0 : index
    %c0_64 = arith.constant 0 : index
    %123 = vector.load %arg3[%c3_62, %c0_63, %c0_64] : memref<8x360x256xf32, #tpu.memory_space<vmem>>, vector<1x360x256xf32>
    %124 = vector.shape_cast %123 : vector<1x360x256xf32> to vector<360x256xf32>
    %cst_65 = arith.constant dense<0.000000e+00> : vector<2x256xf32>
    %125 = tpu.matmul %122, %124, %cst_65 {dimension_numbers = #tpu.dot_dimension_numbers<[1], [0], [0], [1], [0, 0, 1, 1], [], []>} : vector<2x360xf32>, vector<360x256xf32>, vector<2x256xf32> -> vector<2x256xf32>
    %126 = arith.addf %96, %125 : vector<2x256xf32>
    %c0_66 = arith.constant 0 : index
    %c4_67 = arith.constant 4 : index
    %127 = memref.load %arg1[%c0_66, %c4_67] : memref<5x8xf32, #tpu.memory_space<smem>>
    %c1_68 = arith.constant 1 : index
    %c4_69 = arith.constant 4 : index
    %128 = memref.load %arg1[%c1_68, %c4_69] : memref<5x8xf32, #tpu.memory_space<smem>>
    %c2_70 = arith.constant 2 : index
    %c4_71 = arith.constant 4 : index
    %129 = memref.load %arg1[%c2_70, %c4_71] : memref<5x8xf32, #tpu.memory_space<smem>>
    %c3_72 = arith.constant 3 : index
    %c4_73 = arith.constant 4 : index
    %130 = memref.load %arg1[%c3_72, %c4_73] : memref<5x8xf32, #tpu.memory_space<smem>>
    %c4_74 = arith.constant 4 : index
    %c4_75 = arith.constant 4 : index
    %131 = memref.load %arg1[%c4_74, %c4_75] : memref<5x8xf32, #tpu.memory_space<smem>>
    %132 = vector.broadcast %127 : f32 to vector<2x360xf32>
    %133 = arith.mulf %132, %1 : vector<2x360xf32>
    %134 = vector.broadcast %128 : f32 to vector<2x360xf32>
    %135 = arith.mulf %134, %3 : vector<2x360xf32>
    %136 = arith.addf %133, %135 : vector<2x360xf32>
    %137 = vector.broadcast %129 : f32 to vector<2x360xf32>
    %138 = arith.addf %136, %137 : vector<2x360xf32>
    %139 = vector.broadcast %127 : f32 to vector<2x360xf32>
    %140 = arith.mulf %139, %5 : vector<2x360xf32>
    %141 = vector.broadcast %128 : f32 to vector<2x360xf32>
    %142 = arith.mulf %141, %7 : vector<2x360xf32>
    %143 = arith.addf %140, %142 : vector<2x360xf32>
    %144 = vector.broadcast %129 : f32 to vector<2x360xf32>
    %145 = arith.addf %143, %144 : vector<2x360xf32>
    %146 = arith.maximumf %138, %145 : vector<2x360xf32>
    %147 = vector.broadcast %130 : f32 to vector<2x360xf32>
    %148 = arith.mulf %146, %147 : vector<2x360xf32>
    %149 = vector.broadcast %131 : f32 to vector<2x360xf32>
    %150 = arith.addf %148, %149 : vector<2x360xf32>
    %cst_76 = arith.constant 0.000000e+00 : f32
    %151 = vector.broadcast %cst_76 : f32 to vector<2x360xf32>
    %152 = arith.maximumf %150, %151 : vector<2x360xf32>
    %c4_77 = arith.constant 4 : index
    %c0_78 = arith.constant 0 : index
    %c0_79 = arith.constant 0 : index
    %153 = vector.load %arg3[%c4_77, %c0_78, %c0_79] : memref<8x360x256xf32, #tpu.memory_space<vmem>>, vector<1x360x256xf32>
    %154 = vector.shape_cast %153 : vector<1x360x256xf32> to vector<360x256xf32>
    %cst_80 = arith.constant dense<0.000000e+00> : vector<2x256xf32>
    %155 = tpu.matmul %152, %154, %cst_80 {dimension_numbers = #tpu.dot_dimension_numbers<[1], [0], [0], [1], [0, 0, 1, 1], [], []>} : vector<2x360xf32>, vector<360x256xf32>, vector<2x256xf32> -> vector<2x256xf32>
    %156 = arith.addf %126, %155 : vector<2x256xf32>
    %c0_81 = arith.constant 0 : index
    %c5 = arith.constant 5 : index
    %157 = memref.load %arg1[%c0_81, %c5] : memref<5x8xf32, #tpu.memory_space<smem>>
    %c1_82 = arith.constant 1 : index
    %c5_83 = arith.constant 5 : index
    %158 = memref.load %arg1[%c1_82, %c5_83] : memref<5x8xf32, #tpu.memory_space<smem>>
    %c2_84 = arith.constant 2 : index
    %c5_85 = arith.constant 5 : index
    %159 = memref.load %arg1[%c2_84, %c5_85] : memref<5x8xf32, #tpu.memory_space<smem>>
    %c3_86 = arith.constant 3 : index
    %c5_87 = arith.constant 5 : index
    %160 = memref.load %arg1[%c3_86, %c5_87] : memref<5x8xf32, #tpu.memory_space<smem>>
    %c4_88 = arith.constant 4 : index
    %c5_89 = arith.constant 5 : index
    %161 = memref.load %arg1[%c4_88, %c5_89] : memref<5x8xf32, #tpu.memory_space<smem>>
    %162 = vector.broadcast %157 : f32 to vector<2x360xf32>
    %163 = arith.mulf %162, %1 : vector<2x360xf32>
    %164 = vector.broadcast %158 : f32 to vector<2x360xf32>
    %165 = arith.mulf %164, %3 : vector<2x360xf32>
    %166 = arith.addf %163, %165 : vector<2x360xf32>
    %167 = vector.broadcast %159 : f32 to vector<2x360xf32>
    %168 = arith.addf %166, %167 : vector<2x360xf32>
    %169 = vector.broadcast %157 : f32 to vector<2x360xf32>
    %170 = arith.mulf %169, %5 : vector<2x360xf32>
    %171 = vector.broadcast %158 : f32 to vector<2x360xf32>
    %172 = arith.mulf %171, %7 : vector<2x360xf32>
    %173 = arith.addf %170, %172 : vector<2x360xf32>
    %174 = vector.broadcast %159 : f32 to vector<2x360xf32>
    %175 = arith.addf %173, %174 : vector<2x360xf32>
    %176 = arith.maximumf %168, %175 : vector<2x360xf32>
    %177 = vector.broadcast %160 : f32 to vector<2x360xf32>
    %178 = arith.mulf %176, %177 : vector<2x360xf32>
    %179 = vector.broadcast %161 : f32 to vector<2x360xf32>
    %180 = arith.addf %178, %179 : vector<2x360xf32>
    %cst_90 = arith.constant 0.000000e+00 : f32
    %181 = vector.broadcast %cst_90 : f32 to vector<2x360xf32>
    %182 = arith.maximumf %180, %181 : vector<2x360xf32>
    %c5_91 = arith.constant 5 : index
    %c0_92 = arith.constant 0 : index
    %c0_93 = arith.constant 0 : index
    %183 = vector.load %arg3[%c5_91, %c0_92, %c0_93] : memref<8x360x256xf32, #tpu.memory_space<vmem>>, vector<1x360x256xf32>
    %184 = vector.shape_cast %183 : vector<1x360x256xf32> to vector<360x256xf32>
    %cst_94 = arith.constant dense<0.000000e+00> : vector<2x256xf32>
    %185 = tpu.matmul %182, %184, %cst_94 {dimension_numbers = #tpu.dot_dimension_numbers<[1], [0], [0], [1], [0, 0, 1, 1], [], []>} : vector<2x360xf32>, vector<360x256xf32>, vector<2x256xf32> -> vector<2x256xf32>
    %186 = arith.addf %156, %185 : vector<2x256xf32>
    %c0_95 = arith.constant 0 : index
    %c6 = arith.constant 6 : index
    %187 = memref.load %arg1[%c0_95, %c6] : memref<5x8xf32, #tpu.memory_space<smem>>
    %c1_96 = arith.constant 1 : index
    %c6_97 = arith.constant 6 : index
    %188 = memref.load %arg1[%c1_96, %c6_97] : memref<5x8xf32, #tpu.memory_space<smem>>
    %c2_98 = arith.constant 2 : index
    %c6_99 = arith.constant 6 : index
    %189 = memref.load %arg1[%c2_98, %c6_99] : memref<5x8xf32, #tpu.memory_space<smem>>
    %c3_100 = arith.constant 3 : index
    %c6_101 = arith.constant 6 : index
    %190 = memref.load %arg1[%c3_100, %c6_101] : memref<5x8xf32, #tpu.memory_space<smem>>
    %c4_102 = arith.constant 4 : index
    %c6_103 = arith.constant 6 : index
    %191 = memref.load %arg1[%c4_102, %c6_103] : memref<5x8xf32, #tpu.memory_space<smem>>
    %192 = vector.broadcast %187 : f32 to vector<2x360xf32>
    %193 = arith.mulf %192, %1 : vector<2x360xf32>
    %194 = vector.broadcast %188 : f32 to vector<2x360xf32>
    %195 = arith.mulf %194, %3 : vector<2x360xf32>
    %196 = arith.addf %193, %195 : vector<2x360xf32>
    %197 = vector.broadcast %189 : f32 to vector<2x360xf32>
    %198 = arith.addf %196, %197 : vector<2x360xf32>
    %199 = vector.broadcast %187 : f32 to vector<2x360xf32>
    %200 = arith.mulf %199, %5 : vector<2x360xf32>
    %201 = vector.broadcast %188 : f32 to vector<2x360xf32>
    %202 = arith.mulf %201, %7 : vector<2x360xf32>
    %203 = arith.addf %200, %202 : vector<2x360xf32>
    %204 = vector.broadcast %189 : f32 to vector<2x360xf32>
    %205 = arith.addf %203, %204 : vector<2x360xf32>
    %206 = arith.maximumf %198, %205 : vector<2x360xf32>
    %207 = vector.broadcast %190 : f32 to vector<2x360xf32>
    %208 = arith.mulf %206, %207 : vector<2x360xf32>
    %209 = vector.broadcast %191 : f32 to vector<2x360xf32>
    %210 = arith.addf %208, %209 : vector<2x360xf32>
    %cst_104 = arith.constant 0.000000e+00 : f32
    %211 = vector.broadcast %cst_104 : f32 to vector<2x360xf32>
    %212 = arith.maximumf %210, %211 : vector<2x360xf32>
    %c6_105 = arith.constant 6 : index
    %c0_106 = arith.constant 0 : index
    %c0_107 = arith.constant 0 : index
    %213 = vector.load %arg3[%c6_105, %c0_106, %c0_107] : memref<8x360x256xf32, #tpu.memory_space<vmem>>, vector<1x360x256xf32>
    %214 = vector.shape_cast %213 : vector<1x360x256xf32> to vector<360x256xf32>
    %cst_108 = arith.constant dense<0.000000e+00> : vector<2x256xf32>
    %215 = tpu.matmul %212, %214, %cst_108 {dimension_numbers = #tpu.dot_dimension_numbers<[1], [0], [0], [1], [0, 0, 1, 1], [], []>} : vector<2x360xf32>, vector<360x256xf32>, vector<2x256xf32> -> vector<2x256xf32>
    %216 = arith.addf %186, %215 : vector<2x256xf32>
    %c0_109 = arith.constant 0 : index
    %c7 = arith.constant 7 : index
    %217 = memref.load %arg1[%c0_109, %c7] : memref<5x8xf32, #tpu.memory_space<smem>>
    %c1_110 = arith.constant 1 : index
    %c7_111 = arith.constant 7 : index
    %218 = memref.load %arg1[%c1_110, %c7_111] : memref<5x8xf32, #tpu.memory_space<smem>>
    %c2_112 = arith.constant 2 : index
    %c7_113 = arith.constant 7 : index
    %219 = memref.load %arg1[%c2_112, %c7_113] : memref<5x8xf32, #tpu.memory_space<smem>>
    %c3_114 = arith.constant 3 : index
    %c7_115 = arith.constant 7 : index
    %220 = memref.load %arg1[%c3_114, %c7_115] : memref<5x8xf32, #tpu.memory_space<smem>>
    %c4_116 = arith.constant 4 : index
    %c7_117 = arith.constant 7 : index
    %221 = memref.load %arg1[%c4_116, %c7_117] : memref<5x8xf32, #tpu.memory_space<smem>>
    %222 = vector.broadcast %217 : f32 to vector<2x360xf32>
    %223 = arith.mulf %222, %1 : vector<2x360xf32>
    %224 = vector.broadcast %218 : f32 to vector<2x360xf32>
    %225 = arith.mulf %224, %3 : vector<2x360xf32>
    %226 = arith.addf %223, %225 : vector<2x360xf32>
    %227 = vector.broadcast %219 : f32 to vector<2x360xf32>
    %228 = arith.addf %226, %227 : vector<2x360xf32>
    %229 = vector.broadcast %217 : f32 to vector<2x360xf32>
    %230 = arith.mulf %229, %5 : vector<2x360xf32>
    %231 = vector.broadcast %218 : f32 to vector<2x360xf32>
    %232 = arith.mulf %231, %7 : vector<2x360xf32>
    %233 = arith.addf %230, %232 : vector<2x360xf32>
    %234 = vector.broadcast %219 : f32 to vector<2x360xf32>
    %235 = arith.addf %233, %234 : vector<2x360xf32>
    %236 = arith.maximumf %228, %235 : vector<2x360xf32>
    %237 = vector.broadcast %220 : f32 to vector<2x360xf32>
    %238 = arith.mulf %236, %237 : vector<2x360xf32>
    %239 = vector.broadcast %221 : f32 to vector<2x360xf32>
    %240 = arith.addf %238, %239 : vector<2x360xf32>
    %cst_118 = arith.constant 0.000000e+00 : f32
    %241 = vector.broadcast %cst_118 : f32 to vector<2x360xf32>
    %242 = arith.maximumf %240, %241 : vector<2x360xf32>
    %c7_119 = arith.constant 7 : index
    %c0_120 = arith.constant 0 : index
    %c0_121 = arith.constant 0 : index
    %243 = vector.load %arg3[%c7_119, %c0_120, %c0_121] : memref<8x360x256xf32, #tpu.memory_space<vmem>>, vector<1x360x256xf32>
    %244 = vector.shape_cast %243 : vector<1x360x256xf32> to vector<360x256xf32>
    %cst_122 = arith.constant dense<0.000000e+00> : vector<2x256xf32>
    %245 = tpu.matmul %242, %244, %cst_122 {dimension_numbers = #tpu.dot_dimension_numbers<[1], [0], [0], [1], [0, 0, 1, 1], [], []>} : vector<2x360xf32>, vector<360x256xf32>, vector<2x256xf32> -> vector<2x256xf32>
    %246 = arith.addf %216, %245 : vector<2x256xf32>
    %c0_123 = arith.constant 0 : index
    %c0_124 = arith.constant 0 : index
    %247 = vector.load %arg4[%c0_123, %c0_124] : memref<1x256xf32, #tpu.memory_space<vmem>>, vector<1x256xf32>
    %248 = vector.broadcast %247 : vector<1x256xf32> to vector<2x256xf32>
    %249 = arith.addf %246, %248 : vector<2x256xf32>
    %cst_125 = arith.constant 0.000000e+00 : f32
    %250 = vector.broadcast %cst_125 : f32 to vector<2x256xf32>
    %251 = arith.maximumf %249, %250 : vector<2x256xf32>
    %c0_126 = arith.constant 0 : index
    %c0_127 = arith.constant 0 : index
    %252 = vector.load %arg5[%c0_126, %c0_127] : memref<256x32xf32, #tpu.memory_space<vmem>>, vector<256x32xf32>
    %cst_128 = arith.constant dense<0.000000e+00> : vector<2x32xf32>
    %253 = tpu.matmul %251, %252, %cst_128 {dimension_numbers = #tpu.dot_dimension_numbers<[1], [0], [0], [1], [0, 0, 1, 1], [], []>} : vector<2x256xf32>, vector<256x32xf32>, vector<2x32xf32> -> vector<2x32xf32>
    %c0_129 = arith.constant 0 : index
    %c0_130 = arith.constant 0 : index
    %254 = vector.load %arg6[%c0_129, %c0_130] : memref<1x32xf32, #tpu.memory_space<vmem>>, vector<1x32xf32>
    %255 = vector.broadcast %254 : vector<1x32xf32> to vector<2x32xf32>
    %256 = arith.addf %253, %255 : vector<2x32xf32>
    %cst_131 = arith.constant 0.000000e+00 : f32
    %257 = vector.broadcast %cst_131 : f32 to vector<2x32xf32>
    %258 = arith.maximumf %256, %257 : vector<2x32xf32>
    %c0_132 = arith.constant 0 : index
    %c0_133 = arith.constant 0 : index
    %259 = vector.load %arg7[%c0_132, %c0_133] : memref<32x4xf32, #tpu.memory_space<vmem>>, vector<32x4xf32>
    %cst_134 = arith.constant dense<0.000000e+00> : vector<2x4xf32>
    %260 = tpu.matmul %258, %259, %cst_134 {dimension_numbers = #tpu.dot_dimension_numbers<[1], [0], [0], [1], [0, 0, 1, 1], [], []>} : vector<2x32xf32>, vector<32x4xf32>, vector<2x4xf32> -> vector<2x4xf32>
    %c0_135 = arith.constant 0 : index
    %c0_136 = arith.constant 0 : index
    %261 = vector.load %arg8[%c0_135, %c0_136] : memref<1x4xf32, #tpu.memory_space<vmem>>, vector<1x4xf32>
    %262 = vector.broadcast %261 : vector<1x4xf32> to vector<2x4xf32>
    %263 = arith.addf %260, %262 : vector<2x4xf32>
    %cst_137 = arith.constant dense<0xFF800000> : vector<2xf32>
    %264 = vector.multi_reduction <maximumf>, %263, %cst_137 [1] : vector<2x4xf32> to vector<2xf32>
    %265 = vector.shape_cast %264 : vector<2xf32> to vector<2x1xf32>
    %266 = vector.broadcast %265 : vector<2x1xf32> to vector<2x4xf32>
    %267 = arith.subf %263, %266 : vector<2x4xf32>
    %268 = math.exp %267 : vector<2x4xf32>
    %cst_138 = arith.constant dense<0.000000e+00> : vector<2xf32>
    %269 = vector.multi_reduction <add>, %268, %cst_138 [1] : vector<2x4xf32> to vector<2xf32>
    %270 = vector.shape_cast %269 : vector<2xf32> to vector<2x1xf32>
    %271 = vector.broadcast %270 : vector<2x1xf32> to vector<2x4xf32>
    %272 = arith.divf %268, %271 : vector<2x4xf32>
    %c0_139 = arith.constant 0 : index
    %c0_140 = arith.constant 0 : index
    %273 = vector.load %arg9[%c0_139, %c0_140] : memref<2x4xf32, #tpu.memory_space<vmem>>, vector<2x4xf32>
    tpu.vector_store %arg9[%c0_139, %c0_140], %272 {strides = array<i32>} : memref<2x4xf32, #tpu.memory_space<vmem>>, vector<2x4xf32>,
    return
  }
  func.func @transform_0(%arg0: i32) -> (i32, i32) {
    %c0_i32 = arith.constant 0 : i32
    %c0_i32_0 = arith.constant 0 : i32
    %c0_i32_1 = arith.constant 0 : i32
    return %c0_i32, %c0_i32_0 : i32, i32
  }
  func.func @transform_1(%arg0: i32) -> (i32, i32, i32) {
    %c0_i32 = arith.constant 0 : i32
    %c0_i32_0 = arith.constant 0 : i32
    %c0_i32_1 = arith.constant 0 : i32
    return %c0_i32, %arg0, %c0_i32_0 : i32, i32, i32
  }
  func.func @transform_2(%arg0: i32) -> (i32, i32, i32) {
    %c0_i32 = arith.constant 0 : i32
    %c0_i32_0 = arith.constant 0 : i32
    %c0_i32_1 = arith.constant 0 : i32
    %c0_i32_2 = arith.constant 0 : i32
    return %c0_i32, %c0_i32_0, %c0_i32_1 : i32, i32, i32
  }
  func.func @transform_3(%arg0: i32) -> (i32, i32) {
    %c0_i32 = arith.constant 0 : i32
    %c0_i32_0 = arith.constant 0 : i32
    %c0_i32_1 = arith.constant 0 : i32
    return %c0_i32, %c0_i32_0 : i32, i32
  }
  func.func @transform_4(%arg0: i32) -> (i32, i32) {
    %c0_i32 = arith.constant 0 : i32
    %c0_i32_0 = arith.constant 0 : i32
    %c0_i32_1 = arith.constant 0 : i32
    return %c0_i32, %c0_i32_0 : i32, i32
  }
  func.func @transform_5(%arg0: i32) -> (i32, i32) {
    %c0_i32 = arith.constant 0 : i32
    %c0_i32_0 = arith.constant 0 : i32
    %c0_i32_1 = arith.constant 0 : i32
    return %c0_i32, %c0_i32_0 : i32, i32
  }
  func.func @transform_6(%arg0: i32) -> (i32, i32) {
    %c0_i32 = arith.constant 0 : i32
    %c0_i32_0 = arith.constant 0 : i32
    %c0_i32_1 = arith.constant 0 : i32
    return %c0_i32, %c0_i32_0 : i32, i32
  }
  func.func @transform_7(%arg0: i32) -> (i32, i32) {
    %c0_i32 = arith.constant 0 : i32
    %c0_i32_0 = arith.constant 0 : i32
    %c0_i32_1 = arith.constant 0 : i32
    return %c0_i32, %c0_i32_0 : i32, i32
  }
  func.func @transform_8(%arg0: i32) -> (i32, i32) {
    %c0_i32 = arith.constant 0 : i32
    %c0_i32_0 = arith.constant 0 : i32
    return %arg0, %c0_i32 : i32, i32
  }
}

</mosaic_0001>

<bundles_post_ra>
// kernel: extempconvlg_forward.1
= control target key start
LH: loop header
LB: loop body
LE: loop exit
PB: predicated region body
PF: predicated region fallthrough
CT: control target
= control target key end

     0   :  { %13 = vsyncpa [#allocation5], 0  ;;  %s4161_s0 = inlined_call_operand.hbm [shape: f32[5,8], index: 0, kind: input, shape index: {}]   ;;  %s4162_s1 = inlined_call_operand.vmem [shape: f32[4,2,360], index: 1, kind: input, shape index: {}]   ;;  %s4163_s2 = inlined_call_operand.hbm [shape: f32[8,360,256], index: 2, kind: input, shape index: {}]   ;;  %s4164_s3 = inlined_call_operand.hbm [shape: f32[1,256], index: 3, kind: input, shape index: {}]   ;;  %s4165_s4 = inlined_call_operand.vmem [shape: f32[256,32], index: 4, kind: input, shape index: {}]   ;;  %s4166_s5 = inlined_call_operand.hbm [shape: f32[1,32], index: 5, kind: input, shape index: {}]   ;;  %s4167_s6 = inlined_call_operand.vmem [shape: f32[32,4], index: 6, kind: input, shape index: {}]   ;;  %s4168_s7 = inlined_call_operand.hbm [shape: f32[1,4], index: 7, kind: input, shape index: {}]   ;;  %s4169_s8 = inlined_call_operand.hbm [shape: f32[2,4], index: 8, kind: output, shape index: {}]  }
   0x1   :  { %14 = vsyncpa [#allocation3], 0 }
   0x2   :  { %15 = vsyncpa [#allocation8], 0 }
   0x3   :  { %16 = vsyncpa [#allocation11], 0 }
   0x4   :  { %17 = vsyncpa [#allocation4], 0  ;;  %s3585_s27 = smov [#allocation7]   ;;  %s3586_s29 = smov [#allocation6]  }
   0x5   :  { %s46_s28 = sshll.u32 %s3585_s27, 4  ;;  %s33_s30 = sshll.u32 %s3586_s29, 4  ;;  %s47_s28 = int_to_ptr.vmem [resolvable:$true] %s46_s28  ;;  %s34_s30 = int_to_ptr.vmem [resolvable:$true] %s33_s30 }
   0x6   :  { %s3455_s11 = scalar_lea.hbm %s4164_s3, 32 }
   0x7   :  { %p3456_p0 = scmp.ne.s32.totalorder %s4164_s3, %s3455_s11  ;;  %p3459_p1 = scmp.lt.u32.totalorder %s3455_s11, %s4164_s3 }
   0x9   :  { %p3461_p2 = pnand %p3459_p1, %p3456_p0 }
   0xb   :  { %3464 = shalt.err (!%p3461_p2)
}
   0xc   :  { %s3465_s16 = scalar_lea.vmem %s47_s28, 32  ;;  %p3470_p4 = scmp.lt.s32.totalorder %s47_s28, %s47_s28 }
   0xd   :  { %p3466_p3 = scmp.ne.s32.totalorder %s47_s28, %s3465_s16  ;;  %p3471_p5 = scmp.lt.s32.totalorder %s3465_s16, %s3465_s16 }
   0xf   :  { %p3472_p6 = por %p3471_p5, %p3470_p4 }
  0x11   :  { %p3473_p7 = pnand %p3472_p6, %p3466_p3 }
  0x13   :  { %3476 = shalt.err (!%p3473_p7)
}
  0x14   :  { %49 = dma.hbm_to_vmem [thread:$0]  %s4164_s3, 32, %s47_s28, [#allocation8]  }
  0x15   :  { %s3477_s21 = scalar_lea.hbm %s4161_s0, 128 }
  0x16   :  { %p3478_p8 = scmp.ne.s32.totalorder %s4161_s0, %s3477_s21  ;;  %p3481_p9 = scmp.lt.u32.totalorder %s3477_s21, %s4161_s0 }
  0x18   :  { %p3483_p10 = pnand %p3481_p9, %p3478_p8 }
  0x1a   :  { %3486 = shalt.err (!%p3483_p10)
}
  0x1b   :  { %s3587_s26 = smov [#allocation2]   ;;  %s3487_s9 = scalar_lea.hbm %s4163_s2, 92160 }
  0x1c   :  { %25 = dma.hbm_to_smem %s4161_s0, 128, %s3587_s26, [#allocation5]  }
  0x1d   :  { %p3488_p11 = scmp.ne.s32.totalorder %s4163_s2, %s3487_s9  ;;  %p3491_p12 = scmp.lt.u32.totalorder %s3487_s9, %s4163_s2 }
  0x1f   :  { %p3493_p13 = pnand %p3491_p12, %p3488_p11 }
  0x21   :  { %3496 = shalt.err (!%p3493_p13)
}
  0x22   :  { %s3497_s14 = scalar_lea.vmem %s34_s30, 92160  ;;  %p3502_p1 = scmp.lt.s32.totalorder %s34_s30, %s34_s30 }
  0x23   :  { %p3498_p0 = scmp.ne.s32.totalorder %s34_s30, %s3497_s14  ;;  %p3503_p2 = scmp.lt.s32.totalorder %s3497_s14, %s3497_s14 }
  0x25   :  { %p3504_p3 = por %p3503_p2, %p3502_p1 }
  0x27   :  { %p3505_p4 = pnand %p3504_p3, %p3498_p0 }
  0x29   :  { %3508 = shalt.err (!%p3505_p4)
}
  0x2a   :  { %s3588_s0 = smov 256   ;;  %s3589_s15 = smov 16  }
  0x2b   :  { %39 = dma.hbm_to_vmem [thread:$0]  %s4163_s2, 92160, %s34_s30, [#allocation3], %s3588_s0, %s3588_s0, %s3589_s15  }
  0x2c   :  { %s3590_s18 = smov [#allocation9]   ;;  %s3591_s20 = smov [#allocation10]  }
  0x2d   :  { %s58_s19 = sshll.u32 %s3590_s18, 4  ;;  %s70_s21 = sshll.u32 %s3591_s20, 4  ;;  %s59_s19 = int_to_ptr.vmem [resolvable:$true] %s58_s19  ;;  %s71_s21 = int_to_ptr.vmem [resolvable:$true] %s70_s21 }
  0x2e   :  { %s3509_s24 = scalar_lea.hbm %s4166_s5, 16 }
  0x2f   :  { %p3510_p5 = scmp.ne.s32.totalorder %s4166_s5, %s3509_s24  ;;  %p3513_p6 = scmp.lt.u32.totalorder %s3509_s24, %s4166_s5 }
  0x31   :  { %p3515_p7 = pnand %p3513_p6, %p3510_p5 }
  0x33   :  { %3518 = shalt.err (!%p3515_p7)
}
  0x34   :  { %s3519_s2 = scalar_lea.vmem %s59_s19, 16  ;;  %s3523_s30 = scalar_lea.vmem %s59_s19, 32 }
  0x35   :  { %p3520_p8 = scmp.ne.s32.totalorder %s59_s19, %s3519_s2  ;;  %p3524_p9 = scmp.lt.s32.totalorder %s59_s19, %s59_s19 }
  0x36   :  { %p3525_p10 = scmp.lt.s32.totalorder %s3523_s30, %s3519_s2 }
  0x38   :  { %p3526_p11 = por %p3525_p10, %p3524_p9 }
  0x3a   :  { %p3527_p12 = pnand %p3526_p11, %p3520_p8 }
  0x3c   :  { %3530 = shalt.err (!%p3527_p12)
}
  0x3d   :  { %61 = dma.hbm_to_vmem [thread:$0]  %s4166_s5, 16, %s59_s19, [#allocation8]  }
  0x3e   :  { %s3531_s11 = scalar_lea.hbm %s4168_s7, 16 }
  0x3f   :  { %p3532_p13 = scmp.ne.s32.totalorder %s4168_s7, %s3531_s11  ;;  %p3535_p0 = scmp.lt.u32.totalorder %s3531_s11, %s4168_s7 }
  0x41   :  { %p3537_p1 = pnand %p3535_p0, %p3532_p13 }
  0x43   :  { %3540 = shalt.err (!%p3537_p1)
}
  0x44   :  { %s3541_s15 = scalar_lea.vmem %s71_s21, 16  ;;  %s3545_s16 = scalar_lea.vmem %s71_s21, 32 }
  0x45   :  { %p3542_p2 = scmp.ne.s32.totalorder %s71_s21, %s3541_s15  ;;  %p3546_p3 = scmp.lt.s32.totalorder %s71_s21, %s71_s21 }
  0x46   :  { %p3547_p4 = scmp.lt.s32.totalorder %s3545_s16, %s3541_s15 }
  0x48   :  { %p3548_p5 = por %p3547_p4, %p3546_p3 }
  0x4a   :  { %p3549_p6 = pnand %p3548_p5, %p3542_p2 }
  0x4c   :  { %3552 = shalt.err (!%p3549_p6)
}
  0x4d   :  { %73 = dma.hbm_to_vmem [thread:$0]  %s4168_s7, 16, %s71_s21, [#allocation11]  }
  0x4e   :  { %3575 = dma.done.wait [#allocation5], 128  }
  0x4f   :  { %3576 = vsyncadd [#allocation5], 4294967168 }
  0x50   :  { %3577 = dma.done.wait [#allocation3], 92160  }
  0x51   :  { %3578 = vsyncadd [#allocation3], 4294875136 }
  0x52   :  { %3579 = dma.done.wait [#allocation8], 48  }
  0x53   :  { %3580 = vsyncadd [#allocation8], 4294967248 }
  0x54   :  { %3581 = dma.done.wait [#allocation11], 16  }
  0x55   :  { %3582 = vsyncadd [#allocation11], 4294967280 }
  0x56   :  { %89 = sfence }
  0x57   :  { %v233_v0 = vld [vmem:[#allocation6 + $0x2d8] sm:$0xff]  ;;  %v235_v1 = vld [vmem:[#allocation6 + $0x2e8] sm:$0xff]  ;;  %v232_v5 = vld [vmem:[#allocation6 + $0x2d0] sm:$0xff]  ;;  %v3592_v7 = vmov 0.0   ;;  %s3703_s7 = sld [smem:[#allocation2]]  ;;  %s3709_s20 = sld [smem:[#allocation2 + $0x1]] }
  0x58   :  { %v184_v2 = vld [vmem:[#allocation6 + $0x208] sm:$0xff]  ;;  %v2663_v3 = vpack.c.bf16 %v235_v1, %v233_v0  ;;  %v186_v4 = vld [vmem:[#allocation6 + $0x218] sm:$0xff]  ;;  %v234_v6 = vld [vmem:[#allocation6 + $0x2e0] sm:$0xff]  ;;  %642 = vmatprep.mubr.f32.mxu0 %v3592_v7  ;;  %s3705_s18 = sld [smem:[#allocation2 + $0x80]]  ;;  %s3713_s22 = sld [smem:[#allocation2 + $0x81]]  ;;  %vm341_vm0 = vcmask 850944  }
  0x59   :  { %v2815_v8 = vpack.c.bf16 %v186_v4, %v184_v2  ;;  %v2665_v9 = vpack.c.bf16 %v234_v6, %v232_v5  ;;  %v183_v10 = vld [vmem:[#allocation6 + $0x200] sm:$0xff]  ;;  %v185_v11 = vld [vmem:[#allocation6 + $0x210] sm:$0xff]  ;;  %v237_v12 = vld [vmem:[#allocation6 + $0x2f8] sm:$0xff]  ;;  %s3707_s19 = sld [smem:[#allocation2 + $0x100]]  ;;  %s3715_s23 = sld [smem:[#allocation2 + $0x2]]  ;;  %vm3595_vm1 = vmmov 0  }
  0x5a   :  { %2664 = vmatprep.subr.bf16.mxu1 %v2663_v3  ;;  %v2817_v13 = vpack.c.bf16 %v185_v11, %v183_v10  ;;  %v239_v14 = vld [vmem:[#allocation6 + $0x308] sm:$0xff]  ;;  %v190_v16 = vld [vmem:[#allocation6 + $0x238] sm:$0xff]  ;;  %v236_v19 = vld [vmem:[#allocation6 + $0x2f0] sm:$0xff]  ;;  %s3711_s21 = sld [smem:[#allocation2 + $0x180]]  ;;  %s3719_s24 = sld [smem:[#allocation2 + $0x82]]  ;;  %vm2454_vm2 = vcmask 261120  }
  0x5b   :  { %v188_v15 = vld [vmem:[#allocation6 + $0x228] sm:$0xff]  ;;  %2816 = vmatprep.subr.bf16.mxu0 %v2815_v8  ;;  %2666 = vmatpush1.bf16.msra.mxu1 %v2665_v9  ;;  %v2667_v17 = vpack.c.bf16 %v239_v14, %v237_v12  ;;  %v238_v20 = vld [vmem:[#allocation6 + $0x300] sm:$0xff]  ;;  %v189_v23 = vld [vmem:[#allocation6 + $0x230] sm:$0xff]  ;;  %s3721_s25 = sld [smem:[#allocation2 + $0x200]]  ;;  %s3748_s10 = sld [smem:[#allocation2 + $0x101]]  ;;  %vm2528_vm3 = vcmask 25600  }
  0x5c   :  { %v2819_v18 = vpack.c.bf16 %v190_v16, %v188_v15  ;;  %v187_v21 = vld [vmem:[#allocation6 + $0x220] sm:$0xff]  ;;  %2818 = vmatpush1.bf16.msra.mxu0 %v2817_v13  ;;  %v2669_v22 = vpack.c.bf16 %v238_v20, %v236_v19  ;;  %v241_v24 = vld [vmem:[#allocation6 + $0x318] sm:$0xff]  ;;  %v243_v25 = vld [vmem:[#allocation6 + $0x328] sm:$0xff]  ;;  %v327_v15 = vlaneseq  ;;  %v3593_v20 = vmov 1983009808   ;;  %s3756_s11 = sld [smem:[#allocation2 + $0x102]] }
  0x5d   :  { %2668 = vmatprep.subr.bf16.mxu1 %v2667_v17  ;;  %v2821_v26 = vpack.c.bf16 %v189_v23, %v187_v21  ;;  %v2671_v27 = vpack.c.bf16 %v243_v25, %v241_v24  ;;  %v192_v28 = vld [vmem:[#allocation6 + $0x248] sm:$0xff]  ;;  %v194_v29 = vld [vmem:[#allocation6 + $0x258] sm:$0xff]  ;;  %v240_v30 = vld [vmem:[#allocation6 + $0x310] sm:$0xff]  ;;  %v102_v3 = vstv %s3703_s7  ;;  %v3746_v21 = vunpack.c.l.s4 %v3593_v20  ;;  %s3764_s12 = sld [smem:[#allocation2 + $0x181]]  ;;  %s3782_s14 = sld [smem:[#allocation2 + $0x182]] }
  0x5e   :  { %2820 = vmatprep.subr.bf16.mxu0 %v2819_v18  ;;  %v2823_v31 = vpack.c.bf16 %v194_v29, %v192_v28  ;;  %v242_v32 = vld [vmem:[#allocation6 + $0x320] sm:$0xff]  ;;  %v193_v34 = vld [vmem:[#allocation6 + $0x250] sm:$0xff]  ;;  %v245_v36 = vld [vmem:[#allocation6 + $0x338] sm:$0xff]  ;;  %v104_v4 = vstv %s3705_s18  ;;  %v214_v25 = vstv %s3709_s20  ;;  %s3770_s13 = sld [smem:[#allocation2 + $0x201]]  ;;  %s3789_s0 = sld [smem:[#allocation2 + $0x202]] }
  0x5f   :  { %v191_v33 = vld [vmem:[#allocation6 + $0x240] sm:$0xff]  ;;  %2670 = vmatpush1.bf16.msra.mxu1 %v2669_v22  ;;  %v2673_v35 = vpack.c.bf16 %v242_v32, %v240_v30  ;;  %v247_v37 = vld [vmem:[#allocation6 + $0x348] sm:$0xff]  ;;  %v198_v41 = vld [vmem:[#allocation6 + $0x278] sm:$0xff]  ;;  %v107_v23 = vstv %s3707_s19  ;;  %s3796_s15 = sld [smem:[#allocation2 + $0x3]]  ;;  %s3828_s18 = sld [smem:[#allocation2 + $0x4]] }
  0x60   :  { %v196_v38 = vld [vmem:[#allocation6 + $0x268] sm:$0xff]  ;;  %2822 = vmatpush1.bf16.msra.mxu0 %v2821_v26  ;;  %2672 = vmatprep.subr.bf16.mxu1 %v2671_v27  ;;  %v2825_v39 = vpack.c.bf16 %v193_v34, %v191_v33  ;;  %v2675_v40 = vpack.c.bf16 %v247_v37, %v245_v36  ;;  %v244_v42 = vld [vmem:[#allocation6 + $0x330] sm:$0xff]  ;;  %v246_v43 = vld [vmem:[#allocation6 + $0x340] sm:$0xff]  ;;  %v216_v34 = vstv %s3713_s22  ;;  %v3754_v37 = vshrl.u32 %v327_v15, 7  ;;  %s3802_s16 = sld [smem:[#allocation2 + $0x83]]  ;;  %s3831_s19 = sld [smem:[#allocation2 + $0x84]] }
  0x61   :  { %2824 = vmatprep.subr.bf16.mxu0 %v2823_v31  ;;  %v2827_v44 = vpack.c.bf16 %v198_v41, %v196_v38  ;;  %v195_v45 = vld [vmem:[#allocation6 + $0x260] sm:$0xff]  ;;  %v197_v46 = vld [vmem:[#allocation6 + $0x270] sm:$0xff]  ;;  %v249_v47 = vld [vmem:[#allocation6 + $0x358] sm:$0xff]  ;;  %v2677_v51 = vpack.c.bf16 %v246_v43, %v244_v42  ;;  %s3808_s5 = sld [smem:[#allocation2 + $0x103]]  ;;  %s3833_s20 = sld [smem:[#allocation2 + $0x5]] }
  0x62   :  { %v251_v48 = vld [vmem:[#allocation6 + $0x368] sm:$0xff]  ;;  %v202_v50 = vld [vmem:[#allocation6 + $0x298] sm:$0xff]  ;;  %v2829_v52 = vpack.c.bf16 %v197_v46, %v195_v45  ;;  %v248_v54 = vld [vmem:[#allocation6 + $0x350] sm:$0xff]  ;;  %v656_v45 = vstv %s3719_s24  ;;  %v114_v46 = vstv %s3711_s21  ;;  %s3819_s17 = sld [smem:[#allocation2 + $0x183]]  ;;  %s3835_s21 = sld [smem:[#allocation2 + $0x85]] }
  0x63   :  { %v200_v49 = vld [vmem:[#allocation6 + $0x288] sm:$0xff]  ;;  %2674 = vmatpush1.bf16.msra.mxu1 %v2673_v35  ;;  %v2679_v53 = vpack.c.bf16 %v251_v48, %v249_v47  ;;  %v250_v55 = vld [vmem:[#allocation6 + $0x360] sm:$0xff]  ;;  %v201_v58 = vld [vmem:[#allocation6 + $0x290] sm:$0xff]  ;;  %v116_v47 = vstv %s3721_s25  ;;  %s3823_s7 = sld [smem:[#allocation2 + $0x203]]  ;;  %s3844_s22 = sld [smem:[#allocation2 + $0x104]] }
  0x64   :  { %2826 = vmatpush1.bf16.msra.mxu0 %v2825_v39  ;;  %2676 = vmatprep.subr.bf16.mxu1 %v2675_v40  ;;  %v199_v56 = vld [vmem:[#allocation6 + $0x280] sm:$0xff]  ;;  %v2831_v57 = vpack.c.bf16 %v202_v50, %v200_v49  ;;  %v253_v59 = vld [vmem:[#allocation6 + $0x378] sm:$0xff]  ;;  %v255_v60 = vld [vmem:[#allocation6 + $0x388] sm:$0xff]  ;;  %v2681_v63 = vpack.c.bf16 %v250_v55, %v248_v54  ;;  %v654_v40 = vstv %s3715_s23  ;;  %s3849_s23 = sld [smem:[#allocation2 + $0x105]]  ;;  %s3862_s24 = sld [smem:[#allocation2 + $0x184]] }
  0x65   :  { %2828 = vmatprep.subr.bf16.mxu0 %v2827_v44  ;;  %v204_v61 = vld [vmem:[#allocation6 + $0x2a8] sm:$0xff]  ;;  %v206_v62 = vld [vmem:[#allocation6 + $0x2b8] sm:$0xff]  ;;  %v252_v0 = vld [vmem:[#allocation6 + $0x370] sm:$0xff]  ;;  %v2833_v5 = vpack.c.bf16 %v201_v58, %v199_v56  ;;  %v2683_v6 = vpack.c.bf16 %v255_v60, %v253_v59  ;;  %v326_v44 = vunpack.c.0.s8 %v3746_v21  ;;  %s3865_s25 = sld [smem:[#allocation2 + $0x185]]  ;;  %s3869_s26 = sld [smem:[#allocation2 + $0x204]] }
  0x66   :  { %v254_v1 = vld [vmem:[#allocation6 + $0x380] sm:$0xff]  ;;  %v205_v8 = vld [vmem:[#allocation6 + $0x2b0] sm:$0xff]  ;;  %v257_v9 = vld [vmem:[#allocation6 + $0x398] sm:$0xff]  ;;  %v2835_v11 = vpack.c.bf16 %v206_v62, %v204_v61  ;;  %v219_v61 = vstv %s3748_s10  ;;  %s3876_s27 = sld [smem:[#allocation2 + $0x205]]  ;;  %s3907_s29 = sld [smem:[#allocation2 + $0x6]] }
  0x67   :  { %2678 = vmatpush1.bf16.msra.mxu1 %v2677_v51  ;;  %v203_v2 = vld [vmem:[#allocation6 + $0x2a0] sm:$0xff]  ;;  %v259_v10 = vld [vmem:[#allocation6 + $0x3a8] sm:$0xff]  ;;  %v3741_v16 = vld [vmem:[%s4162_s1 + $0x12] sm:$0x3f]  ;;  %v2685_v22 = vpack.c.bf16 %v254_v1, %v252_v0  ;;  %v3777_v15 = vsub.s32 %v326_v44, %v3754_v37  ;;  %s3909_s2 = sld [smem:[#allocation2 + $0x86]] }
  0x68   :  { %2830 = vmatpush1.bf16.msra.mxu0 %v2829_v52  ;;  %2680 = vmatprep.subr.bf16.mxu1 %v2679_v53  ;;  %v3726_v12 = vld [vmem:[%s4162_s1] sm:$0x3f]  ;;  %v3731_v13 = vld [vmem:[%s4162_s1 + $0x6] sm:$0x3f]  ;;  %v3736_v14 = vld [vmem:[%s4162_s1 + $0xc] sm:$0x3f]  ;;  %v110_v24 = vmul.f32 %v3741_v16, %v104_v4  ;;  %v2837_v26 = vpack.c.bf16 %v205_v8, %v203_v2  ;;  %v2687_v27 = vpack.c.bf16 %v259_v10, %v257_v9 }
  0x69   :  { %2832 = vmatprep.subr.bf16.mxu0 %v2831_v57  ;;  %v103_v17 = vmul.f32 %v102_v3, %v3726_v12  ;;  %v105_v18 = vmul.f32 %v3731_v13, %v104_v4  ;;  %v109_v19 = vmul.f32 %v3736_v14, %v102_v3  ;;  %v256_v28 = vld [vmem:[#allocation6 + $0x390] sm:$0xff]  ;;  %v258_v29 = vld [vmem:[#allocation6 + $0x3a0] sm:$0xff]  ;;  %v261_v32 = vld [vmem:[#allocation6 + $0x3b8] sm:$0xff]  ;;  %v215_v41 = vmul.f32 %v214_v25, %v3726_v12  ;;  %s3911_s30 = sld [smem:[#allocation2 + $0x106]] }
  0x6a   :  { %v263_v33 = vld [vmem:[#allocation6 + $0x3c8] sm:$0xff]  ;;  %v739_v39 = vld [vmem:[#allocation6 + $0x7b8] sm:$0xff]  ;;  %v2689_v42 = vpack.c.bf16 %v258_v29, %v256_v28  ;;  %v260_v49 = vld [vmem:[#allocation6 + $0x3b0] sm:$0xff]  ;;  %v217_v51 = vmul.f32 %v3731_v13, %v216_v34  ;;  %v655_v57 = vmul.f32 %v654_v40, %v3726_v12  ;;  %v221_v58 = vmul.f32 %v3736_v14, %v214_v25 }
  0x6b   :  { %2682 = vmatpush1.bf16.msra.mxu1 %v2681_v63  ;;  %v106_v30 = vadd.f32 %v105_v18, %v103_v17  ;;  %v111_v31 = vadd.f32 %v110_v24, %v109_v19  ;;  %v208_v35 = vld [vmem:[#allocation6 + $0x2c8] sm:$0xff]  ;;  %v2691_v48 = vpack.c.bf16 %v263_v33, %v261_v32  ;;  %v262_v50 = vld [vmem:[#allocation6 + $0x3c0] sm:$0xff]  ;;  %v265_v55 = vld [vmem:[#allocation6 + $0x3d8] sm:$0xff]  ;;  %v657_v59 = vmul.f32 %v3731_v13, %v656_v45 }
  0x6c   :  { %2834 = vmatpush1.bf16.msra.mxu0 %v2833_v5  ;;  %2684 = vmatprep.subr.bf16.mxu1 %v2683_v6  ;;  %v737_v38 = vld [vmem:[#allocation6 + $0x7a8] sm:$0xff]  ;;  %v207_v52 = vld [vmem:[#allocation6 + $0x2c0] sm:$0xff]  ;;  %v218_v60 = vadd.f32 %v217_v51, %v215_v41  ;;  %v222_v62 = vmul.f32 %v3741_v16, %v216_v34  ;;  %v2693_v0 = vpack.c.bf16 %v262_v50, %v260_v49  ;;  %v264_v4 = vld [vmem:[#allocation6 + $0x3d0] sm:$0xff]  ;;  %v659_v19 = vstv %s3756_s11 }
  0x6d   :  { %2836 = vmatprep.subr.bf16.mxu0 %v2835_v11  ;;  %v108_v36 = vadd.f32 %v107_v23, %v106_v30  ;;  %v112_v43 = vadd.f32 %v111_v31, %v107_v23  ;;  %v2903_v54 = vpack.c.bf16 %v739_v39, %v737_v38  ;;  %v267_v56 = vld [vmem:[#allocation6 + $0x3e8] sm:$0xff]  ;;  %v661_v1 = vmul.f32 %v3736_v14, %v654_v40  ;;  %v266_v5 = vld [vmem:[#allocation6 + $0x3e0] sm:$0xff]  ;;  %v269_v8 = vld [vmem:[#allocation6 + $0x3f8] sm:$0xff] }
  0x6e   :  { %v662_v2 = vmul.f32 %v3741_v16, %v656_v45  ;;  %v2695_v3 = vpack.c.bf16 %v267_v56, %v265_v55  ;;  %v271_v9 = vld [vmem:[#allocation6 + $0x408] sm:$0xff]  ;;  %v220_v10 = vadd.f32 %v219_v61, %v218_v60  ;;  %v223_v11 = vadd.f32 %v222_v62, %v221_v58  ;;  %v736_v17 = vld [vmem:[#allocation6 + $0x7a0] sm:$0xff]  ;;  %v738_v21 = vld [vmem:[#allocation6 + $0x7b0] sm:$0xff] }
  0x6f   :  { %2686 = vmatpush1.bf16.msra.mxu1 %v2685_v22  ;;  %v113_v53 = vmax.f32 %v108_v36, %v112_v43  ;;  %v658_v18 = vadd.f32 %v657_v59, %v655_v57  ;;  %v741_v22 = vld [vmem:[#allocation6 + $0x7c8] sm:$0xff]  ;;  %v743_v23 = vld [vmem:[#allocation6 + $0x7d8] sm:$0xff]  ;;  %v2697_v24 = vpack.c.bf16 %v266_v5, %v264_v4  ;;  %v268_v28 = vld [vmem:[#allocation6 + $0x3f0] sm:$0xff]  ;;  %v226_v30 = vstv %s3764_s12 }
  0x70   :  { %2838 = vmatpush1.bf16.msra.mxu0 %v2837_v26  ;;  %2688 = vmatprep.subr.bf16.mxu1 %v2687_v27  ;;  %v663_v25 = vadd.f32 %v662_v2, %v661_v1  ;;  %v224_v26 = vadd.f32 %v223_v11, %v219_v61  ;;  %v2699_v27 = vpack.c.bf16 %v271_v9, %v269_v8  ;;  %v270_v29 = vld [vmem:[#allocation6 + $0x400] sm:$0xff]  ;;  %v273_v32 = vld [vmem:[#allocation6 + $0x418] sm:$0xff]  ;;  %v275_v33 = vld [vmem:[#allocation6 + $0x428] sm:$0xff]  ;;  %v228_v39 = vstv %s3770_s13 }
  0x71   :  { %602 = vmatprep.subr.mxu0 %v208_v35  ;;  %v115_v63 = vmul.f32 %v114_v46, %v113_v53  ;;  %v2905_v35 = vpack.c.bf16 %v738_v21, %v736_v17  ;;  %v2907_v36 = vpack.c.bf16 %v743_v23, %v741_v22  ;;  %v660_v38 = vadd.f32 %v659_v19, %v658_v18  ;;  %v740_v41 = vld [vmem:[#allocation6 + $0x7c0] sm:$0xff]  ;;  %v745_v43 = vld [vmem:[#allocation6 + $0x7e8] sm:$0xff]  ;;  %v272_v49 = vld [vmem:[#allocation6 + $0x410] sm:$0xff] }
  0x72   :  { %v225_v34 = vmax.f32 %v220_v10, %v224_v26  ;;  %v2701_v44 = vpack.c.bf16 %v270_v29, %v268_v28  ;;  %v664_v45 = vadd.f32 %v663_v25, %v659_v19  ;;  %v274_v50 = vld [vmem:[#allocation6 + $0x420] sm:$0xff]  ;;  %v277_v51 = vld [vmem:[#allocation6 + $0x438] sm:$0xff]  ;;  %v746_v57 = vld [vmem:[#allocation6 + $0x7f0] sm:$0xff]  ;;  %v666_v2 = vstv %s3782_s14 }
  0x73   :  { %2690 = vmatpush1.bf16.msra.mxu1 %v2689_v42  ;;  %v117_v6 = vadd.f32 %v116_v47, %v115_v63  ;;  %v742_v42 = vld [vmem:[#allocation6 + $0x7d0] sm:$0xff]  ;;  %v747_v47 = vld [vmem:[#allocation6 + $0x7f8] sm:$0xff]  ;;  %v744_v56 = vld [vmem:[#allocation6 + $0x7e0] sm:$0xff]  ;;  %v2705_v59 = vpack.c.bf16 %v274_v50, %v272_v49 }
  0x74   :  { %603 = vmatpush1.msra.mxu0 %v207_v52  ;;  %2692 = vmatprep.subr.bf16.mxu1 %v2691_v48  ;;  %v227_v46 = vmul.f32 %v226_v30, %v225_v34  ;;  %v2703_v48 = vpack.c.bf16 %v275_v33, %v273_v32  ;;  %v279_v52 = vld [vmem:[#allocation6 + $0x448] sm:$0xff]  ;;  %v2911_v55 = vpack.c.bf16 %v747_v47, %v745_v43  ;;  %v751_v62 = vld [vmem:[#allocation6 + $0x818] sm:$0xff]  ;;  %v278_v1 = vld [vmem:[#allocation6 + $0x440] sm:$0xff]  ;;  %v934_v43 = vstv %s3802_s16  ;;  %s3973_s16 = sld [smem:[#allocation2 + $0x87]] }
  0x75   :  { %2904 = vmatprep.subr.bf16.mxu0 %v2903_v54  ;;  %v3780_v20 = vmax.f32 %v117_v6, 0.0  ;;  %v2909_v54 = vpack.c.bf16 %v742_v42, %v740_v41  ;;  %v749_v58 = vld [vmem:[#allocation6 + $0x808] sm:$0xff]  ;;  %v665_v60 = vmax.f32 %v660_v38, %v664_v45  ;;  %v2707_v63 = vpack.c.bf16 %v279_v52, %v277_v51  ;;  %v748_v9 = vld [vmem:[#allocation6 + $0x800] sm:$0xff]  ;;  %v750_v10 = vld [vmem:[#allocation6 + $0x810] sm:$0xff] }
  0x76   :  { %v229_v53 = vadd.f32 %v228_v39, %v227_v46  ;;  %v283_v4 = vld [vmem:[#allocation6 + $0x468] sm:$0xff]  ;;  %v2913_v6 = vpack.c.bf16 %v746_v57, %v744_v56  ;;  %v2915_v8 = vpack.c.bf16 %v751_v62, %v749_v58  ;;  %v755_v19 = vld [vmem:[#allocation6 + $0x838] sm:$0xff]  ;;  %v280_v22 = vld [vmem:[#allocation6 + $0x450] sm:$0xff]  ;;  %v2917_v28 = vpack.c.bf16 %v750_v10, %v748_v9 }
  0x77   :  { %2694 = vmatpush1.bf16.msra.mxu1 %v2693_v0  ;;  %v487_v31 = vcombine.high %v3780_v20, %v3780_v20  ;;  %v276_v0 = vld [vmem:[#allocation6 + $0x430] sm:$0xff]  ;;  %v753_v11 = vld [vmem:[#allocation6 + $0x828] sm:$0xff]  ;;  %v667_v18 = vmul.f32 %v666_v2, %v665_v60  ;;  %v282_v23 = vld [vmem:[#allocation6 + $0x460] sm:$0xff]  ;;  %v940_v56 = vmul.f32 %v3741_v16, %v934_v43 }
  0x78   :  { %2696 = vmatprep.subr.bf16.mxu1 %v2695_v3  ;;  %v3793_v61 = vmax.f32 %v229_v53, 0.0  ;;  %v281_v3 = vld [vmem:[#allocation6 + $0x458] sm:$0xff]  ;;  %v2709_v17 = vpack.c.bf16 %v278_v1, %v276_v0  ;;  %v2919_v29 = vpack.c.bf16 %v755_v19, %v753_v11  ;;  %v752_v30 = vld [vmem:[#allocation6 + $0x820] sm:$0xff]  ;;  %v757_v32 = vld [vmem:[#allocation6 + $0x848] sm:$0xff]  ;;  %v2713_v33 = vpack.c.bf16 %v282_v23, %v280_v22 }
  0x79   :  { %v501_v40 = vrot.slane %v487_v31, %v3777_v15  ;;  %v2711_v21 = vpack.c.bf16 %v283_v4, %v281_v3  ;;  %v285_v26 = vld [vmem:[#allocation6 + $0x478] sm:$0xff]  ;;  %v754_v31 = vld [vmem:[#allocation6 + $0x830] sm:$0xff]  ;;  %v286_v39 = vld [vmem:[#allocation6 + $0x480] sm:$0xff] }
  0x7a   :  { %v3800_v5 = vrot.slane %v3793_v61, %v3777_v15  ;;  %v284_v38 = vld [vmem:[#allocation6 + $0x470] sm:$0xff]  ;;  %v289_v41 = vld [vmem:[#allocation6 + $0x498] sm:$0xff]  ;;  %v291_v42 = vld [vmem:[#allocation6 + $0x4a8] sm:$0xff] }
  0x7b   :  { %2698 = vmatpush1.bf16.msra.mxu1 %v2697_v24  ;;  %2572 = vmatmul.mubr.msk.f32.vlgmr.msra.gmra.mrb[0].mxu0 %vm341_vm0, %v501_v40  ;;  %v668_v24 = vstv %s3789_s0  ;;  %v932_v40 = vstv %s3796_s15  ;;  %v756_v46 = vld [vmem:[#allocation6 + $0x840] sm:$0xff]  ;;  %v758_v47 = vld [vmem:[#allocation6 + $0x850] sm:$0xff]  ;;  %v2717_v49 = vpack.c.bf16 %v286_v39, %v284_v38  ;;  %v2719_v51 = vpack.c.bf16 %v291_v42, %v289_v41  ;;  %v293_v57 = vld [vmem:[#allocation6 + $0x4b8] sm:$0xff]  ;;  %s3944_s0 = sld [smem:[#allocation2 + $0x206]]  ;;  %s3971_s15 = sld [smem:[#allocation2 + $0x7]] }
  0x7c   :  { %2700 = vmatprep.subr.bf16.mxu1 %v2699_v27  ;;  %2906 = vmatpush1.bf16.msra.mxu0 %v2905_v35  ;;  %v338_v25 = vcombine.high %v3800_v5, %v3800_v5  ;;  %v287_v27 = vld [vmem:[#allocation6 + $0x488] sm:$0xff]  ;;  %v669_v34 = vadd.f32 %v668_v24, %v667_v18  ;;  %v759_v35 = vld [vmem:[#allocation6 + $0x858] sm:$0xff]  ;;  %v933_v50 = vmul.f32 %v932_v40, %v3726_v12  ;;  %v288_v52 = vld [vmem:[#allocation6 + $0x490] sm:$0xff] }
  0x7d   :  { %918 = vmatprep.mubr.f32.mxu0 %v3592_v7  ;;  %2908 = vmatprep.subr.bf16.mxu0 %v2907_v36  ;;  %v2715_v36 = vpack.c.bf16 %v287_v27, %v285_v26  ;;  %v2923_v45 = vpack.c.bf16 %v759_v35, %v757_v32  ;;  %v290_v53 = vld [vmem:[#allocation6 + $0x4a0] sm:$0xff]  ;;  %v295_v58 = vld [vmem:[#allocation6 + $0x4c8] sm:$0xff]  ;;  %v1014_v2 = vld [vmem:[#allocation6 + $0xa70] sm:$0xff] }
  0x7e   :  { %408 = vmatprep.mubr.f32.mxu1 %v338_v25  ;;  %v761_v60 = vld [vmem:[#allocation6 + $0x868] sm:$0xff]  ;;  %v2721_v0 = vpack.c.bf16 %v290_v53, %v288_v52  ;;  %v1016_v3 = vld [vmem:[#allocation6 + $0xa80] sm:$0xff]  ;;  %v2723_v4 = vpack.c.bf16 %v295_v58, %v293_v57  ;;  %v1019_v9 = vld [vmem:[#allocation6 + $0xa98] sm:$0xff] }
  0x7f   :  { %2702 = vmatpush1.bf16.msra.mxu1 %v2701_v44  ;;  %v2921_v44 = vpack.c.bf16 %v754_v31, %v752_v30  ;;  %v1017_v1 = vld [vmem:[#allocation6 + $0xa88] sm:$0xff]  ;;  %v292_v10 = vld [vmem:[#allocation6 + $0x4b0] sm:$0xff]  ;;  %v294_v11 = vld [vmem:[#allocation6 + $0x4c0] sm:$0xff]  ;;  %v2993_v25 = vpack.c.bf16 %v1016_v3, %v1014_v2 }
  0x80   :  { %2704 = vmatprep.subr.bf16.mxu1 %v2703_v48  ;;  %2910 = vmatpush1.bf16.msra.mxu0 %v2909_v54  ;;  %v3811_v48 = vmax.f32 %v669_v34, 0.0  ;;  %v935_v54 = vmul.f32 %v3731_v13, %v934_v43  ;;  %v1021_v18 = vld [vmem:[#allocation6 + $0xaa8] sm:$0xff]  ;;  %v297_v19 = vld [vmem:[#allocation6 + $0x4d8] sm:$0xff]  ;;  %v760_v22 = vld [vmem:[#allocation6 + $0x860] sm:$0xff] }
  0x81   :  { %2912 = vmatprep.subr.bf16.mxu0 %v2911_v55  ;;  %v939_v55 = vmul.f32 %v3736_v14, %v932_v40  ;;  %v1018_v26 = vld [vmem:[#allocation6 + $0xa90] sm:$0xff]  ;;  %v1020_v27 = vld [vmem:[#allocation6 + $0xaa0] sm:$0xff]  ;;  %v2995_v31 = vpack.c.bf16 %v1021_v18, %v1019_v9  ;;  %v1023_v32 = vld [vmem:[#allocation6 + $0xab8] sm:$0xff] }
  0x82   :  { %v763_v62 = vcombine.high %v3811_v48, %v3811_v48  ;;  %v296_v34 = vld [vmem:[#allocation6 + $0x4d0] sm:$0xff]  ;;  %v298_v35 = vld [vmem:[#allocation6 + $0x4e0] sm:$0xff]  ;;  %v301_v38 = vld [vmem:[#allocation6 + $0x4f8] sm:$0xff]  ;;  %v2997_v40 = vpack.c.bf16 %v1020_v27, %v1018_v26  ;;  %v1210_v26 = vstv %s3828_s18  ;;  %v1212_v27 = vstv %s3831_s19 }
  0x83   :  { %2706 = vmatpush1.bf16.msra.mxu1 %v2705_v59  ;;  %v2925_v59 = vpack.c.bf16 %v758_v47, %v756_v46  ;;  %v303_v39 = vld [vmem:[#allocation6 + $0x508] sm:$0xff]  ;;  %v1022_v41 = vld [vmem:[#allocation6 + $0xab0] sm:$0xff]  ;;  %v1024_v42 = vld [vmem:[#allocation6 + $0xac0] sm:$0xff]  ;;  %v2729_v43 = vpack.c.bf16 %v298_v35, %v296_v34 }
  0x84   :  { %2708 = vmatprep.subr.bf16.mxu1 %v2707_v63  ;;  %2914 = vmatpush1.bf16.msra.mxu0 %v2913_v6  ;;  %v1015_v63 = vld [vmem:[#allocation6 + $0xa78] sm:$0xff]  ;;  %v936_v6 = vadd.f32 %v935_v54, %v933_v50  ;;  %v777_v23 = vrot.slane %v763_v62, %v3777_v15  ;;  %v2731_v47 = vpack.c.bf16 %v303_v39, %v301_v38  ;;  %v302_v50 = vld [vmem:[#allocation6 + $0x500] sm:$0xff]  ;;  %v1029_v52 = vld [vmem:[#allocation6 + $0xae8] sm:$0xff] }
  0x85   :  { %2916 = vmatprep.subr.bf16.mxu0 %v2915_v8  ;;  %v941_v8 = vadd.f32 %v940_v56, %v939_v55  ;;  %v2991_v24 = vpack.c.bf16 %v1017_v1, %v1015_v63  ;;  %v1027_v46 = vld [vmem:[#allocation6 + $0xad8] sm:$0xff]  ;;  %v307_v54 = vld [vmem:[#allocation6 + $0x528] sm:$0xff]  ;;  %v3001_v55 = vpack.c.bf16 %v1024_v42, %v1022_v41  ;;  %v1026_v56 = vld [vmem:[#allocation6 + $0xad0] sm:$0xff]  ;;  %v946_v1 = vstv %s3823_s7  ;;  %s3987_s7 = sld [smem:[#allocation2 + $0x207]] }
  0x86   :  { %v305_v53 = vld [vmem:[#allocation6 + $0x518] sm:$0xff]  ;;  %v1028_v57 = vld [vmem:[#allocation6 + $0xae0] sm:$0xff]  ;;  %v1033_v2 = vld [vmem:[#allocation6 + $0xb08] sm:$0xff]  ;;  %v1211_v42 = vmul.f32 %v1210_v26, %v3726_v12 }
  0x87   :  { %2710 = vmatpush1.bf16.msra.mxu1 %v2709_v17  ;;  %v937_v17 = vstv %s3808_s5  ;;  %v1031_v62 = vld [vmem:[#allocation6 + $0xaf8] sm:$0xff]  ;;  %v2735_v63 = vpack.c.bf16 %v307_v54, %v305_v53  ;;  %v1032_v9 = vld [vmem:[#allocation6 + $0xb00] sm:$0xff]  ;;  %v312_v38 = vld [vmem:[#allocation6 + $0x550] sm:$0xff]  ;;  %s3975_s5 = sld [smem:[#allocation2 + $0x107]] }
  0x88   :  { %2712 = vmatprep.subr.bf16.mxu1 %v2711_v21  ;;  %2918 = vmatpush1.bf16.msra.mxu0 %v2917_v28  ;;  %v299_v21 = vld [vmem:[#allocation6 + $0x4e8] sm:$0xff]  ;;  %v2725_v28 = vpack.c.bf16 %v294_v11, %v292_v10  ;;  %v942_v30 = vadd.f32 %v941_v8, %v937_v17  ;;  %v309_v3 = vld [vmem:[#allocation6 + $0x538] sm:$0xff]  ;;  %v1030_v8 = vld [vmem:[#allocation6 + $0xaf0] sm:$0xff] }
  0x89   :  { %2920 = vmatprep.subr.bf16.mxu0 %v2919_v29  ;;  %v938_v29 = vadd.f32 %v937_v17, %v936_v6  ;;  %v3005_v6 = vpack.c.bf16 %v1028_v57, %v1026_v56  ;;  %v3007_v17 = vpack.c.bf16 %v1033_v2, %v1031_v62  ;;  %v1035_v18 = vld [vmem:[#allocation6 + $0xb18] sm:$0xff]  ;;  %v1036_v35 = vld [vmem:[#allocation6 + $0xb20] sm:$0xff]  ;;  %v319_v41 = vld [vmem:[#allocation6 + $0x588] sm:$0xff] }
  0x8a   :  { %v314_v39 = vld [vmem:[#allocation6 + $0x560] sm:$0xff]  ;;  %v316_v53 = vld [vmem:[#allocation6 + $0x570] sm:$0xff]  ;;  %v1293_v57 = vld [vmem:[#allocation6 + $0xd48] sm:$0xff] }
  0x8b   :  { %2714 = vmatpush1.bf16.msra.mxu1 %v2713_v33  ;;  %v2727_v33 = vpack.c.bf16 %v299_v21, %v297_v19  ;;  %v308_v21 = vld [vmem:[#allocation6 + $0x530] sm:$0xff]  ;;  %v318_v54 = vld [vmem:[#allocation6 + $0x580] sm:$0xff] }
  0x8c   :  { %2716 = vmatprep.subr.bf16.mxu1 %v2715_v36  ;;  %2922 = vmatpush1.bf16.msra.mxu0 %v2921_v44  ;;  %v1025_v36 = vld [vmem:[#allocation6 + $0xac8] sm:$0xff]  ;;  %v943_v44 = vmax.f32 %v938_v29, %v942_v30  ;;  %v3009_v29 = vpack.c.bf16 %v1032_v9, %v1030_v8  ;;  %v1034_v30 = vld [vmem:[#allocation6 + $0xb10] sm:$0xff] }
  0x8d   :  { %2924 = vmatprep.subr.bf16.mxu0 %v2923_v45  ;;  %v2999_v45 = vpack.c.bf16 %v1025_v36, %v1023_v32  ;;  %v1038_v2 = vld [vmem:[#allocation6 + $0xb30] sm:$0xff] }
  0x8f   :  { %2718 = vmatpush1.bf16.msra.mxu1 %v2717_v49  ;;  %v300_v49 = vld [vmem:[#allocation6 + $0x4f0] sm:$0xff] }
  0x90   :  { %2720 = vmatprep.subr.bf16.mxu1 %v2719_v51  ;;  %2926 = vmatpush1.bf16.msra.mxu0 %v2925_v59  ;;  %v944_v51 = vstv %s3819_s17  ;;  %v2733_v58 = vpack.c.bf16 %v302_v50, %v300_v49  ;;  %v3013_v49 = vpack.c.bf16 %v1036_v35, %v1034_v30  ;;  %v3873_v30 = vrot.slane %v3780_v20, %v3777_v15  ;;  %v1305_v20 = vld [vmem:[#allocation6 + $0xda8] sm:$0xff]  ;;  %s3983_s17 = sld [smem:[#allocation2 + $0x187]] }
  0x91   :  { %878 = vmatprep.subr.mxu0 %v761_v60  ;;  %v945_v59 = vmul.f32 %v944_v51, %v943_v44  ;;  %v3003_v60 = vpack.c.bf16 %v1029_v52, %v1027_v46  ;;  %v1217_v44 = vmul.f32 %v3736_v14, %v1210_v26  ;;  %v2745_v51 = vpack.c.bf16 %v314_v39, %v312_v38  ;;  %v1300_v38 = vld [vmem:[#allocation6 + $0xd80] sm:$0xff]  ;;  %v1302_v39 = vld [vmem:[#allocation6 + $0xd90] sm:$0xff] }
  0x93   :  { %2722 = vmatpush1.bf16.msra.mxu1 %v2721_v0  ;;  %v306_v0 = vld [vmem:[#allocation6 + $0x520] sm:$0xff]  ;;  %v947_v11 = vadd.f32 %v946_v1, %v945_v59  ;;  %v1294_v59 = vld [vmem:[#allocation6 + $0xd50] sm:$0xff]  ;;  %v1299_v1 = vld [vmem:[#allocation6 + $0xd78] sm:$0xff] }
  0x94   :  { %2724 = vmatprep.subr.bf16.mxu1 %v2723_v4  ;;  %879 = vmatpush1.msra.mxu0 %v760_v22  ;;  %v311_v4 = vld [vmem:[#allocation6 + $0x548] sm:$0xff]  ;;  %v310_v22 = vld [vmem:[#allocation6 + $0x540] sm:$0xff] }
  0x95   :  { %2578 = vmatmul.mubr.msk.f32.vlgmr.msra.gmra.mrb[2].mxu0 %vm341_vm0, %v777_v23  ;;  %2992 = vmatprep.subr.bf16.mxu0 %v2991_v24  ;;  %v2739_v19 = vpack.c.bf16 %v311_v4, %v309_v3  ;;  %v1037_v23 = vld [vmem:[#allocation6 + $0xb28] sm:$0xff]  ;;  %v313_v24 = vld [vmem:[#allocation6 + $0x558] sm:$0xff]  ;;  %v3842_v32 = vmax.f32 %v947_v11, 0.0  ;;  %v1296_v4 = vld [vmem:[#allocation6 + $0xd60] sm:$0xff] }
  0x96   :  { %2994 = vmatpush1.bf16.msra.mxu0 %v2993_v25  ;;  %1196 = vmatprep.mubr.f32.mxu0 %v3592_v7  ;;  %v315_v25 = vld [vmem:[#allocation6 + $0x568] sm:$0xff]  ;;  %v3011_v34 = vpack.c.bf16 %v1037_v23, %v1035_v18  ;;  %v1493_v18 = vstv %s3849_s23  ;;  %v121_v23 = vld [vmem:[#allocation6 + $0x10] sm:$0xff] }
  0x97   :  { %2726 = vmatpush1.bf16.msra.mxu1 %v2725_v28  ;;  %2996 = vmatprep.subr.bf16.mxu0 %v2995_v31  ;;  %v1488_v28 = vstv %s3833_s20  ;;  %v2741_v31 = vpack.c.bf16 %v310_v22, %v308_v21  ;;  %v2743_v36 = vpack.c.bf16 %v315_v25, %v313_v24  ;;  %v1041_v50 = vcombine.high %v3842_v32, %v3842_v32  ;;  %v120_v11 = vld [vmem:[#allocation6 + $0x8] sm:$0xff]  ;;  %v321_v21 = vld [vmem:[#allocation6 + $0x598] sm:$0xff]  ;;  %v119_v22 = vld [vmem:[#allocation6] sm:$0xff] }
  0x98   :  { %2728 = vmatprep.subr.bf16.mxu1 %v2727_v33  ;;  %v1490_v33 = vstv %s3835_s21  ;;  %v1489_v46 = vmul.f32 %v1488_v28, %v3726_v12  ;;  %v1039_v12 = vld [vmem:[#allocation6 + $0xb38] sm:$0xff] }
  0x99   :  { %v1496_v56 = vmul.f32 %v3741_v16, %v1490_v33 }
  0x9a   :  { %409 = vmatmul.mubr.f32.vlgmr.msra.gmra.mrb[0].mxu1 %v3800_v5  ;;  %2998 = vmatpush1.bf16.msra.mxu0 %v2997_v40  ;;  %v304_v5 = vld [vmem:[#allocation6 + $0x510] sm:$0xff]  ;;  %v317_v40 = vld [vmem:[#allocation6 + $0x578] sm:$0xff] }
  0x9b   :  { %2730 = vmatpush1.bf16.msra.mxu1 %v2729_v43  ;;  %3000 = vmatprep.subr.bf16.mxu0 %v2999_v45  ;;  %v2737_v10 = vpack.c.bf16 %v306_v0, %v304_v5  ;;  %v1213_v43 = vmul.f32 %v3731_v13, %v1212_v27  ;;  %v1218_v45 = vmul.f32 %v3741_v16, %v1212_v27  ;;  %v1297_v0 = vld [vmem:[#allocation6 + $0xd68] sm:$0xff]  ;;  %v1215_v16 = vstv %s3844_s22  ;;  %v1303_v27 = vld [vmem:[#allocation6 + $0xd98] sm:$0xff] }
  0x9c   :  { %2732 = vmatprep.subr.bf16.mxu1 %v2731_v47  ;;  %479 = vmatprep.mubr.f32.mxu1 %v3592_v7  ;;  %v1491_v47 = vmul.f32 %v3731_v13, %v1490_v33  ;;  %v2747_v52 = vpack.c.bf16 %v319_v41, %v317_v40  ;;  %v1295_v13 = vld [vmem:[#allocation6 + $0xd58] sm:$0xff]  ;;  %v1055_v5 = vrot.slane %v1041_v50, %v3777_v15  ;;  %v1222_v50 = vstv %s3862_s24 }
  0x9d   :  { %v1219_v62 = vadd.f32 %v1218_v45, %v1217_v44  ;;  %v3079_v3 = vpack.c.bf16 %v1295_v13, %v1293_v57  ;;  %v2753_v40 = vpack.c.bf16 %v121_v23, %v119_v22  ;;  %v125_v44 = vld [vmem:[#allocation6 + $0x30] sm:$0xff]  ;;  %v1309_v13 = vld [vmem:[#allocation6 + $0xdc8] sm:$0xff] }
  0x9e   :  { %3002 = vmatpush1.bf16.msra.mxu0 %v3001_v55  ;;  %v1495_v55 = vmul.f32 %v3736_v14, %v1488_v28  ;;  %v2749_v14 = vpack.c.bf16 %v318_v54, %v316_v53  ;;  %v1492_v8 = vadd.f32 %v1491_v47, %v1489_v46  ;;  %v124_v28 = vld [vmem:[#allocation6 + $0x28] sm:$0xff]  ;;  %v1307_v46 = vld [vmem:[#allocation6 + $0xdb8] sm:$0xff]  ;;  %v3089_v53 = vpack.c.bf16 %v1302_v39, %v1300_v38  ;;  %v1304_v54 = vld [vmem:[#allocation6 + $0xda0] sm:$0xff] }
  0x9f   :  { %2734 = vmatpush1.bf16.msra.mxu1 %v2733_v58  ;;  %3004 = vmatprep.subr.bf16.mxu0 %v3003_v60  ;;  %v1292_v58 = vld [vmem:[#allocation6 + $0xd40] sm:$0xff]  ;;  %v1214_v60 = vadd.f32 %v1213_v43, %v1211_v42  ;;  %v1220_v25 = vadd.f32 %v1219_v62, %v1215_v16  ;;  %v128_v47 = vld [vmem:[#allocation6 + $0x48] sm:$0xff]  ;;  %v3091_v57 = vpack.c.bf16 %v1307_v46, %v1305_v20  ;;  %v1506_v46 = vld [vmem:[#allocation6 + $0xe10] sm:$0xff] }
  0xa0   :  { %2736 = vmatprep.subr.bf16.mxu1 %v2735_v63  ;;  %v323_v63 = vcombine.high %v3793_v61, %v3793_v61  ;;  %v1497_v9 = vadd.f32 %v1496_v56, %v1495_v55  ;;  %v3081_v61 = vpack.c.bf16 %v1294_v59, %v1292_v58  ;;  %v123_v43 = vld [vmem:[#allocation6 + $0x20] sm:$0xff]  ;;  %v1306_v55 = vld [vmem:[#allocation6 + $0xdb0] sm:$0xff] }
  0xa1   :  { %v1216_v24 = vadd.f32 %v1215_v16, %v1214_v60  ;;  %v2757_v56 = vpack.c.bf16 %v125_v44, %v123_v43  ;;  %v127_v59 = vld [vmem:[#allocation6 + $0x40] sm:$0xff]  ;;  %v129_v60 = vld [vmem:[#allocation6 + $0x50] sm:$0xff]  ;;  %v3093_v16 = vpack.c.bf16 %v1306_v55, %v1304_v54  ;;  %v1507_v44 = vld [vmem:[#allocation6 + $0xe18] sm:$0xff] }
  0xa2   :  { %3006 = vmatpush1.bf16.msra.mxu0 %v3005_v6  ;;  %v1298_v6 = vld [vmem:[#allocation6 + $0xd70] sm:$0xff]  ;;  %v337_v26 = vrot.slane %v323_v63, %v3777_v15  ;;  %v1498_v35 = vadd.f32 %v1497_v9, %v1493_v18  ;;  %v1311_v63 = vld [vmem:[#allocation6 + $0xdd8] sm:$0xff]  ;;  %v1313_v9 = vld [vmem:[#allocation6 + $0xde8] sm:$0xff] }
  0xa3   :  { %2738 = vmatpush1.bf16.msra.mxu1 %v2737_v10  ;;  %3008 = vmatprep.subr.bf16.mxu0 %v3007_v17  ;;  %v1301_v10 = vld [vmem:[#allocation6 + $0xd88] sm:$0xff]  ;;  %v122_v17 = vld [vmem:[#allocation6 + $0x18] sm:$0xff]  ;;  %v1221_v45 = vmax.f32 %v1216_v24, %v1220_v25  ;;  %v1312_v24 = vld [vmem:[#allocation6 + $0xde0] sm:$0xff] }
  0xa4   :  { %2740 = vmatprep.subr.bf16.mxu1 %v2739_v19  ;;  %v3083_v19 = vpack.c.bf16 %v1299_v1, %v1297_v0  ;;  %v2751_v33 = vpack.c.bf16 %v122_v17, %v120_v11  ;;  %v3087_v41 = vpack.c.bf16 %v1303_v27, %v1301_v10  ;;  %v134_v0 = vld [vmem:[#allocation6 + $0x78] sm:$0xff]  ;;  %v1224_v1 = vstv %s3869_s26  ;;  %v131_v10 = vld [vmem:[#allocation6 + $0x60] sm:$0xff]  ;;  %v133_v11 = vld [vmem:[#allocation6 + $0x70] sm:$0xff] }
  0xa5   :  { %v1223_v62 = vmul.f32 %v1222_v50, %v1221_v45  ;;  %v2765_v25 = vpack.c.bf16 %v133_v11, %v131_v10  ;;  %v1314_v27 = vld [vmem:[#allocation6 + $0xdf0] sm:$0xff]  ;;  %v1509_v45 = vld [vmem:[#allocation6 + $0xe28] sm:$0xff]  ;;  %v146_v50 = vld [vmem:[#allocation6 + $0xd8] sm:$0xff] }
  0xa6   :  { %3010 = vmatpush1.bf16.msra.mxu0 %v3009_v29  ;;  %v126_v29 = vld [vmem:[#allocation6 + $0x38] sm:$0xff]  ;;  %v3101_v38 = vpack.c.bf16 %v1314_v27, %v1312_v24  ;;  %v141_v43 = vld [vmem:[#allocation6 + $0xb0] sm:$0xff]  ;;  %v1316_v55 = vld [vmem:[#allocation6 + $0xe00] sm:$0xff] }
  0xa7   :  { %2742 = vmatpush1.bf16.msra.mxu1 %v2741_v31  ;;  %3012 = vmatprep.subr.bf16.mxu0 %v3011_v34  ;;  %v320_v31 = vld [vmem:[#allocation6 + $0x590] sm:$0xff]  ;;  %v1494_v34 = vadd.f32 %v1493_v18, %v1492_v8  ;;  %v2755_v42 = vpack.c.bf16 %v126_v29, %v124_v28  ;;  %v3095_v8 = vpack.c.bf16 %v1311_v63, %v1309_v13  ;;  %v1315_v18 = vld [vmem:[#allocation6 + $0xdf8] sm:$0xff] }
  0xa8   :  { %2744 = vmatprep.subr.bf16.mxu1 %v2743_v36  ;;  %v3085_v36 = vpack.c.bf16 %v1298_v6, %v1296_v4  ;;  %v2761_v4 = vpack.c.bf16 %v129_v60, %v127_v59  ;;  %v1502_v6 = vstv %s3876_s27  ;;  %v1225_v17 = vadd.f32 %v1224_v1, %v1223_v62  ;;  %v145_v13 = vld [vmem:[#allocation6 + $0xd0] sm:$0xff]  ;;  %v148_v60 = vld [vmem:[#allocation6 + $0xe8] sm:$0xff]  ;;  %v150_v62 = vld [vmem:[#allocation6 + $0xf8] sm:$0xff] }
  0xa9   :  { %v1514_v11 = vld [vmem:[#allocation6 + $0xe50] sm:$0xff]  ;;  %v158_v27 = vld [vmem:[#allocation6 + $0x138] sm:$0xff] }
  0xaa   :  { %3014 = vmatpush1.bf16.msra.mxu0 %v3013_v49  ;;  %v130_v49 = vld [vmem:[#allocation6 + $0x58] sm:$0xff]  ;;  %v3886_v28 = vmax.f32 %v1225_v17, 0.0  ;;  %v1516_v17 = vld [vmem:[#allocation6 + $0xe60] sm:$0xff]  ;;  %v153_v24 = vld [vmem:[#allocation6 + $0x110] sm:$0xff] }
  0xab   :  { %2746 = vmatpush1.bf16.msra.mxu1 %v2745_v51  ;;  %1156 = vmatprep.subr.mxu0 %v1039_v12  ;;  %v502_v51 = vcombine.high %v3873_v30, %v3873_v30  ;;  %v1500_v12 = vstv %s3865_s25  ;;  %v2759_v58 = vpack.c.bf16 %v130_v49, %v128_v47  ;;  %v1508_v47 = vld [vmem:[#allocation6 + $0xe20] sm:$0xff]  ;;  %v144_v49 = vld [vmem:[#allocation6 + $0xc8] sm:$0xff] }
  0xac   :  { %2748 = vmatprep.subr.bf16.mxu1 %v2747_v52  ;;  %v1499_v52 = vmax.f32 %v1494_v34, %v1498_v35  ;;  %v140_v34 = vld [vmem:[#allocation6 + $0xa8] sm:$0xff]  ;;  %v142_v35 = vld [vmem:[#allocation6 + $0xb8] sm:$0xff]  ;;  %v2775_v59 = vpack.c.bf16 %v146_v50, %v144_v49 }
  0xad   :  { %v2771_v20 = vpack.c.bf16 %v142_v35, %v140_v34  ;;  %v1523_v34 = vld [vmem:[#allocation6 + $0xe98] sm:$0xff]  ;;  %v1525_v35 = vld [vmem:[#allocation6 + $0xea8] sm:$0xff] }
  0xae   :  { %1157 = vmatpush1.msra.mxu0 %v1038_v2  ;;  %v1308_v2 = vld [vmem:[#allocation6 + $0xdc0] sm:$0xff]  ;;  %v1529_v49 = vld [vmem:[#allocation6 + $0xec8] sm:$0xff] }
  0xaf   :  { %2750 = vmatpush1.bf16.msra.mxu1 %v2749_v14  ;;  %2584 = vmatmul.mubr.msk.f32.vlgmr.msra.gmra.mrb[4].mxu0 %vm341_vm0, %v1055_v5  ;;  %v132_v5 = vld [vmem:[#allocation6 + $0x68] sm:$0xff]  ;;  %v1501_v14 = vmul.f32 %v1500_v12, %v1499_v52  ;;  %v1511_v52 = vld [vmem:[#allocation6 + $0xe38] sm:$0xff] }
  0xb0   :  { %3080 = vmatprep.subr.bf16.mxu0 %v3079_v3  ;;  %439 = vmatprep.subr.mxu1 %v321_v21  ;;  %v1310_v3 = vld [vmem:[#allocation6 + $0xdd0] sm:$0xff]  ;;  %v138_v21 = vld [vmem:[#allocation6 + $0x98] sm:$0xff] }
  0xb1   :  { %3082 = vmatpush1.bf16.msra.mxu0 %v3081_v61  ;;  %1474 = vmatprep.mubr.f32.mxu0 %v3592_v7  ;;  %v2763_v61 = vpack.c.bf16 %v134_v0, %v132_v5  ;;  %v1503_v22 = vadd.f32 %v1502_v6, %v1501_v14  ;;  %v3097_v23 = vpack.c.bf16 %v1310_v3, %v1308_v2  ;;  %v1510_v5 = vld [vmem:[#allocation6 + $0xe30] sm:$0xff]  ;;  %v1512_v0 = vld [vmem:[#allocation6 + $0xe40] sm:$0xff]  ;;  %v1515_v14 = vld [vmem:[#allocation6 + $0xe58] sm:$0xff] }
  0xb2   :  { %3084 = vmatprep.subr.bf16.mxu0 %v3083_v19  ;;  %v136_v19 = vld [vmem:[#allocation6 + $0x88] sm:$0xff]  ;;  %v2779_v3 = vpack.c.bf16 %v150_v62, %v148_v60  ;;  %v149_v6 = vld [vmem:[#allocation6 + $0xf0] sm:$0xff] }
  0xb3   :  { %440 = vmatpush1.msra.mxu1 %v320_v31  ;;  %v2767_v29 = vpack.c.bf16 %v138_v21, %v136_v19  ;;  %v135_v31 = vld [vmem:[#allocation6 + $0x80] sm:$0xff]  ;;  %v1521_v19 = vld [vmem:[#allocation6 + $0xe88] sm:$0xff] }
  0xb4   :  { %2752 = vmatprep.subr.bf16.mxu1 %v2751_v33  ;;  %2571 = vmatmul.mubr.msk.f32.vlgmr.msra.gmra.mrb[0].mxu1 %vm341_vm0, %v337_v26  ;;  %v3099_v26 = vpack.c.bf16 %v1315_v18, %v1313_v9  ;;  %v137_v33 = vld [vmem:[#allocation6 + $0x90] sm:$0xff]  ;;  %v152_v9 = vld [vmem:[#allocation6 + $0x108] sm:$0xff]  ;;  %v1519_v18 = vld [vmem:[#allocation6 + $0xe78] sm:$0xff] }
  0xb5   :  { %3086 = vmatpush1.bf16.msra.mxu0 %v3085_v36  ;;  %2754 = vmatpush1.bf16.msra.mxu1 %v2753_v40  ;;  %v3888_v36 = vmax.f32 %v1503_v22, 0.0  ;;  %v2769_v39 = vpack.c.bf16 %v137_v33, %v135_v31  ;;  %v1317_v40 = vld [vmem:[#allocation6 + $0xe08] sm:$0xff]  ;;  %v1518_v31 = vld [vmem:[#allocation6 + $0xe70] sm:$0xff]  ;;  %v1520_v33 = vld [vmem:[#allocation6 + $0xe80] sm:$0xff] }
  0xb6   :  { %3088 = vmatprep.subr.bf16.mxu0 %v3087_v41  ;;  %2756 = vmatprep.subr.bf16.mxu1 %v2755_v42  ;;  %v1319_v41 = vcombine.high %v3886_v28, %v3886_v28  ;;  %v139_v42 = vld [vmem:[#allocation6 + $0xa0] sm:$0xff]  ;;  %v1533_v60 = vld [vmem:[#allocation6 + $0xee8] sm:$0xff] }
  0xb7   :  { %571 = vmatprep.mubr.f32.mxu1 %v502_v51  ;;  %v3894_v51 = vrot.slane %v3888_v36, %v3777_v15  ;;  %v2773_v54 = vpack.c.bf16 %v141_v43, %v139_v42  ;;  %v160_v42 = vld [vmem:[#allocation6 + $0x148] sm:$0xff]  ;;  %v162_v43 = vld [vmem:[#allocation6 + $0x158] sm:$0xff] }
  0xb8   :  { %v1333_v12 = vrot.slane %v1319_v41, %v3777_v15  ;;  %v157_v41 = vld [vmem:[#allocation6 + $0x130] sm:$0xff] }
  0xb9   :  { %3090 = vmatpush1.bf16.msra.mxu0 %v3089_v53  ;;  %2758 = vmatpush1.bf16.msra.mxu1 %v2757_v56  ;;  %v1513_v53 = vld [vmem:[#allocation6 + $0xe48] sm:$0xff]  ;;  %v3103_v56 = vpack.c.bf16 %v1509_v45, %v1507_v44  ;;  %v1612_v1 = vcombine.high %v3894_v51, %v3894_v51  ;;  %v3119_v44 = vpack.c.bf16 %v1525_v35, %v1523_v34  ;;  %v1522_v45 = vld [vmem:[#allocation6 + $0xe90] sm:$0xff]  ;;  %v178_v35 = vld [vmem:[#allocation6 + $0x1d8] sm:$0xff] }
  0xba   :  { %3092 = vmatprep.subr.bf16.mxu0 %v3091_v57  ;;  %2760 = vmatprep.subr.bf16.mxu1 %v2759_v58  ;;  %v143_v57 = vld [vmem:[#allocation6 + $0xc0] sm:$0xff]  ;;  %v3105_v58 = vpack.c.bf16 %v1508_v47, %v1506_v46  ;;  %v3107_v63 = vpack.c.bf16 %v1513_v53, %v1511_v52  ;;  %v1527_v47 = vld [vmem:[#allocation6 + $0xeb8] sm:$0xff]  ;;  %v2791_v52 = vpack.c.bf16 %v162_v43, %v160_v42  ;;  %v176_v34 = vld [vmem:[#allocation6 + $0x1c8] sm:$0xff] }
  0xbb   :  { %v2777_v2 = vpack.c.bf16 %v145_v13, %v143_v57  ;;  %v1524_v46 = vld [vmem:[#allocation6 + $0xea0] sm:$0xff]  ;;  %v3123_v57 = vpack.c.bf16 %v1529_v49, %v1527_v47  ;;  %v1526_v13 = vld [vmem:[#allocation6 + $0xeb0] sm:$0xff]  ;;  %v2807_v43 = vpack.c.bf16 %v178_v35, %v176_v34  ;;  %v180_v47 = vld [vmem:[#allocation6 + $0x1e8] sm:$0xff] }
  0xbc   :  { %v159_v53 = vld [vmem:[#allocation6 + $0x140] sm:$0xff]  ;;  %v182_v49 = vld [vmem:[#allocation6 + $0x1f8] sm:$0xff]  ;;  %v1561_v34 = vld [vmem:[#allocation6 + $0xfc8] sm:$0xff] }
  0xbd   :  { %3094 = vmatpush1.bf16.msra.mxu0 %v3093_v16  ;;  %2762 = vmatpush1.bf16.msra.mxu1 %v2761_v4  ;;  %v1517_v16 = vld [vmem:[#allocation6 + $0xe68] sm:$0xff]  ;;  %v147_v4 = vld [vmem:[#allocation6 + $0xe0] sm:$0xff] }
  0xbe   :  { %3096 = vmatprep.subr.bf16.mxu0 %v3095_v8  ;;  %2764 = vmatprep.subr.bf16.mxu1 %v2763_v61  ;;  %v3109_v8 = vpack.c.bf16 %v1512_v0, %v1510_v5  ;;  %v154_v61 = vld [vmem:[#allocation6 + $0x118] sm:$0xff]  ;;  %v3111_v10 = vpack.c.bf16 %v1517_v16, %v1515_v14  ;;  %v2781_v21 = vpack.c.bf16 %v149_v6, %v147_v4  ;;  %v163_v5 = vld [vmem:[#allocation6 + $0x160] sm:$0xff]  ;;  %v165_v0 = vld [vmem:[#allocation6 + $0x170] sm:$0xff] }
  0xbf   :  { %v2783_v22 = vpack.c.bf16 %v154_v61, %v152_v9  ;;  %v168_v14 = vld [vmem:[#allocation6 + $0x188] sm:$0xff]  ;;  %v170_v16 = vld [vmem:[#allocation6 + $0x198] sm:$0xff]  ;;  %v1532_v4 = vld [vmem:[#allocation6 + $0xee0] sm:$0xff]  ;;  %v2797_v9 = vpack.c.bf16 %v165_v0, %v163_v5 }
  0xc0   :  { %v1535_v6 = vld [vmem:[#allocation6 + $0xef8] sm:$0xff]  ;;  %v2799_v61 = vpack.c.bf16 %v170_v16, %v168_v14  ;;  %v1548_v5 = vld [vmem:[#allocation6 + $0xf60] sm:$0xff]  ;;  %v3902_v16 = vrot.slane %v3811_v48, %v3777_v15 }
  0xc1   :  { %3098 = vmatpush1.bf16.msra.mxu0 %v3097_v23  ;;  %2766 = vmatpush1.bf16.msra.mxu1 %v2765_v25  ;;  %v151_v23 = vld [vmem:[#allocation6 + $0x100] sm:$0xff]  ;;  %v3113_v25 = vpack.c.bf16 %v1516_v17, %v1514_v11  ;;  %v169_v11 = vld [vmem:[#allocation6 + $0x190] sm:$0xff]  ;;  %v1551_v0 = vld [vmem:[#allocation6 + $0xf78] sm:$0xff] }
  0xc2   :  { %3100 = vmatprep.subr.bf16.mxu0 %v3099_v26  ;;  %2768 = vmatprep.subr.bf16.mxu1 %v2767_v29  ;;  %v156_v26 = vld [vmem:[#allocation6 + $0x128] sm:$0xff]  ;;  %v3115_v29 = vpack.c.bf16 %v1521_v19, %v1519_v18  ;;  %v174_v19 = vld [vmem:[#allocation6 + $0x1b8] sm:$0xff]  ;;  %v778_v48 = vcombine.high %v3902_v16, %v3902_v16 }
  0xc3   :  { %v172_v18 = vld [vmem:[#allocation6 + $0x1a8] sm:$0xff] }
  0xc5   :  { %3102 = vmatpush1.bf16.msra.mxu0 %v3101_v38  ;;  %2770 = vmatpush1.bf16.msra.mxu1 %v2769_v39  ;;  %v2785_v38 = vpack.c.bf16 %v153_v24, %v151_v23  ;;  %v2787_v39 = vpack.c.bf16 %v158_v27, %v156_v26  ;;  %v1536_v23 = vld [vmem:[#allocation6 + $0xf00] sm:$0xff]  ;;  %v1539_v24 = vld [vmem:[#allocation6 + $0xf18] sm:$0xff]  ;;  %v2803_v27 = vpack.c.bf16 %v174_v19, %v172_v18  ;;  %v1557_v18 = vld [vmem:[#allocation6 + $0xfa8] sm:$0xff] }
  0xc6   :  { %1434 = vmatprep.subr.mxu0 %v1317_v40  ;;  %2772 = vmatprep.subr.bf16.mxu1 %v2771_v20  ;;  %v155_v40 = vld [vmem:[#allocation6 + $0x120] sm:$0xff]  ;;  %v3117_v20 = vpack.c.bf16 %v1520_v33, %v1518_v31  ;;  %v173_v31 = vld [vmem:[#allocation6 + $0x1b0] sm:$0xff] }
  0xc7   :  { %v2789_v50 = vpack.c.bf16 %v157_v41, %v155_v40  ;;  %v1540_v40 = vld [vmem:[#allocation6 + $0xf20] sm:$0xff]  ;;  %v1543_v41 = vld [vmem:[#allocation6 + $0xf38] sm:$0xff] }
  0xc9   :  { %1435 = vmatpush1.msra.mxu0 %v1316_v55  ;;  %2774 = vmatpush1.bf16.msra.mxu1 %v2773_v54  ;;  %v161_v54 = vld [vmem:[#allocation6 + $0x150] sm:$0xff]  ;;  %v3121_v55 = vpack.c.bf16 %v1524_v46, %v1522_v45 }
  0xca   :  { %3104 = vmatprep.subr.bf16.mxu0 %v3103_v56  ;;  %2590 = vmatmul.mubr.msk.f32.vlgmr.msra.gmra.mrb[6].mxu0 %vm341_vm0, %v1333_v12  ;;  %v164_v56 = vld [vmem:[#allocation6 + $0x168] sm:$0xff]  ;;  %v166_v12 = vld [vmem:[#allocation6 + $0x178] sm:$0xff]  ;;  %v2793_v62 = vpack.c.bf16 %v161_v54, %v159_v53  ;;  %v177_v45 = vld [vmem:[#allocation6 + $0x1d0] sm:$0xff] }
  0xcb   :  { %3106 = vmatpush1.bf16.msra.mxu0 %v3105_v58  ;;  %2776 = vmatprep.subr.bf16.mxu1 %v2775_v59  ;;  %v1528_v58 = vld [vmem:[#allocation6 + $0xec0] sm:$0xff]  ;;  %v1531_v59 = vld [vmem:[#allocation6 + $0xed8] sm:$0xff] }
  0xcc   :  { %3108 = vmatprep.subr.bf16.mxu0 %v3107_v63  ;;  %1681 = vmatprep.mubr.f32.mxu0 %v1612_v1  ;;  %v2795_v63 = vpack.c.bf16 %v166_v12, %v164_v56  ;;  %v3125_v1 = vpack.c.bf16 %v1528_v58, %v1526_v13  ;;  %v1544_v53 = vld [vmem:[#allocation6 + $0xf40] sm:$0xff]  ;;  %v1547_v54 = vld [vmem:[#allocation6 + $0xf58] sm:$0xff]  ;;  %v2811_v12 = vpack.c.bf16 %v182_v49, %v180_v47  ;;  %v181_v13 = vld [vmem:[#allocation6 + $0x1f0] sm:$0xff] }
  0xcd   :  { %2778 = vmatpush1.bf16.msra.mxu1 %v2777_v2  ;;  %v3127_v2 = vpack.c.bf16 %v1533_v60, %v1531_v59  ;;  %v673_v59 = vld [vmem:[#allocation6 + $0x5a8] sm:$0xff]  ;;  %v675_v60 = vld [vmem:[#allocation6 + $0x5b8] sm:$0xff] }
  0xce   :  { %2780 = vmatprep.subr.bf16.mxu1 %v2779_v3  ;;  %v1530_v3 = vld [vmem:[#allocation6 + $0xed0] sm:$0xff] }
  0xcf   :  { %3110 = vmatpush1.bf16.msra.mxu0 %v3109_v8  ;;  %v1537_v8 = vld [vmem:[#allocation6 + $0xf08] sm:$0xff]  ;;  %v3129_v17 = vpack.c.bf16 %v1532_v4, %v1530_v3  ;;  %v672_v3 = vld [vmem:[#allocation6 + $0x5a0] sm:$0xff]  ;;  %v674_v4 = vld [vmem:[#allocation6 + $0x5b0] sm:$0xff] }
  0xd0   :  { %3112 = vmatprep.subr.bf16.mxu0 %v3111_v10  ;;  %v167_v10 = vld [vmem:[#allocation6 + $0x180] sm:$0xff]  ;;  %v2841_v19 = vpack.c.bf16 %v674_v4, %v672_v3  ;;  %v1766_v4 = vstv %s3907_s29 }
  0xd1   :  { %2782 = vmatpush1.bf16.msra.mxu1 %v2781_v21  ;;  %v3131_v21 = vpack.c.bf16 %v1537_v8, %v1535_v6  ;;  %v2801_v26 = vpack.c.bf16 %v169_v11, %v167_v10  ;;  %v677_v8 = vld [vmem:[#allocation6 + $0x5c8] sm:$0xff]  ;;  %v1550_v10 = vld [vmem:[#allocation6 + $0xf70] sm:$0xff]  ;;  %v1552_v11 = vld [vmem:[#allocation6 + $0xf80] sm:$0xff] }
  0xd2   :  { %2784 = vmatprep.subr.bf16.mxu1 %v2783_v22  ;;  %v1534_v22 = vld [vmem:[#allocation6 + $0xef0] sm:$0xff] }
  0xd3   :  { %3114 = vmatpush1.bf16.msra.mxu0 %v3113_v25  ;;  %v1541_v25 = vld [vmem:[#allocation6 + $0xf28] sm:$0xff]  ;;  %v3133_v33 = vpack.c.bf16 %v1536_v23, %v1534_v22  ;;  %v676_v22 = vld [vmem:[#allocation6 + $0x5c0] sm:$0xff]  ;;  %v678_v23 = vld [vmem:[#allocation6 + $0x5d0] sm:$0xff] }
  0xd4   :  { %3116 = vmatprep.subr.bf16.mxu0 %v3115_v29  ;;  %v171_v29 = vld [vmem:[#allocation6 + $0x1a0] sm:$0xff]  ;;  %v2845_v35 = vpack.c.bf16 %v678_v23, %v676_v22 }
  0xd5   :  { %2786 = vmatpush1.bf16.msra.mxu1 %v2785_v38  ;;  %v3135_v38 = vpack.c.bf16 %v1541_v25, %v1539_v24  ;;  %v2805_v42 = vpack.c.bf16 %v173_v31, %v171_v29  ;;  %v3149_v24 = vpack.c.bf16 %v1552_v11, %v1550_v10  ;;  %v681_v25 = vld [vmem:[#allocation6 + $0x5e8] sm:$0xff]  ;;  %v1554_v29 = vld [vmem:[#allocation6 + $0xf90] sm:$0xff]  ;;  %v1556_v31 = vld [vmem:[#allocation6 + $0xfa0] sm:$0xff] }
  0xd6   :  { %2788 = vmatprep.subr.bf16.mxu1 %v2787_v39  ;;  %v1538_v39 = vld [vmem:[#allocation6 + $0xf10] sm:$0xff]  ;;  %v3924_v23 = vld [vmem:[%s4162_s1 + $0x6] sm:$0x3f] }
  0xd7   :  { %3118 = vmatpush1.bf16.msra.mxu0 %v3117_v20  ;;  %v1545_v20 = vld [vmem:[#allocation6 + $0xf48] sm:$0xff]  ;;  %v3137_v46 = vpack.c.bf16 %v1540_v40, %v1538_v39  ;;  %v680_v39 = vld [vmem:[#allocation6 + $0x5e0] sm:$0xff]  ;;  %v682_v40 = vld [vmem:[#allocation6 + $0x5f0] sm:$0xff] }
  0xd8   :  { %3120 = vmatprep.subr.bf16.mxu0 %v3119_v44  ;;  %v175_v44 = vld [vmem:[#allocation6 + $0x1c0] sm:$0xff]  ;;  %v2849_v47 = vpack.c.bf16 %v682_v40, %v680_v39 }
  0xd9   :  { %2790 = vmatpush1.bf16.msra.mxu1 %v2789_v50  ;;  %v3139_v50 = vpack.c.bf16 %v1545_v20, %v1543_v41  ;;  %v2809_v56 = vpack.c.bf16 %v177_v45, %v175_v44  ;;  %v3153_v41 = vpack.c.bf16 %v1556_v31, %v1554_v29  ;;  %v685_v20 = vld [vmem:[#allocation6 + $0x608] sm:$0xff]  ;;  %v1558_v44 = vld [vmem:[#allocation6 + $0xfb0] sm:$0xff]  ;;  %v1560_v45 = vld [vmem:[#allocation6 + $0xfc0] sm:$0xff] }
  0xda   :  { %2792 = vmatprep.subr.bf16.mxu1 %v2791_v52  ;;  %v1542_v52 = vld [vmem:[#allocation6 + $0xf30] sm:$0xff] }
  0xdb   :  { %3122 = vmatpush1.bf16.msra.mxu0 %v3121_v55  ;;  %v1549_v55 = vld [vmem:[#allocation6 + $0xf68] sm:$0xff]  ;;  %v3141_v58 = vpack.c.bf16 %v1544_v53, %v1542_v52  ;;  %v686_v52 = vld [vmem:[#allocation6 + $0x610] sm:$0xff]  ;;  %v3157_v53 = vpack.c.bf16 %v1560_v45, %v1558_v44  ;;  %v703_v44 = vld [vmem:[#allocation6 + $0x698] sm:$0xff] }
  0xdc   :  { %3124 = vmatprep.subr.bf16.mxu0 %v3123_v57  ;;  %v179_v57 = vld [vmem:[#allocation6 + $0x1e0] sm:$0xff] }
  0xdd   :  { %2794 = vmatpush1.bf16.msra.mxu1 %v2793_v62  ;;  %v3143_v62 = vpack.c.bf16 %v1549_v55, %v1547_v54  ;;  %v2813_v14 = vpack.c.bf16 %v181_v13, %v179_v57  ;;  %v689_v54 = vld [vmem:[#allocation6 + $0x628] sm:$0xff]  ;;  %v691_v55 = vld [vmem:[#allocation6 + $0x638] sm:$0xff]  ;;  %v1564_v57 = vld [vmem:[#allocation6 + $0xfe0] sm:$0xff] }
  0xde   :  { %2796 = vmatprep.subr.bf16.mxu1 %v2795_v63  ;;  %v1546_v63 = vld [vmem:[#allocation6 + $0xf50] sm:$0xff]  ;;  %v1567_v13 = vld [vmem:[#allocation6 + $0xff8] sm:$0xff] }
  0xdf   :  { %3126 = vmatpush1.bf16.msra.mxu0 %v3125_v1  ;;  %v1553_v1 = vld [vmem:[#allocation6 + $0xf88] sm:$0xff]  ;;  %v3145_v6 = vpack.c.bf16 %v1548_v5, %v1546_v63  ;;  %v688_v63 = vld [vmem:[#allocation6 + $0x620] sm:$0xff]  ;;  %v690_v5 = vld [vmem:[#allocation6 + $0x630] sm:$0xff] }
  0xe0   :  { %3128 = vmatprep.subr.bf16.mxu0 %v3127_v2  ;;  %v2839_v2 = vpack.c.bf16 %v675_v60, %v673_v59  ;;  %v1566_v60 = vld [vmem:[#allocation6 + $0xff0] sm:$0xff] }
  0xe1   :  { %2798 = vmatpush1.bf16.msra.mxu1 %v2797_v9  ;;  %v679_v9 = vld [vmem:[#allocation6 + $0x5d8] sm:$0xff] }
  0xe2   :  { %2800 = vmatprep.subr.bf16.mxu1 %v2799_v61  ;;  %v3147_v61 = vpack.c.bf16 %v1553_v1, %v1551_v0  ;;  %v1568_v1 = vld [vmem:[#allocation6 + $0x1000] sm:$0xff] }
  0xe3   :  { %3130 = vmatpush1.bf16.msra.mxu0 %v3129_v17  ;;  %v1555_v17 = vld [vmem:[#allocation6 + $0xf98] sm:$0xff]  ;;  %v3165_v10 = vpack.c.bf16 %v1568_v1, %v1566_v60 }
  0xe4   :  { %3132 = vmatprep.subr.bf16.mxu0 %v3131_v21  ;;  %v2843_v21 = vpack.c.bf16 %v679_v9, %v677_v8  ;;  %v1571_v8 = vld [vmem:[#allocation6 + $0x1018] sm:$0xff]  ;;  %v1573_v9 = vld [vmem:[#allocation6 + $0x1028] sm:$0xff] }
  0xe5   :  { %2802 = vmatpush1.bf16.msra.mxu1 %v2801_v26  ;;  %v683_v26 = vld [vmem:[#allocation6 + $0x5f8] sm:$0xff]  ;;  %v3167_v31 = vpack.c.bf16 %v1573_v9, %v1571_v8 }
  0xe6   :  { %2804 = vmatprep.subr.bf16.mxu1 %v2803_v27  ;;  %v3151_v27 = vpack.c.bf16 %v1557_v18, %v1555_v17  ;;  %v692_v17 = vld [vmem:[#allocation6 + $0x640] sm:$0xff]  ;;  %v694_v18 = vld [vmem:[#allocation6 + $0x650] sm:$0xff]  ;;  %v711_v8 = vld [vmem:[#allocation6 + $0x6d8] sm:$0xff] }
  0xe7   :  { %3134 = vmatpush1.bf16.msra.mxu0 %v3133_v33  ;;  %v1559_v33 = vld [vmem:[#allocation6 + $0xfb8] sm:$0xff]  ;;  %v2861_v39 = vpack.c.bf16 %v694_v18, %v692_v17 }
  0xe8   :  { %3136 = vmatprep.subr.bf16.mxu0 %v3135_v38  ;;  %v2847_v38 = vpack.c.bf16 %v683_v26, %v681_v25  ;;  %v3930_v25 = vld [vmem:[%s4162_s1 + $0xc] sm:$0x3f]  ;;  %v1587_v18 = vld [vmem:[#allocation6 + $0x1098] sm:$0xff] }
  0xe9   :  { %2806 = vmatpush1.bf16.msra.mxu1 %v2805_v42  ;;  %v687_v42 = vld [vmem:[#allocation6 + $0x618] sm:$0xff]  ;;  %v1773_v26 = vmul.f32 %v3930_v25, %v1766_v4 }
  0xea   :  { %2808 = vmatprep.subr.bf16.mxu1 %v2807_v43  ;;  %v3155_v43 = vpack.c.bf16 %v1561_v34, %v1559_v33  ;;  %v2851_v49 = vpack.c.bf16 %v687_v42, %v685_v20  ;;  %v1570_v33 = vld [vmem:[#allocation6 + $0x1010] sm:$0xff]  ;;  %v1572_v34 = vld [vmem:[#allocation6 + $0x1020] sm:$0xff] }
  0xeb   :  { %3138 = vmatpush1.bf16.msra.mxu0 %v3137_v46  ;;  %v1565_v46 = vld [vmem:[#allocation6 + $0xfe8] sm:$0xff]  ;;  %v698_v20 = vld [vmem:[#allocation6 + $0x670] sm:$0xff]  ;;  %v3169_v42 = vpack.c.bf16 %v1572_v34, %v1570_v33  ;;  %v715_v33 = vld [vmem:[#allocation6 + $0x6f8] sm:$0xff] }
  0xec   :  { %3140 = vmatprep.subr.bf16.mxu0 %v3139_v50  ;;  %v684_v50 = vld [vmem:[#allocation6 + $0x600] sm:$0xff] }
  0xed   :  { %2810 = vmatpush1.bf16.msra.mxu1 %v2809_v56  ;;  %v2853_v59 = vpack.c.bf16 %v686_v52, %v684_v50  ;;  %v1771_v50 = vstv %s3911_s30  ;;  %v1579_v52 = vld [vmem:[#allocation6 + $0x1058] sm:$0xff] }
  0xee   :  { %2812 = vmatprep.subr.bf16.mxu1 %v2811_v12  ;;  %v1562_v12 = vld [vmem:[#allocation6 + $0xfd0] sm:$0xff] }
  0xef   :  { %3142 = vmatpush1.bf16.msra.mxu0 %v3141_v58  ;;  %v1569_v58 = vld [vmem:[#allocation6 + $0x1008] sm:$0xff]  ;;  %v3161_v0 = vpack.c.bf16 %v1564_v57, %v1562_v12  ;;  %v702_v12 = vld [vmem:[#allocation6 + $0x690] sm:$0xff] }
  0xf0   :  { %3144 = vmatprep.subr.bf16.mxu0 %v3143_v62  ;;  %v2855_v62 = vpack.c.bf16 %v691_v55, %v689_v54  ;;  %v3163_v3 = vpack.c.bf16 %v1569_v58, %v1567_v13  ;;  %v705_v13 = vld [vmem:[#allocation6 + $0x6a8] sm:$0xff]  ;;  %v707_v58 = vld [vmem:[#allocation6 + $0x6b8] sm:$0xff] }
  0xf1   :  { %2814 = vmatpush1.bf16.msra.mxu1 %v2813_v14  ;;  %v693_v14 = vld [vmem:[#allocation6 + $0x648] sm:$0xff] }
  0xf2   :  { %2840 = vmatprep.subr.bf16.mxu1 %v2839_v2  ;;  %v695_v2 = vld [vmem:[#allocation6 + $0x658] sm:$0xff] }
  0xf3   :  { %3146 = vmatpush1.bf16.msra.mxu0 %v3145_v6  ;;  %v1768_v6 = vstv %s3909_s2  ;;  %v2859_v11 = vpack.c.bf16 %v695_v2, %v693_v14  ;;  %v2871_v14 = vpack.c.bf16 %v707_v58, %v705_v13  ;;  %v704_v2 = vld [vmem:[#allocation6 + $0x6a0] sm:$0xff]  ;;  %v721_v13 = vld [vmem:[#allocation6 + $0x728] sm:$0xff]  ;;  %v723_v58 = vld [vmem:[#allocation6 + $0x738] sm:$0xff] }
  0xf4   :  { %3148 = vmatprep.subr.bf16.mxu0 %v3147_v61  ;;  %572 = vmatmul.mubr.f32.vlgmr.msra.gmra.mrb[0].mxu1 %v3873_v30  ;;  %v1563_v30 = vld [vmem:[#allocation6 + $0xfd8] sm:$0xff]  ;;  %v2857_v61 = vpack.c.bf16 %v690_v5, %v688_v63  ;;  %v1578_v63 = vld [vmem:[#allocation6 + $0x1050] sm:$0xff]  ;;  %v1580_v5 = vld [vmem:[#allocation6 + $0x1060] sm:$0xff] }
  0xf5   :  { %2842 = vmatpush1.bf16.msra.mxu1 %v2841_v19  ;;  %847 = vmatprep.mubr.f32.mxu1 %v778_v48  ;;  %v3159_v56 = vpack.c.bf16 %v1565_v46, %v1563_v30  ;;  %v697_v19 = vld [vmem:[#allocation6 + $0x668] sm:$0xff]  ;;  %v699_v48 = vld [vmem:[#allocation6 + $0x678] sm:$0xff] }
  0xf6   :  { %2844 = vmatprep.subr.bf16.mxu1 %v2843_v21  ;;  %v3918_v21 = vld [vmem:[%s4162_s1] sm:$0x3f]  ;;  %v2863_v40 = vpack.c.bf16 %v699_v48, %v697_v19  ;;  %v1589_v19 = vld [vmem:[#allocation6 + $0x10a8] sm:$0xff] }
  0xf7   :  { %3150 = vmatpush1.bf16.msra.mxu0 %v3149_v24  ;;  %v1767_v22 = vmul.f32 %v3918_v21, %v1766_v4  ;;  %v1769_v24 = vmul.f32 %v3924_v23, %v1768_v6  ;;  %v3177_v4 = vpack.c.bf16 %v1580_v5, %v1578_v63  ;;  %v1785_v63 = vld [vmem:[#allocation6 + $0x10e8] sm:$0xff]  ;;  %v1787_v5 = vld [vmem:[#allocation6 + $0x10f8] sm:$0xff] }
  0xf8   :  { %3152 = vmatprep.subr.bf16.mxu0 %v3151_v27  ;;  %v3936_v27 = vld [vmem:[%s4162_s1 + $0x12] sm:$0x3f]  ;;  %s3939_s1 = sld [smem:[#allocation2 + $0x186]] }
  0xf9   :  { %2846 = vmatpush1.bf16.msra.mxu1 %v2845_v35  ;;  %v1774_v29 = vmul.f32 %v3936_v27, %v1768_v6  ;;  %v1575_v35 = vld [vmem:[#allocation6 + $0x1038] sm:$0xff]  ;;  %v1770_v45 = vadd.f32 %v1769_v24, %v1767_v22  ;;  %v709_v6 = vld [vmem:[#allocation6 + $0x6c8] sm:$0xff]  ;;  %v708_v24 = vld [vmem:[#allocation6 + $0x6c0] sm:$0xff] }
  0xfa   :  { %2848 = vmatprep.subr.bf16.mxu1 %v2847_v38  ;;  %v1577_v38 = vld [vmem:[#allocation6 + $0x1048] sm:$0xff]  ;;  %v2875_v22 = vpack.c.bf16 %v711_v8, %v709_v6  ;;  %v1791_v6 = vld [vmem:[#allocation6 + $0x1118] sm:$0xff] }
  0xfb   :  { %3154 = vmatpush1.bf16.msra.mxu0 %v3153_v41  ;;  %v696_v41 = vld [vmem:[#allocation6 + $0x660] sm:$0xff]  ;;  %v1775_v30 = vadd.f32 %v1774_v29, %v1773_v26  ;;  %v3171_v46 = vpack.c.bf16 %v1577_v38, %v1575_v35  ;;  %v710_v26 = vld [vmem:[#allocation6 + $0x6d0] sm:$0xff]  ;;  %v3183_v35 = vpack.c.bf16 %v1589_v19, %v1587_v18  ;;  %v725_v8 = vld [vmem:[#allocation6 + $0x748] sm:$0xff] }
  0xfc   :  { %3156 = vmatprep.subr.bf16.mxu0 %v3155_v43  ;;  %v701_v43 = vld [vmem:[#allocation6 + $0x688] sm:$0xff]  ;;  %v2865_v54 = vpack.c.bf16 %v698_v20, %v696_v41  ;;  %v1586_v38 = vld [vmem:[#allocation6 + $0x1090] sm:$0xff]  ;;  %v1591_v41 = vld [vmem:[#allocation6 + $0x10b8] sm:$0xff] }
  0xfd   :  { %2850 = vmatpush1.bf16.msra.mxu1 %v2849_v47  ;;  %v1574_v47 = vld [vmem:[#allocation6 + $0x1030] sm:$0xff]  ;;  %v2867_v55 = vpack.c.bf16 %v703_v44, %v701_v43  ;;  %v1776_v60 = vadd.f32 %v1775_v30, %v1771_v50  ;;  %v1593_v20 = vld [vmem:[#allocation6 + $0x10c8] sm:$0xff]  ;;  %v712_v44 = vld [vmem:[#allocation6 + $0x6e0] sm:$0xff] }
  0xfe   :  { %2852 = vmatprep.subr.bf16.mxu1 %v2851_v49  ;;  %v1576_v49 = vld [vmem:[#allocation6 + $0x1040] sm:$0xff]  ;;  %v1778_v17 = vstv %s3939_s1  ;;  %v1790_v19 = vld [vmem:[#allocation6 + $0x1110] sm:$0xff] }
  0xff   :  { %3158 = vmatpush1.bf16.msra.mxu0 %v3157_v53  ;;  %v1581_v53 = vld [vmem:[#allocation6 + $0x1068] sm:$0xff]  ;;  %v3173_v57 = vpack.c.bf16 %v1576_v49, %v1574_v47  ;;  %v719_v47 = vld [vmem:[#allocation6 + $0x718] sm:$0xff]  ;;  %v1788_v18 = vld [vmem:[#allocation6 + $0x1100] sm:$0xff] }
 0x100   :  { %3160 = vmatprep.subr.bf16.mxu0 %v3159_v56  ;;  %v700_v56 = vld [vmem:[#allocation6 + $0x680] sm:$0xff] }
 0x101   :  { %2854 = vmatpush1.bf16.msra.mxu1 %v2853_v59  ;;  %v1772_v59 = vadd.f32 %v1771_v50, %v1770_v45  ;;  %v2869_v1 = vpack.c.bf16 %v702_v12, %v700_v56  ;;  %v714_v45 = vld [vmem:[#allocation6 + $0x6f0] sm:$0xff]  ;;  %v3187_v50 = vpack.c.bf16 %v1593_v20, %v1591_v41  ;;  %v716_v56 = vld [vmem:[#allocation6 + $0x700] sm:$0xff] }
 0x102   :  { %2856 = vmatprep.subr.bf16.mxu1 %v2855_v62  ;;  %v3175_v62 = vpack.c.bf16 %v1581_v53, %v1579_v52  ;;  %v1590_v52 = vld [vmem:[#allocation6 + $0x10b0] sm:$0xff]  ;;  %v1592_v53 = vld [vmem:[#allocation6 + $0x10c0] sm:$0xff] }
 0x103   :  { %3162 = vmatpush1.bf16.msra.mxu0 %v3161_v0  ;;  %v1585_v0 = vld [vmem:[#allocation6 + $0x1088] sm:$0xff]  ;;  %v1777_v9 = vmax.f32 %v1772_v59, %v1776_v60  ;;  %v718_v12 = vld [vmem:[#allocation6 + $0x710] sm:$0xff]  ;;  %v1597_v60 = vcombine.high %v3888_v36, %v3888_v36 }
 0x104   :  { %3164 = vmatprep.subr.bf16.mxu0 %v3163_v3  ;;  %v706_v3 = vld [vmem:[#allocation6 + $0x6b0] sm:$0xff] }
 0x105   :  { %2858 = vmatpush1.bf16.msra.mxu1 %v2857_v61  ;;  %v2873_v48 = vpack.c.bf16 %v706_v3, %v704_v2  ;;  %v1779_v34 = vmul.f32 %v1778_v17, %v1777_v9  ;;  %v2887_v2 = vpack.c.bf16 %v723_v58, %v721_v13  ;;  %v720_v3 = vld [vmem:[#allocation6 + $0x720] sm:$0xff]  ;;  %v727_v9 = vld [vmem:[#allocation6 + $0x758] sm:$0xff]  ;;  %v1794_v41 = vld [vmem:[#allocation6 + $0x1130] sm:$0xff] }
 0x106   :  { %2860 = vmatprep.subr.bf16.mxu1 %v2859_v11  ;;  %v1584_v11 = vld [vmem:[#allocation6 + $0x1080] sm:$0xff]  ;;  %v734_v13 = vld [vmem:[#allocation6 + $0x790] sm:$0xff]  ;;  %v1803_v58 = vld [vmem:[#allocation6 + $0x1178] sm:$0xff] }
 0x107   :  { %3166 = vmatpush1.bf16.msra.mxu0 %v3165_v10  ;;  %v1582_v10 = vld [vmem:[#allocation6 + $0x1070] sm:$0xff] }
 0x108   :  { %3168 = vmatprep.subr.bf16.mxu0 %v3167_v31  ;;  %v3181_v29 = vpack.c.bf16 %v1584_v11, %v1582_v10  ;;  %v713_v31 = vld [vmem:[#allocation6 + $0x6e8] sm:$0xff]  ;;  %v3191_v10 = vpack.c.bf16 %v1787_v5, %v1785_v63  ;;  %v1611_v11 = vrot.slane %v1597_v60, %v3777_v15  ;;  %v951_v60 = vld [vmem:[#allocation6 + $0x878] sm:$0xff]  ;;  %v1800_v5 = vld [vmem:[#allocation6 + $0x1160] sm:$0xff] }
 0x109   :  { %2862 = vmatpush1.bf16.msra.mxu1 %v2861_v39  ;;  %v1588_v39 = vld [vmem:[#allocation6 + $0x10a0] sm:$0xff]  ;;  %v2879_v43 = vpack.c.bf16 %v715_v33, %v713_v31  ;;  %v726_v31 = vld [vmem:[#allocation6 + $0x750] sm:$0xff]  ;;  %v1795_v33 = vld [vmem:[#allocation6 + $0x1138] sm:$0xff] }
 0x10a   :  { %1682 = vmatmul.mubr.f32.vlgmr.msra.gmra.mrb[6].mxu0 %v3894_v51  ;;  %2864 = vmatprep.subr.bf16.mxu1 %v2863_v40  ;;  %v1583_v51 = vld [vmem:[#allocation6 + $0x1078] sm:$0xff]  ;;  %v1780_v40 = vstv %s3944_s0  ;;  %v3185_v30 = vpack.c.bf16 %v1588_v39, %v1586_v38  ;;  %v3197_v39 = vpack.c.bf16 %v1790_v19, %v1788_v18 }
 0x10b   :  { %3170 = vmatpush1.bf16.msra.mxu0 %v3169_v42  ;;  %1752 = vmatprep.mubr.f32.mxu0 %v3592_v7  ;;  %v3179_v61 = vpack.c.bf16 %v1585_v0, %v1583_v51  ;;  %v2877_v42 = vpack.c.bf16 %v710_v26, %v708_v24  ;;  %v1781_v49 = vadd.f32 %v1780_v40, %v1779_v34  ;;  %v1784_v51 = vld [vmem:[#allocation6 + $0x10e0] sm:$0xff]  ;;  %v1786_v0 = vld [vmem:[#allocation6 + $0x10f0] sm:$0xff]  ;;  %v1793_v24 = vld [vmem:[#allocation6 + $0x1128] sm:$0xff] }
 0x10c   :  { %3172 = vmatprep.subr.bf16.mxu0 %v3171_v46  ;;  %v717_v46 = vld [vmem:[#allocation6 + $0x708] sm:$0xff]  ;;  %v3193_v17 = vpack.c.bf16 %v1786_v0, %v1784_v51  ;;  %v2891_v26 = vpack.c.bf16 %v727_v9, %v725_v8  ;;  %v1792_v40 = vld [vmem:[#allocation6 + $0x1120] sm:$0xff]  ;;  %v1802_v51 = vld [vmem:[#allocation6 + $0x1170] sm:$0xff] }
 0x10d   :  { %2866 = vmatpush1.bf16.msra.mxu1 %v2865_v54  ;;  %v2881_v54 = vpack.c.bf16 %v714_v45, %v712_v44  ;;  %v3948_v59 = vmax.f32 %v1781_v49, 0.0  ;;  %v729_v34 = vld [vmem:[#allocation6 + $0x768] sm:$0xff]  ;;  %v728_v45 = vld [vmem:[#allocation6 + $0x760] sm:$0xff]  ;;  %v735_v49 = vld [vmem:[#allocation6 + $0x798] sm:$0xff] }
 0x10e   :  { %2868 = vmatprep.subr.bf16.mxu1 %v2867_v55  ;;  %v2883_v55 = vpack.c.bf16 %v719_v47, %v717_v46  ;;  %v1799_v46 = vld [vmem:[#allocation6 + $0x1158] sm:$0xff]  ;;  %v733_v47 = vld [vmem:[#allocation6 + $0x788] sm:$0xff] }
 0x10f   :  { %3174 = vmatpush1.bf16.msra.mxu0 %v3173_v57  ;;  %v3189_v57 = vpack.c.bf16 %v1592_v53, %v1590_v52  ;;  %v3954_v36 = vrot.slane %v3948_v59, %v3777_v15  ;;  %v1796_v52 = vld [vmem:[#allocation6 + $0x1140] sm:$0xff]  ;;  %v1798_v53 = vld [vmem:[#allocation6 + $0x1150] sm:$0xff]  ;;  %v955_v8 = vld [vmem:[#allocation6 + $0x898] sm:$0xff] }
 0x110   :  { %3176 = vmatprep.subr.bf16.mxu0 %v3175_v62  ;;  %v1595_v62 = vld [vmem:[#allocation6 + $0x10d8] sm:$0xff]  ;;  %v3205_v63 = vpack.c.bf16 %v1798_v53, %v1796_v52  ;;  %v957_v9 = vld [vmem:[#allocation6 + $0x8a8] sm:$0xff] }
 0x111   :  { %2870 = vmatpush1.bf16.msra.mxu1 %v2869_v1  ;;  %v2885_v1 = vpack.c.bf16 %v718_v12, %v716_v56  ;;  %v1890_v38 = vcombine.high %v3954_v36, %v3954_v36  ;;  %v1801_v56 = vld [vmem:[#allocation6 + $0x1168] sm:$0xff]  ;;  %v2899_v12 = vpack.c.bf16 %v735_v49, %v733_v47  ;;  %v1814_v47 = vld [vmem:[#allocation6 + $0x11d0] sm:$0xff] }
 0x112   :  { %2872 = vmatprep.subr.bf16.mxu1 %v2871_v14  ;;  %v1789_v14 = vld [vmem:[#allocation6 + $0x1108] sm:$0xff] }
 0x113   :  { %3178 = vmatpush1.bf16.msra.mxu0 %v3177_v4  ;;  %v722_v4 = vld [vmem:[#allocation6 + $0x730] sm:$0xff]  ;;  %v1817_v52 = vld [vmem:[#allocation6 + $0x11e8] sm:$0xff] }
 0x114   :  { %3180 = vmatprep.subr.bf16.mxu0 %v3179_v61  ;;  %v1594_v61 = vld [vmem:[#allocation6 + $0x10d0] sm:$0xff] }
 0x115   :  { %2874 = vmatpush1.bf16.msra.mxu1 %v2873_v48  ;;  %v2889_v48 = vpack.c.bf16 %v722_v4, %v720_v3  ;;  %v950_v3 = vld [vmem:[#allocation6 + $0x870] sm:$0xff]  ;;  %v952_v4 = vld [vmem:[#allocation6 + $0x880] sm:$0xff] }
 0x116   :  { %2876 = vmatprep.subr.bf16.mxu1 %v2875_v22  ;;  %v3195_v22 = vpack.c.bf16 %v1791_v6, %v1789_v14  ;;  %v1805_v14 = vld [vmem:[#allocation6 + $0x1188] sm:$0xff]  ;;  %v1807_v6 = vld [vmem:[#allocation6 + $0x1198] sm:$0xff]  ;;  %v2929_v18 = vpack.c.bf16 %v952_v4, %v950_v3 }
 0x117   :  { %3182 = vmatpush1.bf16.msra.mxu0 %v3181_v29  ;;  %v724_v29 = vld [vmem:[#allocation6 + $0x740] sm:$0xff]  ;;  %v3211_v19 = vpack.c.bf16 %v1807_v6, %v1805_v14  ;;  %v1823_v14 = vld [vmem:[#allocation6 + $0x1218] sm:$0xff]  ;;  %v973_v3 = vld [vmem:[#allocation6 + $0x928] sm:$0xff] }
 0x118   :  { %3184 = vmatprep.subr.bf16.mxu0 %v3183_v35  ;;  %v731_v35 = vld [vmem:[#allocation6 + $0x778] sm:$0xff]  ;;  %v2893_v20 = vpack.c.bf16 %v726_v31, %v724_v29  ;;  %v1820_v6 = vld [vmem:[#allocation6 + $0x1200] sm:$0xff] }
 0x119   :  { %2878 = vmatpush1.bf16.msra.mxu1 %v2877_v42  ;;  %v3199_v42 = vpack.c.bf16 %v1795_v33, %v1793_v24  ;;  %v2895_v44 = vpack.c.bf16 %v731_v35, %v729_v34  ;;  %v954_v24 = vld [vmem:[#allocation6 + $0x890] sm:$0xff]  ;;  %v1811_v29 = vld [vmem:[#allocation6 + $0x11b8] sm:$0xff]  ;;  %v961_v33 = vld [vmem:[#allocation6 + $0x8c8] sm:$0xff] }
 0x11a   :  { %2880 = vmatprep.subr.bf16.mxu1 %v2879_v43  ;;  %v1797_v43 = vld [vmem:[#allocation6 + $0x1148] sm:$0xff]  ;;  %v959_v31 = vld [vmem:[#allocation6 + $0x8b8] sm:$0xff]  ;;  %v1808_v35 = vld [vmem:[#allocation6 + $0x11a0] sm:$0xff] }
 0x11b   :  { %3186 = vmatpush1.bf16.msra.mxu0 %v3185_v30  ;;  %v730_v30 = vld [vmem:[#allocation6 + $0x770] sm:$0xff] }
 0x11c   :  { %3188 = vmatprep.subr.bf16.mxu0 %v3187_v50  ;;  %v3201_v50 = vpack.c.bf16 %v1794_v41, %v1792_v40  ;;  %v1813_v41 = vld [vmem:[#allocation6 + $0x11c8] sm:$0xff] }
 0x11d   :  { %2882 = vmatpush1.bf16.msra.mxu1 %v2881_v54  ;;  %v2897_v54 = vpack.c.bf16 %v730_v30, %v728_v45  ;;  %v963_v45 = vld [vmem:[#allocation6 + $0x8d8] sm:$0xff]  ;;  %v965_v30 = vld [vmem:[#allocation6 + $0x8e8] sm:$0xff] }
 0x11e   :  { %2884 = vmatprep.subr.bf16.mxu1 %v2883_v55  ;;  %v3203_v55 = vpack.c.bf16 %v1799_v46, %v1797_v43  ;;  %v960_v43 = vld [vmem:[#allocation6 + $0x8c0] sm:$0xff]  ;;  %v2939_v53 = vpack.c.bf16 %v965_v30, %v963_v45 }
 0x11f   :  { %3190 = vmatpush1.bf16.msra.mxu0 %v3189_v57  ;;  %v732_v57 = vld [vmem:[#allocation6 + $0x780] sm:$0xff] }
 0x120   :  { %1712 = vmatprep.subr.mxu0 %v1595_v62  ;;  %v953_v62 = vld [vmem:[#allocation6 + $0x888] sm:$0xff]  ;;  %v2901_v0 = vpack.c.bf16 %v734_v13, %v732_v57 }
 0x121   :  { %2886 = vmatpush1.bf16.msra.mxu1 %v2885_v1  ;;  %v3207_v1 = vpack.c.bf16 %v1803_v58, %v1801_v56  ;;  %v1819_v56 = vld [vmem:[#allocation6 + $0x11f8] sm:$0xff]  ;;  %v969_v57 = vld [vmem:[#allocation6 + $0x908] sm:$0xff]  ;;  %v1816_v58 = vld [vmem:[#allocation6 + $0x11e0] sm:$0xff] }
 0x122   :  { %2888 = vmatprep.subr.bf16.mxu1 %v2887_v2  ;;  %v2927_v2 = vpack.c.bf16 %v953_v62, %v951_v60  ;;  %v1818_v60 = vld [vmem:[#allocation6 + $0x11f0] sm:$0xff] }
 0x123   :  { %1713 = vmatpush1.msra.mxu0 %v1594_v61  ;;  %v3962_v61 = vrot.slane %v3842_v32, %v3777_v15  ;;  %v3225_v4 = vpack.c.bf16 %v1818_v60, %v1816_v58  ;;  %v982_v60 = vld [vmem:[#allocation6 + $0x970] sm:$0xff] }
 0x124   :  { %3192 = vmatprep.subr.bf16.mxu0 %v3191_v10  ;;  %2596 = vmatmul.mubr.msk.f32.vlgmr.msra.gmra.mrb[6].mxu0 %vm341_vm0, %v1611_v11  ;;  %v3209_v10 = vpack.c.bf16 %v1802_v51, %v1800_v5  ;;  %v1804_v11 = vld [vmem:[#allocation6 + $0x1180] sm:$0xff]  ;;  %v1821_v5 = vld [vmem:[#allocation6 + $0x1208] sm:$0xff] }
 0x125   :  { %3194 = vmatpush1.bf16.msra.mxu0 %v3193_v17  ;;  %2890 = vmatpush1.bf16.msra.mxu1 %v2889_v48  ;;  %v1806_v17 = vld [vmem:[#allocation6 + $0x1190] sm:$0xff]  ;;  %v1809_v48 = vld [vmem:[#allocation6 + $0x11a8] sm:$0xff]  ;;  %v1056_v32 = vcombine.high %v3962_v61, %v3962_v61 }
 0x126   :  { %3196 = vmatprep.subr.bf16.mxu0 %v3195_v22  ;;  %2892 = vmatprep.subr.bf16.mxu1 %v2891_v26  ;;  %v2931_v22 = vpack.c.bf16 %v957_v9, %v955_v8  ;;  %v956_v26 = vld [vmem:[#allocation6 + $0x8a0] sm:$0xff]  ;;  %v3213_v34 = vpack.c.bf16 %v1806_v17, %v1804_v11  ;;  %v3215_v40 = vpack.c.bf16 %v1811_v29, %v1809_v48  ;;  %v1822_v8 = vld [vmem:[#allocation6 + $0x1210] sm:$0xff]  ;;  %v1825_v11 = vld [vmem:[#allocation6 + $0x1228] sm:$0xff] }
 0x127   :  { %1959 = vmatprep.mubr.f32.mxu0 %v1890_v38  ;;  %v1810_v38 = vld [vmem:[#allocation6 + $0x11b0] sm:$0xff]  ;;  %v1827_v48 = vld [vmem:[#allocation6 + $0x1238] sm:$0xff]  ;;  %v1824_v29 = vld [vmem:[#allocation6 + $0x1220] sm:$0xff] }
 0x128   :  { %v3217_v46 = vpack.c.bf16 %v1810_v38, %v1808_v35  ;;  %v974_v38 = vld [vmem:[#allocation6 + $0x930] sm:$0xff] }
 0x129   :  { %3198 = vmatpush1.bf16.msra.mxu0 %v3197_v39  ;;  %2894 = vmatpush1.bf16.msra.mxu1 %v2893_v20  ;;  %v2933_v39 = vpack.c.bf16 %v956_v26, %v954_v24  ;;  %v2935_v20 = vpack.c.bf16 %v961_v33, %v959_v31  ;;  %v977_v24 = vld [vmem:[#allocation6 + $0x948] sm:$0xff]  ;;  %v3229_v26 = vpack.c.bf16 %v1822_v8, %v1820_v6  ;;  %v1826_v31 = vld [vmem:[#allocation6 + $0x1230] sm:$0xff] }
 0x12a   :  { %3200 = vmatprep.subr.bf16.mxu0 %v3199_v42  ;;  %2896 = vmatprep.subr.bf16.mxu1 %v2895_v44  ;;  %v958_v42 = vld [vmem:[#allocation6 + $0x8b0] sm:$0xff]  ;;  %v1815_v44 = vld [vmem:[#allocation6 + $0x11d8] sm:$0xff]  ;;  %v1841_v8 = vld [vmem:[#allocation6 + $0x12a8] sm:$0xff] }
 0x12b   :  { %v2937_v49 = vpack.c.bf16 %v960_v43, %v958_v42  ;;  %v3233_v42 = vpack.c.bf16 %v1826_v31, %v1824_v29  ;;  %v1828_v43 = vld [vmem:[#allocation6 + $0x1240] sm:$0xff]  ;;  %v1845_v31 = vld [vmem:[#allocation6 + $0x12c8] sm:$0xff] }
 0x12d   :  { %3202 = vmatpush1.bf16.msra.mxu0 %v3201_v50  ;;  %2898 = vmatpush1.bf16.msra.mxu1 %v2897_v54  ;;  %v3219_v50 = vpack.c.bf16 %v1815_v44, %v1813_v41  ;;  %v962_v54 = vld [vmem:[#allocation6 + $0x8d0] sm:$0xff]  ;;  %v979_v41 = vld [vmem:[#allocation6 + $0x958] sm:$0xff] }
 0x12e   :  { %3204 = vmatprep.subr.bf16.mxu0 %v3203_v55  ;;  %2900 = vmatprep.subr.bf16.mxu1 %v2899_v12  ;;  %v964_v55 = vld [vmem:[#allocation6 + $0x8e0] sm:$0xff]  ;;  %v967_v12 = vld [vmem:[#allocation6 + $0x8f8] sm:$0xff]  ;;  %v1830_v44 = vld [vmem:[#allocation6 + $0x1250] sm:$0xff] }
 0x12f   :  { %v2941_v62 = vpack.c.bf16 %v964_v55, %v962_v54  ;;  %v2943_v51 = vpack.c.bf16 %v969_v57, %v967_v12  ;;  %v3237_v54 = vpack.c.bf16 %v1830_v44, %v1828_v43  ;;  %v1832_v55 = vld [vmem:[#allocation6 + $0x1260] sm:$0xff]  ;;  %v2044_v43 = vstv %s3971_s15 }
 0x130   :  { %v2046_v44 = vstv %s3973_s16 }
 0x131   :  { %3206 = vmatpush1.bf16.msra.mxu0 %v3205_v63  ;;  %2902 = vmatpush1.bf16.msra.mxu1 %v2901_v0  ;;  %v3223_v63 = vpack.c.bf16 %v1819_v56, %v1817_v52  ;;  %v966_v0 = vld [vmem:[#allocation6 + $0x8f0] sm:$0xff]  ;;  %v983_v52 = vld [vmem:[#allocation6 + $0x978] sm:$0xff] }
 0x132   :  { %3208 = vmatprep.subr.bf16.mxu0 %v3207_v1  ;;  %2928 = vmatprep.subr.bf16.mxu1 %v2927_v2  ;;  %v968_v1 = vld [vmem:[#allocation6 + $0x900] sm:$0xff]  ;;  %v971_v2 = vld [vmem:[#allocation6 + $0x918] sm:$0xff]  ;;  %v1834_v56 = vld [vmem:[#allocation6 + $0x1270] sm:$0xff] }
 0x133   :  { %v2945_v9 = vpack.c.bf16 %v968_v1, %v966_v0  ;;  %v2947_v17 = vpack.c.bf16 %v973_v3, %v971_v2  ;;  %v989_v0 = vld [vmem:[#allocation6 + $0x9a8] sm:$0xff]  ;;  %v1836_v2 = vld [vmem:[#allocation6 + $0x1280] sm:$0xff]  ;;  %v1838_v3 = vld [vmem:[#allocation6 + $0x1290] sm:$0xff] }
 0x134   :  { %848 = vmatmul.mubr.f32.vlgmr.msra.gmra.mrb[2].mxu1 %v3902_v16  ;;  %v1812_v16 = vld [vmem:[#allocation6 + $0x11c0] sm:$0xff] }
 0x135   :  { %3210 = vmatpush1.bf16.msra.mxu0 %v3209_v10  ;;  %2930 = vmatpush1.bf16.msra.mxu1 %v2929_v18  ;;  %v3221_v13 = vpack.c.bf16 %v1814_v47, %v1812_v16  ;;  %v3227_v10 = vpack.c.bf16 %v1823_v14, %v1821_v5  ;;  %v970_v18 = vld [vmem:[#allocation6 + $0x910] sm:$0xff]  ;;  %v1839_v5 = vld [vmem:[#allocation6 + $0x1298] sm:$0xff]  ;;  %v3241_v14 = vpack.c.bf16 %v1834_v56, %v1832_v55 }
 0x136   :  { %3212 = vmatprep.subr.bf16.mxu0 %v3211_v19  ;;  %2932 = vmatprep.subr.bf16.mxu1 %v2931_v22  ;;  %v972_v19 = vld [vmem:[#allocation6 + $0x920] sm:$0xff]  ;;  %v975_v22 = vld [vmem:[#allocation6 + $0x938] sm:$0xff]  ;;  %v978_v47 = vld [vmem:[#allocation6 + $0x950] sm:$0xff]  ;;  %v2051_v55 = vmul.f32 %v3930_v25, %v2044_v43  ;;  %v2052_v56 = vmul.f32 %v3936_v27, %v2046_v44 }
 0x137   :  { %1125 = vmatprep.mubr.f32.mxu1 %v1056_v32  ;;  %v2949_v33 = vpack.c.bf16 %v972_v19, %v970_v18  ;;  %v3231_v32 = vpack.c.bf16 %v1827_v48, %v1825_v11  ;;  %v2951_v35 = vpack.c.bf16 %v977_v24, %v975_v22  ;;  %v988_v11 = vld [vmem:[#allocation6 + $0x9a0] sm:$0xff]  ;;  %v991_v18 = vld [vmem:[#allocation6 + $0x9b8] sm:$0xff]  ;;  %v993_v19 = vld [vmem:[#allocation6 + $0x9c8] sm:$0xff]  ;;  %v3245_v48 = vpack.c.bf16 %v1838_v3, %v1836_v2 }
 0x138   :  { %v1840_v22 = vld [vmem:[#allocation6 + $0x12a0] sm:$0xff]  ;;  %v1842_v24 = vld [vmem:[#allocation6 + $0x12b0] sm:$0xff]  ;;  %v2053_v2 = vadd.f32 %v2052_v56, %v2051_v55  ;;  %v1867_v55 = vld [vmem:[#allocation6 + $0x1378] sm:$0xff] }
 0x139   :  { %3214 = vmatpush1.bf16.msra.mxu0 %v3213_v34  ;;  %2934 = vmatpush1.bf16.msra.mxu1 %v2933_v39  ;;  %v1829_v34 = vld [vmem:[#allocation6 + $0x1248] sm:$0xff]  ;;  %v976_v39 = vld [vmem:[#allocation6 + $0x940] sm:$0xff] }
 0x13a   :  { %3216 = vmatprep.subr.bf16.mxu0 %v3215_v40  ;;  %2936 = vmatprep.subr.bf16.mxu1 %v2935_v20  ;;  %v1831_v40 = vld [vmem:[#allocation6 + $0x1258] sm:$0xff]  ;;  %v981_v20 = vld [vmem:[#allocation6 + $0x968] sm:$0xff]  ;;  %v2953_v45 = vpack.c.bf16 %v976_v39, %v974_v38  ;;  %v1852_v3 = vld [vmem:[#allocation6 + $0x1300] sm:$0xff] }
 0x13b   :  { %v3235_v30 = vpack.c.bf16 %v1831_v40, %v1829_v34  ;;  %v2955_v16 = vpack.c.bf16 %v981_v20, %v979_v41  ;;  %v992_v34 = vld [vmem:[#allocation6 + $0x9c0] sm:$0xff]  ;;  %v995_v38 = vld [vmem:[#allocation6 + $0x9d8] sm:$0xff]  ;;  %v997_v39 = vld [vmem:[#allocation6 + $0x9e8] sm:$0xff]  ;;  %v3249_v40 = vpack.c.bf16 %v1842_v24, %v1840_v22 }
 0x13c   :  { %v1844_v41 = vld [vmem:[#allocation6 + $0x12c0] sm:$0xff]  ;;  %v1846_v20 = vld [vmem:[#allocation6 + $0x12d0] sm:$0xff]  ;;  %v1009_v22 = vld [vmem:[#allocation6 + $0xa48] sm:$0xff] }
 0x13d   :  { %3218 = vmatpush1.bf16.msra.mxu0 %v3217_v46  ;;  %2938 = vmatpush1.bf16.msra.mxu1 %v2937_v49  ;;  %v1833_v46 = vld [vmem:[#allocation6 + $0x1268] sm:$0xff]  ;;  %v980_v49 = vld [vmem:[#allocation6 + $0x960] sm:$0xff] }
 0x13e   :  { %3220 = vmatprep.subr.bf16.mxu0 %v3219_v50  ;;  %2940 = vmatprep.subr.bf16.mxu1 %v2939_v53  ;;  %v1835_v50 = vld [vmem:[#allocation6 + $0x1278] sm:$0xff]  ;;  %v985_v53 = vld [vmem:[#allocation6 + $0x988] sm:$0xff]  ;;  %v2957_v12 = vpack.c.bf16 %v980_v49, %v978_v47  ;;  %v996_v47 = vld [vmem:[#allocation6 + $0x9e0] sm:$0xff] }
 0x13f   :  { %v3239_v57 = vpack.c.bf16 %v1835_v50, %v1833_v46  ;;  %v2959_v58 = vpack.c.bf16 %v985_v53, %v983_v52  ;;  %v2971_v46 = vpack.c.bf16 %v997_v39, %v995_v38  ;;  %v1851_v49 = vld [vmem:[#allocation6 + $0x12f8] sm:$0xff]  ;;  %v1001_v52 = vld [vmem:[#allocation6 + $0xa08] sm:$0xff]  ;;  %v2045_v53 = vmul.f32 %v3918_v21, %v2044_v43  ;;  %v1000_v21 = vld [vmem:[#allocation6 + $0xa00] sm:$0xff] }
 0x140   :  { %v999_v50 = vld [vmem:[#allocation6 + $0x9f8] sm:$0xff]  ;;  %v1006_v39 = vld [vmem:[#allocation6 + $0xa30] sm:$0xff]  ;;  %v1229_v56 = vld [vmem:[#allocation6 + $0xb48] sm:$0xff] }
 0x141   :  { %3222 = vmatpush1.bf16.msra.mxu0 %v3221_v13  ;;  %2942 = vmatpush1.bf16.msra.mxu1 %v2941_v62  ;;  %v1837_v13 = vld [vmem:[#allocation6 + $0x1288] sm:$0xff]  ;;  %v984_v62 = vld [vmem:[#allocation6 + $0x980] sm:$0xff] }
 0x142   :  { %3224 = vmatprep.subr.bf16.mxu0 %v3223_v63  ;;  %2944 = vmatprep.subr.bf16.mxu1 %v2943_v51  ;;  %v987_v51 = vld [vmem:[#allocation6 + $0x998] sm:$0xff]  ;;  %v3243_v6 = vpack.c.bf16 %v1839_v5, %v1837_v13  ;;  %v1850_v13 = vld [vmem:[#allocation6 + $0x12f0] sm:$0xff]  ;;  %v2975_v5 = vpack.c.bf16 %v1001_v52, %v999_v50  ;;  %v1865_v50 = vld [vmem:[#allocation6 + $0x1368] sm:$0xff] }
 0x145   :  { %3226 = vmatpush1.bf16.msra.mxu0 %v3225_v4  ;;  %2946 = vmatpush1.bf16.msra.mxu1 %v2945_v9  ;;  %v2961_v4 = vpack.c.bf16 %v984_v62, %v982_v60  ;;  %v2963_v9 = vpack.c.bf16 %v989_v0, %v987_v51  ;;  %v1853_v62 = vld [vmem:[#allocation6 + $0x1308] sm:$0xff]  ;;  %v998_v51 = vld [vmem:[#allocation6 + $0x9f0] sm:$0xff]  ;;  %v1855_v0 = vld [vmem:[#allocation6 + $0x1318] sm:$0xff] }
 0x146   :  { %3228 = vmatprep.subr.bf16.mxu0 %v3227_v10  ;;  %2948 = vmatprep.subr.bf16.mxu1 %v2947_v17  ;;  %v986_v10 = vld [vmem:[#allocation6 + $0x990] sm:$0xff]  ;;  %v1843_v17 = vld [vmem:[#allocation6 + $0x12b8] sm:$0xff] }
 0x147   :  { %v3247_v29 = vpack.c.bf16 %v1843_v17, %v1841_v8  ;;  %v2049_v8 = vstv %s3975_s5  ;;  %v1002_v17 = vld [vmem:[#allocation6 + $0xa10] sm:$0xff] }
 0x149   :  { %3230 = vmatpush1.bf16.msra.mxu0 %v3229_v26  ;;  %2950 = vmatpush1.bf16.msra.mxu1 %v2949_v33  ;;  %v2965_v26 = vpack.c.bf16 %v988_v11, %v986_v10  ;;  %v2967_v33 = vpack.c.bf16 %v993_v19, %v991_v18  ;;  %v1857_v10 = vld [vmem:[#allocation6 + $0x1328] sm:$0xff]  ;;  %v1004_v18 = vld [vmem:[#allocation6 + $0xa20] sm:$0xff]  ;;  %v1859_v19 = vld [vmem:[#allocation6 + $0x1338] sm:$0xff] }
 0x14a   :  { %3232 = vmatprep.subr.bf16.mxu0 %v3231_v32  ;;  %2952 = vmatprep.subr.bf16.mxu1 %v2951_v35  ;;  %v990_v32 = vld [vmem:[#allocation6 + $0x9b0] sm:$0xff]  ;;  %v1847_v35 = vld [vmem:[#allocation6 + $0x12d8] sm:$0xff] }
 0x14d   :  { %3234 = vmatpush1.bf16.msra.mxu0 %v3233_v42  ;;  %2954 = vmatpush1.bf16.msra.mxu1 %v2953_v45  ;;  %v2969_v42 = vpack.c.bf16 %v992_v34, %v990_v32  ;;  %v3251_v45 = vpack.c.bf16 %v1847_v35, %v1845_v31  ;;  %v1856_v31 = vld [vmem:[#allocation6 + $0x1320] sm:$0xff]  ;;  %v2981_v32 = vpack.c.bf16 %v1004_v18, %v1002_v17  ;;  %v1861_v35 = vld [vmem:[#allocation6 + $0x1348] sm:$0xff] }
 0x14e   :  { %3236 = vmatprep.subr.bf16.mxu0 %v3235_v30  ;;  %2956 = vmatprep.subr.bf16.mxu1 %v2955_v16  ;;  %v3967_v63 = vpop.f32.mrb[0].mxu0  ;;  %v1849_v30 = vld [vmem:[#allocation6 + $0x12e8] sm:$0xff]  ;;  %v994_v16 = vld [vmem:[#allocation6 + $0x9d0] sm:$0xff]  ;;  %v3263_v34 = vpack.c.bf16 %v1859_v19, %v1857_v10  ;;  %v1232_v18 = vld [vmem:[#allocation6 + $0xb60] sm:$0xff] }
 0x14f   :  { %v3969_v1 = vpop.f32.mrb[1].mxu0  ;;  %v3255_v60 = vpack.c.bf16 %v1851_v49, %v1849_v30  ;;  %v1862_v30 = vld [vmem:[#allocation6 + $0x1350] sm:$0xff] }
 0x150   :  { %v1234_v19 = vld [vmem:[#allocation6 + $0xb70] sm:$0xff] }
 0x151   :  { %3238 = vmatpush1.bf16.msra.mxu0 %v3237_v54  ;;  %2958 = vmatpush1.bf16.msra.mxu1 %v2957_v12  ;;  %v2047_v54 = vmul.f32 %v3924_v23, %v2046_v44  ;;  %v3253_v12 = vpack.c.bf16 %v1846_v20, %v1844_v41  ;;  %v1003_v23 = vld [vmem:[#allocation6 + $0xa18] sm:$0xff]  ;;  %v1013_v20 = vld [vmem:[#allocation6 + $0xa68] sm:$0xff] }
 0x152   :  { %3240 = vmatprep.subr.bf16.mxu0 %v3239_v57  ;;  %2960 = vmatprep.subr.bf16.mxu1 %v2959_v58  ;;  %v1848_v57 = vld [vmem:[#allocation6 + $0x12e0] sm:$0xff]  ;;  %v2973_v58 = vpack.c.bf16 %v996_v47, %v994_v16  ;;  %v1863_v41 = vld [vmem:[#allocation6 + $0x1358] sm:$0xff]  ;;  %v2056_v16 = vstv %s3983_s17 }
 0x153   :  { %v2048_v25 = vadd.f32 %v2047_v54, %v2045_v53  ;;  %v3257_v27 = vpack.c.bf16 %v1850_v13, %v1848_v57  ;;  %v3267_v49 = vpack.c.bf16 %v1863_v41, %v1861_v35  ;;  %v1010_v53 = vld [vmem:[#allocation6 + $0xa50] sm:$0xff]  ;;  %v1012_v54 = vld [vmem:[#allocation6 + $0xa60] sm:$0xff]  ;;  %v1241_v41 = vld [vmem:[#allocation6 + $0xba8] sm:$0xff] }
 0x154   :  { %v1238_v35 = vld [vmem:[#allocation6 + $0xb90] sm:$0xff] }
 0x155   :  { %3242 = vmatpush1.bf16.msra.mxu0 %v3241_v14  ;;  %2962 = vmatpush1.bf16.msra.mxu1 %v2961_v4  ;;  %v1005_v14 = vld [vmem:[#allocation6 + $0xa28] sm:$0xff]  ;;  %v1854_v4 = vld [vmem:[#allocation6 + $0x1310] sm:$0xff]  ;;  %v2050_v24 = vadd.f32 %v2049_v8, %v2048_v25  ;;  %v1871_v25 = vld [vmem:[#allocation6 + $0x1398] sm:$0xff] }
 0x156   :  { %3244 = vmatprep.subr.bf16.mxu0 %v3243_v6  ;;  %2964 = vmatprep.subr.bf16.mxu1 %v2963_v9  ;;  %v2977_v6 = vpack.c.bf16 %v1000_v21, %v998_v51  ;;  %v3259_v9 = vpack.c.bf16 %v1855_v0, %v1853_v62  ;;  %v2979_v11 = vpack.c.bf16 %v1005_v14, %v1003_v23  ;;  %v1869_v21 = vld [vmem:[#allocation6 + $0x1388] sm:$0xff]  ;;  %v1228_v23 = vld [vmem:[#allocation6 + $0xb40] sm:$0xff]  ;;  %v1230_v14 = vld [vmem:[#allocation6 + $0xb50] sm:$0xff] }
 0x157   :  { %v2989_v62 = vpack.c.bf16 %v1012_v54, %v1010_v53  ;;  %v3271_v51 = vpack.c.bf16 %v1867_v55, %v1865_v50  ;;  %v3275_v10 = vpack.c.bf16 %v1871_v25, %v1869_v21  ;;  %v1245_v53 = vld [vmem:[#allocation6 + $0xbc8] sm:$0xff]  ;;  %v1247_v54 = vld [vmem:[#allocation6 + $0xbd8] sm:$0xff]  ;;  %v2070_v25 = vld [vmem:[#allocation6 + $0x13f0] sm:$0xff] }
 0x159   :  { %3246 = vmatpush1.bf16.msra.mxu0 %v3245_v48  ;;  %2966 = vmatpush1.bf16.msra.mxu1 %v2965_v26  ;;  %v1007_v48 = vld [vmem:[#allocation6 + $0xa38] sm:$0xff]  ;;  %v2054_v26 = vadd.f32 %v2053_v2, %v2049_v8  ;;  %v1233_v2 = vld [vmem:[#allocation6 + $0xb68] sm:$0xff]  ;;  %v1868_v8 = vld [vmem:[#allocation6 + $0x1380] sm:$0xff] }
 0x15a   :  { %3248 = vmatprep.subr.bf16.mxu0 %v3247_v29  ;;  %2968 = vmatprep.subr.bf16.mxu1 %v2967_v33  ;;  %v3261_v29 = vpack.c.bf16 %v1854_v4, %v1852_v3  ;;  %v1858_v33 = vld [vmem:[#allocation6 + $0x1330] sm:$0xff]  ;;  %v2983_v38 = vpack.c.bf16 %v1009_v22, %v1007_v48  ;;  %v3998_v3 = vrot.slane %v3886_v28, %v3777_v15  ;;  %v1237_v48 = vld [vmem:[#allocation6 + $0xb88] sm:$0xff]  ;;  %v1239_v22 = vld [vmem:[#allocation6 + $0xb98] sm:$0xff] }
 0x15b   :  { %v3265_v44 = vpack.c.bf16 %v1858_v33, %v1856_v31  ;;  %v1875_v31 = vcombine.high %v3948_v59, %v3948_v59  ;;  %v1873_v33 = vld [vmem:[#allocation6 + $0x13a8] sm:$0xff]  ;;  %v2067_v59 = vld [vmem:[#allocation6 + $0x13d8] sm:$0xff] }
 0x15d   :  { %3250 = vmatpush1.bf16.msra.mxu0 %v3249_v40  ;;  %2970 = vmatpush1.bf16.msra.mxu1 %v2969_v42  ;;  %v1008_v40 = vld [vmem:[#allocation6 + $0xa40] sm:$0xff]  ;;  %v2055_v42 = vmax.f32 %v2050_v24, %v2054_v26  ;;  %v1334_v24 = vcombine.high %v3998_v3, %v3998_v3 }
 0x15e   :  { %3252 = vmatprep.subr.bf16.mxu0 %v3251_v45  ;;  %2972 = vmatprep.subr.bf16.mxu1 %v2971_v46  ;;  %v1860_v45 = vld [vmem:[#allocation6 + $0x1340] sm:$0xff]  ;;  %v2985_v46 = vpack.c.bf16 %v1008_v40, %v1006_v39  ;;  %v2065_v39 = vld [vmem:[#allocation6 + $0x13c8] sm:$0xff]  ;;  %v2062_v40 = vld [vmem:[#allocation6 + $0x13b0] sm:$0xff] }
 0x15f   :  { %v2057_v57 = vmul.f32 %v2056_v16, %v2055_v42  ;;  %v3269_v13 = vpack.c.bf16 %v1862_v30, %v1860_v45  ;;  %v2069_v42 = vld [vmem:[#allocation6 + $0x13e8] sm:$0xff]  ;;  %v1872_v45 = vld [vmem:[#allocation6 + $0x13a0] sm:$0xff] }
 0x160   :  { %v1240_v16 = vld [vmem:[#allocation6 + $0xba0] sm:$0xff]  ;;  %v3283_v55 = vpack.c.bf16 %v2069_v42, %v2067_v59  ;;  %v2083_v59 = vld [vmem:[#allocation6 + $0x1458] sm:$0xff]  ;;  %v2085_v42 = vld [vmem:[#allocation6 + $0x1468] sm:$0xff] }
 0x161   :  { %3254 = vmatpush1.bf16.msra.mxu0 %v3253_v12  ;;  %2974 = vmatpush1.bf16.msra.mxu1 %v2973_v58  ;;  %v1231_v12 = vld [vmem:[#allocation6 + $0xb58] sm:$0xff]  ;;  %v1864_v58 = vld [vmem:[#allocation6 + $0x1360] sm:$0xff] }
 0x162   :  { %3256 = vmatprep.subr.bf16.mxu0 %v3255_v60  ;;  %2976 = vmatprep.subr.bf16.mxu1 %v2975_v5  ;;  %v1866_v60 = vld [vmem:[#allocation6 + $0x1370] sm:$0xff]  ;;  %v2058_v5 = vstv %s3987_s7  ;;  %v3015_v0 = vpack.c.bf16 %v1231_v12, %v1229_v56  ;;  %v2068_v12 = vld [vmem:[#allocation6 + $0x13e0] sm:$0xff] }
 0x163   :  { %v2059_v4 = vadd.f32 %v2058_v5, %v2057_v57  ;;  %v2066_v56 = vld [vmem:[#allocation6 + $0x13d0] sm:$0xff]  ;;  %v1244_v5 = vld [vmem:[#allocation6 + $0xbc0] sm:$0xff] }
 0x164   :  { %1960 = vmatmul.mubr.f32.vlgmr.msra.gmra.mrb[6].mxu0 %v3954_v36  ;;  %v1011_v36 = vld [vmem:[#allocation6 + $0xa58] sm:$0xff]  ;;  %v3285_v21 = vpack.c.bf16 %v2068_v12, %v2066_v56  ;;  %v2089_v56 = vld [vmem:[#allocation6 + $0x1488] sm:$0xff] }
 0x165   :  { %3258 = vmatpush1.bf16.msra.mxu0 %v3257_v27  ;;  %2978 = vmatpush1.bf16.msra.mxu1 %v2977_v6  ;;  %v2987_v52 = vpack.c.bf16 %v1013_v20, %v1011_v36  ;;  %v1235_v27 = vld [vmem:[#allocation6 + $0xb78] sm:$0xff]  ;;  %v3273_v6 = vpack.c.bf16 %v1866_v60, %v1864_v58  ;;  %v4003_v28 = vmax.f32 %v2059_v4, 0.0  ;;  %v2073_v58 = vld [vmem:[#allocation6 + $0x1408] sm:$0xff] }
 0x166   :  { %3260 = vmatprep.subr.bf16.mxu0 %v3259_v9  ;;  %2980 = vmatprep.subr.bf16.mxu1 %v2979_v11  ;;  %v3017_v9 = vpack.c.bf16 %v1230_v14, %v1228_v23  ;;  %v1870_v11 = vld [vmem:[#allocation6 + $0x1390] sm:$0xff]  ;;  %v3019_v17 = vpack.c.bf16 %v1235_v27, %v1233_v2  ;;  %v1243_v36 = vld [vmem:[#allocation6 + $0xbb8] sm:$0xff]  ;;  %v2072_v2 = vld [vmem:[#allocation6 + $0x1400] sm:$0xff] }
 0x167   :  { %2030 = vmatprep.mubr.f32.mxu0 %v3592_v7  ;;  %v3277_v26 = vpack.c.bf16 %v1870_v11, %v1868_v8  ;;  %v4009_v20 = vrot.slane %v4003_v28, %v3777_v15  ;;  %v1251_v23 = vld [vmem:[#allocation6 + $0xbf8] sm:$0xff]  ;;  %v2077_v4 = vld [vmem:[#allocation6 + $0x1428] sm:$0xff] }
 0x168   :  { %v3990_v43 = vpop.f32.mrb[2].mxu0  ;;  %v2075_v27 = vld [vmem:[#allocation6 + $0x1418] sm:$0xff] }
 0x169   :  { %3262 = vmatpush1.bf16.msra.mxu0 %v3261_v29  ;;  %2982 = vmatpush1.bf16.msra.mxu1 %v2981_v32  ;;  %v3993_v47 = vpop.f32.mrb[3].mxu0  ;;  %v3021_v29 = vpack.c.bf16 %v1234_v19, %v1232_v18  ;;  %v3023_v32 = vpack.c.bf16 %v1239_v22, %v1237_v48  ;;  %v2168_v57 = vcombine.high %v4009_v20, %v4009_v20  ;;  %v1253_v18 = vld [vmem:[#allocation6 + $0xc08] sm:$0xff]  ;;  %v1255_v19 = vld [vmem:[#allocation6 + $0xc18] sm:$0xff] }
 0x16a   :  { %3264 = vmatprep.subr.bf16.mxu0 %v3263_v34  ;;  %2984 = vmatprep.subr.bf16.mxu1 %v2983_v38  ;;  %v1236_v34 = vld [vmem:[#allocation6 + $0xb80] sm:$0xff]  ;;  %v2063_v38 = vld [vmem:[#allocation6 + $0x13b8] sm:$0xff]  ;;  %v3291_v22 = vpack.c.bf16 %v2077_v4, %v2075_v27  ;;  %v1266_v4 = vld [vmem:[#allocation6 + $0xc70] sm:$0xff] }
 0x16b   :  { %v3279_v30 = vpack.c.bf16 %v2065_v39, %v2063_v38  ;;  %v1257_v39 = vld [vmem:[#allocation6 + $0xc28] sm:$0xff]  ;;  %v1264_v27 = vld [vmem:[#allocation6 + $0xc60] sm:$0xff] }
 0x16d   :  { %3266 = vmatpush1.bf16.msra.mxu0 %v3265_v44  ;;  %2986 = vmatpush1.bf16.msra.mxu1 %v2985_v46  ;;  %v3025_v44 = vpack.c.bf16 %v1238_v35, %v1236_v34  ;;  %v1889_v46 = vrot.slane %v1875_v31, %v3777_v15  ;;  %v2081_v31 = vld [vmem:[#allocation6 + $0x1448] sm:$0xff]  ;;  %v1252_v34 = vld [vmem:[#allocation6 + $0xc00] sm:$0xff]  ;;  %v1254_v35 = vld [vmem:[#allocation6 + $0xc10] sm:$0xff] }
 0x16e   :  { %3268 = vmatprep.subr.bf16.mxu0 %v3267_v49  ;;  %2988 = vmatprep.subr.bf16.mxu1 %v2987_v52  ;;  %v1242_v49 = vld [vmem:[#allocation6 + $0xbb0] sm:$0xff]  ;;  %v3027_v52 = vpack.c.bf16 %v1243_v36, %v1241_v41  ;;  %v2080_v36 = vld [vmem:[#allocation6 + $0x1440] sm:$0xff] }
 0x16f   :  { %v3029_v60 = vpack.c.bf16 %v1242_v49, %v1240_v16  ;;  %v2078_v41 = vld [vmem:[#allocation6 + $0x1430] sm:$0xff]  ;;  %v1261_v49 = vld [vmem:[#allocation6 + $0xc48] sm:$0xff] }
 0x170   :  { %v3297_v16 = vpack.c.bf16 %v2080_v36, %v2078_v41 }
 0x171   :  { %3270 = vmatpush1.bf16.msra.mxu0 %v3269_v13  ;;  %2990 = vmatpush1.bf16.msra.mxu1 %v2989_v62  ;;  %v2071_v13 = vld [vmem:[#allocation6 + $0x13f8] sm:$0xff]  ;;  %v3031_v62 = vpack.c.bf16 %v1247_v54, %v1245_v53  ;;  %v2082_v53 = vld [vmem:[#allocation6 + $0x1450] sm:$0xff]  ;;  %v2084_v54 = vld [vmem:[#allocation6 + $0x1460] sm:$0xff] }
 0x172   :  { %3272 = vmatprep.subr.bf16.mxu0 %v3271_v51  ;;  %3016 = vmatprep.subr.bf16.mxu1 %v3015_v0  ;;  %v1246_v51 = vld [vmem:[#allocation6 + $0xbd0] sm:$0xff]  ;;  %v1249_v0 = vld [vmem:[#allocation6 + $0xbe8] sm:$0xff]  ;;  %v3287_v14 = vpack.c.bf16 %v2073_v58, %v2071_v13  ;;  %v1260_v13 = vld [vmem:[#allocation6 + $0xc40] sm:$0xff] }
 0x173   :  { %v3035_v8 = vpack.c.bf16 %v1251_v23, %v1249_v0  ;;  %v1262_v58 = vld [vmem:[#allocation6 + $0xc50] sm:$0xff]  ;;  %v2088_v0 = vld [vmem:[#allocation6 + $0x1480] sm:$0xff]  ;;  %v2091_v23 = vld [vmem:[#allocation6 + $0x1498] sm:$0xff] }
 0x174   :  { %1126 = vmatmul.mubr.f32.vlgmr.msra.gmra.mrb[4].mxu1 %v3962_v61  ;;  %v2064_v61 = vld [vmem:[#allocation6 + $0x13c0] sm:$0xff] }
 0x175   :  { %3274 = vmatpush1.bf16.msra.mxu0 %v3273_v6  ;;  %3018 = vmatpush1.bf16.msra.mxu1 %v3017_v9  ;;  %v3281_v50 = vpack.c.bf16 %v2064_v61, %v2062_v40  ;;  %v3033_v6 = vpack.c.bf16 %v1246_v51, %v1244_v5  ;;  %v1248_v9 = vld [vmem:[#allocation6 + $0xbe0] sm:$0xff]  ;;  %v1259_v40 = vld [vmem:[#allocation6 + $0xc38] sm:$0xff] }
 0x176   :  { %3276 = vmatprep.subr.bf16.mxu0 %v3275_v10  ;;  %3020 = vmatprep.subr.bf16.mxu1 %v3019_v17  ;;  %v1250_v10 = vld [vmem:[#allocation6 + $0xbf0] sm:$0xff]  ;;  %v3289_v17 = vpack.c.bf16 %v2072_v2, %v2070_v25  ;;  %v1267_v5 = vld [vmem:[#allocation6 + $0xc78] sm:$0xff]  ;;  %v3049_v25 = vpack.c.bf16 %v1262_v58, %v1260_v13 }
 0x177   :  { %1403 = vmatprep.mubr.f32.mxu1 %v1334_v24  ;;  %v2074_v24 = vld [vmem:[#allocation6 + $0x1410] sm:$0xff]  ;;  %v1283_v13 = vld [vmem:[#allocation6 + $0xcf8] sm:$0xff] }
 0x179   :  { %3278 = vmatpush1.bf16.msra.mxu0 %v3277_v26  ;;  %3022 = vmatpush1.bf16.msra.mxu1 %v3021_v29  ;;  %v2076_v26 = vld [vmem:[#allocation6 + $0x1420] sm:$0xff]  ;;  %v2079_v29 = vld [vmem:[#allocation6 + $0x1438] sm:$0xff] }
 0x17a   :  { %1990 = vmatprep.subr.mxu0 %v1873_v33  ;;  %3024 = vmatprep.subr.bf16.mxu1 %v3023_v32  ;;  %v3037_v33 = vpack.c.bf16 %v1250_v10, %v1248_v9  ;;  %v3039_v32 = vpack.c.bf16 %v1255_v19, %v1253_v18  ;;  %v3293_v38 = vpack.c.bf16 %v2076_v26, %v2074_v24  ;;  %v1271_v9 = vld [vmem:[#allocation6 + $0xc98] sm:$0xff]  ;;  %v2092_v18 = vld [vmem:[#allocation6 + $0x14a0] sm:$0xff] }
 0x17b   :  { %v3295_v61 = vpack.c.bf16 %v2081_v31, %v2079_v29  ;;  %v2095_v19 = vld [vmem:[#allocation6 + $0x14b8] sm:$0xff]  ;;  %v3053_v24 = vpack.c.bf16 %v1266_v4, %v1264_v27  ;;  %v1268_v29 = vld [vmem:[#allocation6 + $0xc80] sm:$0xff]  ;;  %v1270_v31 = vld [vmem:[#allocation6 + $0xc90] sm:$0xff] }
 0x17c   :  { %v3057_v41 = vpack.c.bf16 %v1270_v31, %v1268_v29  ;;  %v1287_v27 = vld [vmem:[#allocation6 + $0xd18] sm:$0xff] }
 0x17d   :  { %1991 = vmatpush1.msra.mxu0 %v1872_v45  ;;  %3026 = vmatpush1.bf16.msra.mxu1 %v3025_v44  ;;  %v3041_v44 = vpack.c.bf16 %v1254_v35, %v1252_v34  ;;  %v3043_v45 = vpack.c.bf16 %v1259_v40, %v1257_v39  ;;  %v1275_v34 = vld [vmem:[#allocation6 + $0xcb8] sm:$0xff]  ;;  %v2096_v39 = vld [vmem:[#allocation6 + $0x14c0] sm:$0xff] }
 0x17e   :  { %3280 = vmatprep.subr.bf16.mxu0 %v3279_v30  ;;  %2602 = vmatmul.mubr.msk.f32.vlgmr.msra.gmra.mrb[6].mxu0 %vm341_vm0, %v1889_v46  ;;  %v1256_v30 = vld [vmem:[#allocation6 + $0xc20] sm:$0xff]  ;;  %v1258_v46 = vld [vmem:[#allocation6 + $0xc30] sm:$0xff]  ;;  %v2099_v40 = vld [vmem:[#allocation6 + $0x14d8] sm:$0xff] }
 0x17f   :  { %3282 = vmatpush1.bf16.msra.mxu0 %v3281_v50  ;;  %3028 = vmatprep.subr.bf16.mxu1 %v3027_v52  ;;  %v1263_v50 = vld [vmem:[#allocation6 + $0xc58] sm:$0xff]  ;;  %v3299_v52 = vpack.c.bf16 %v2085_v42, %v2083_v59  ;;  %v3045_v12 = vpack.c.bf16 %v1258_v46, %v1256_v30  ;;  %v1272_v59 = vld [vmem:[#allocation6 + $0xca0] sm:$0xff]  ;;  %v1274_v42 = vld [vmem:[#allocation6 + $0xcb0] sm:$0xff] }
 0x180   :  { %3284 = vmatprep.subr.bf16.mxu0 %v3283_v55  ;;  %2237 = vmatprep.mubr.f32.mxu0 %v2168_v57  ;;  %v2087_v55 = vld [vmem:[#allocation6 + $0x1478] sm:$0xff]  ;;  %v3047_v57 = vpack.c.bf16 %v1263_v50, %v1261_v49  ;;  %v2100_v49 = vld [vmem:[#allocation6 + $0x14e0] sm:$0xff] }
 0x181   :  { %3030 = vmatpush1.bf16.msra.mxu1 %v3029_v60  ;;  %v3301_v60 = vpack.c.bf16 %v2084_v54, %v2082_v53  ;;  %v3303_v51 = vpack.c.bf16 %v2089_v56, %v2087_v55  ;;  %v1279_v30 = vld [vmem:[#allocation6 + $0xcd8] sm:$0xff]  ;;  %v3061_v53 = vpack.c.bf16 %v1274_v42, %v1272_v59  ;;  %v1276_v55 = vld [vmem:[#allocation6 + $0xcc0] sm:$0xff]  ;;  %v1278_v56 = vld [vmem:[#allocation6 + $0xcd0] sm:$0xff] }
 0x182   :  { %3032 = vmatprep.subr.bf16.mxu1 %v3031_v62  ;;  %v4015_v11 = vpop.f32.mrb[4].mxu0  ;;  %v1265_v62 = vld [vmem:[#allocation6 + $0xc68] sm:$0xff]  ;;  %v2103_v50 = vld [vmem:[#allocation6 + $0x14f8] sm:$0xff]  ;;  %v2114_v59 = vld [vmem:[#allocation6 + $0x1550] sm:$0xff] }
 0x183   :  { %3286 = vmatpush1.bf16.msra.mxu0 %v3285_v21  ;;  %v4017_v48 = vpop.f32.mrb[5].mxu0  ;;  %v2086_v21 = vld [vmem:[#allocation6 + $0x1470] sm:$0xff]  ;;  %v3051_v2 = vpack.c.bf16 %v1267_v5, %v1265_v62  ;;  %v2104_v62 = vld [vmem:[#allocation6 + $0x1500] sm:$0xff]  ;;  %v2107_v5 = vld [vmem:[#allocation6 + $0x1518] sm:$0xff] }
 0x184   :  { %3288 = vmatprep.subr.bf16.mxu0 %v3287_v14  ;;  %v2093_v14 = vld [vmem:[#allocation6 + $0x14a8] sm:$0xff]  ;;  %v1291_v29 = vld [vmem:[#allocation6 + $0xd38] sm:$0xff]  ;;  %v2116_v42 = vld [vmem:[#allocation6 + $0x1560] sm:$0xff] }
 0x185   :  { %3034 = vmatpush1.bf16.msra.mxu1 %v3033_v6  ;;  %v3305_v6 = vpack.c.bf16 %v2088_v0, %v2086_v21  ;;  %v3307_v10 = vpack.c.bf16 %v2093_v14, %v2091_v23  ;;  %v3065_v21 = vpack.c.bf16 %v1278_v56, %v1276_v55  ;;  %v1280_v23 = vld [vmem:[#allocation6 + $0xce0] sm:$0xff]  ;;  %v1282_v14 = vld [vmem:[#allocation6 + $0xcf0] sm:$0xff] }
 0x186   :  { %3036 = vmatprep.subr.bf16.mxu1 %v3035_v8  ;;  %v1269_v8 = vld [vmem:[#allocation6 + $0xc88] sm:$0xff]  ;;  %v2122_v56 = vld [vmem:[#allocation6 + $0x1590] sm:$0xff] }
 0x187   :  { %3290 = vmatpush1.bf16.msra.mxu0 %v3289_v17  ;;  %v2090_v17 = vld [vmem:[#allocation6 + $0x1490] sm:$0xff]  ;;  %v3055_v26 = vpack.c.bf16 %v1271_v9, %v1269_v8  ;;  %v2108_v8 = vld [vmem:[#allocation6 + $0x1520] sm:$0xff]  ;;  %v2111_v9 = vld [vmem:[#allocation6 + $0x1538] sm:$0xff] }
 0x188   :  { %3292 = vmatprep.subr.bf16.mxu0 %v3291_v22  ;;  %v2097_v22 = vld [vmem:[#allocation6 + $0x14c8] sm:$0xff] }
 0x189   :  { %3038 = vmatpush1.bf16.msra.mxu1 %v3037_v33  ;;  %v3309_v33 = vpack.c.bf16 %v2092_v18, %v2090_v17  ;;  %v3311_v35 = vpack.c.bf16 %v2097_v22, %v2095_v19  ;;  %v3069_v17 = vpack.c.bf16 %v1282_v14, %v1280_v23  ;;  %v1284_v19 = vld [vmem:[#allocation6 + $0xd00] sm:$0xff]  ;;  %v1286_v22 = vld [vmem:[#allocation6 + $0xd10] sm:$0xff] }
 0x18a   :  { %3040 = vmatprep.subr.bf16.mxu1 %v3039_v32  ;;  %v1273_v32 = vld [vmem:[#allocation6 + $0xca8] sm:$0xff]  ;;  %v2130_v14 = vld [vmem:[#allocation6 + $0x15d0] sm:$0xff] }
 0x18b   :  { %3294 = vmatpush1.bf16.msra.mxu0 %v3293_v38  ;;  %v2094_v38 = vld [vmem:[#allocation6 + $0x14b0] sm:$0xff]  ;;  %v3059_v36 = vpack.c.bf16 %v1275_v34, %v1273_v32  ;;  %v2112_v32 = vld [vmem:[#allocation6 + $0x1540] sm:$0xff]  ;;  %v2115_v34 = vld [vmem:[#allocation6 + $0x1558] sm:$0xff] }
 0x18c   :  { %3296 = vmatprep.subr.bf16.mxu0 %v3295_v61  ;;  %v2101_v61 = vld [vmem:[#allocation6 + $0x14e8] sm:$0xff] }
 0x18d   :  { %3042 = vmatpush1.bf16.msra.mxu1 %v3041_v44  ;;  %v3313_v44 = vpack.c.bf16 %v2096_v39, %v2094_v38  ;;  %v3315_v46 = vpack.c.bf16 %v2101_v61, %v2099_v40  ;;  %v3073_v38 = vpack.c.bf16 %v1286_v22, %v1284_v19  ;;  %v1288_v40 = vld [vmem:[#allocation6 + $0xd20] sm:$0xff]  ;;  %v1290_v61 = vld [vmem:[#allocation6 + $0xd30] sm:$0xff] }
 0x18e   :  { %3044 = vmatprep.subr.bf16.mxu1 %v3043_v45  ;;  %v1277_v45 = vld [vmem:[#allocation6 + $0xcc8] sm:$0xff]  ;;  %v2138_v19 = vld [vmem:[#allocation6 + $0x1610] sm:$0xff]  ;;  %v2140_v22 = vld [vmem:[#allocation6 + $0x1620] sm:$0xff] }
 0x18f   :  { %3298 = vmatpush1.bf16.msra.mxu0 %v3297_v16  ;;  %v2098_v16 = vld [vmem:[#allocation6 + $0x14d0] sm:$0xff]  ;;  %v3063_v54 = vpack.c.bf16 %v1279_v30, %v1277_v45  ;;  %v2121_v45 = vld [vmem:[#allocation6 + $0x1588] sm:$0xff]  ;;  %v3077_v30 = vpack.c.bf16 %v1290_v61, %v1288_v40 }
 0x190   :  { %3300 = vmatprep.subr.bf16.mxu0 %v3299_v52  ;;  %v2105_v52 = vld [vmem:[#allocation6 + $0x1508] sm:$0xff] }
 0x191   :  { %3046 = vmatpush1.bf16.msra.mxu1 %v3045_v12  ;;  %v3317_v12 = vpack.c.bf16 %v2100_v49, %v2098_v16  ;;  %v3319_v58 = vpack.c.bf16 %v2105_v52, %v2103_v50  ;;  %v2118_v49 = vld [vmem:[#allocation6 + $0x1570] sm:$0xff]  ;;  %v2120_v50 = vld [vmem:[#allocation6 + $0x1580] sm:$0xff]  ;;  %v2123_v52 = vld [vmem:[#allocation6 + $0x1598] sm:$0xff] }
 0x192   :  { %3048 = vmatprep.subr.bf16.mxu1 %v3047_v57  ;;  %v1281_v57 = vld [vmem:[#allocation6 + $0xce8] sm:$0xff] }
 0x193   :  { %3302 = vmatpush1.bf16.msra.mxu0 %v3301_v60  ;;  %v2102_v60 = vld [vmem:[#allocation6 + $0x14f0] sm:$0xff]  ;;  %v3067_v0 = vpack.c.bf16 %v1283_v13, %v1281_v57  ;;  %v2127_v57 = vld [vmem:[#allocation6 + $0x15b8] sm:$0xff]  ;;  %v2129_v13 = vld [vmem:[#allocation6 + $0x15c8] sm:$0xff] }
 0x194   :  { %3304 = vmatprep.subr.bf16.mxu0 %v3303_v51  ;;  %v2109_v51 = vld [vmem:[#allocation6 + $0x1528] sm:$0xff] }
 0x195   :  { %3050 = vmatpush1.bf16.msra.mxu1 %v3049_v25  ;;  %v3321_v25 = vpack.c.bf16 %v2104_v62, %v2102_v60  ;;  %v3323_v4 = vpack.c.bf16 %v2109_v51, %v2107_v5  ;;  %v3343_v60 = vpack.c.bf16 %v2129_v13, %v2127_v57  ;;  %v2126_v62 = vld [vmem:[#allocation6 + $0x15b0] sm:$0xff]  ;;  %v2128_v5 = vld [vmem:[#allocation6 + $0x15c0] sm:$0xff]  ;;  %v2131_v51 = vld [vmem:[#allocation6 + $0x15d8] sm:$0xff] }
 0x196   :  { %3052 = vmatprep.subr.bf16.mxu1 %v3051_v2  ;;  %v1285_v2 = vld [vmem:[#allocation6 + $0xd08] sm:$0xff] }
 0x197   :  { %3306 = vmatpush1.bf16.msra.mxu0 %v3305_v6  ;;  %v2106_v6 = vld [vmem:[#allocation6 + $0x1510] sm:$0xff]  ;;  %v3071_v18 = vpack.c.bf16 %v1287_v27, %v1285_v2  ;;  %v2135_v2 = vld [vmem:[#allocation6 + $0x15f8] sm:$0xff]  ;;  %v2137_v27 = vld [vmem:[#allocation6 + $0x1608] sm:$0xff] }
 0x198   :  { %3308 = vmatprep.subr.bf16.mxu0 %v3307_v10  ;;  %v2113_v10 = vld [vmem:[#allocation6 + $0x1548] sm:$0xff] }
 0x199   :  { %3054 = vmatpush1.bf16.msra.mxu1 %v3053_v24  ;;  %v3325_v24 = vpack.c.bf16 %v2108_v8, %v2106_v6  ;;  %v3327_v31 = vpack.c.bf16 %v2113_v10, %v2111_v9  ;;  %v2134_v6 = vld [vmem:[#allocation6 + $0x15f0] sm:$0xff]  ;;  %v2136_v8 = vld [vmem:[#allocation6 + $0x1600] sm:$0xff]  ;;  %v2139_v9 = vld [vmem:[#allocation6 + $0x1618] sm:$0xff] }
 0x19a   :  { %3056 = vmatprep.subr.bf16.mxu1 %v3055_v26  ;;  %v1289_v26 = vld [vmem:[#allocation6 + $0xd28] sm:$0xff] }
 0x19b   :  { %3310 = vmatpush1.bf16.msra.mxu0 %v3309_v33  ;;  %v2110_v33 = vld [vmem:[#allocation6 + $0x1530] sm:$0xff]  ;;  %v3075_v39 = vpack.c.bf16 %v1291_v29, %v1289_v26  ;;  %v2141_v10 = vld [vmem:[#allocation6 + $0x1628] sm:$0xff] }
 0x19c   :  { %3312 = vmatprep.subr.bf16.mxu0 %v3311_v35  ;;  %v2117_v35 = vld [vmem:[#allocation6 + $0x1568] sm:$0xff] }
 0x19d   :  { %3058 = vmatpush1.bf16.msra.mxu1 %v3057_v41  ;;  %v3329_v41 = vpack.c.bf16 %v2112_v32, %v2110_v33  ;;  %v2145_v26 = vld [vmem:[#allocation6 + $0x1648] sm:$0xff]  ;;  %v2142_v32 = vld [vmem:[#allocation6 + $0x1630] sm:$0xff] }
 0x19e   :  { %3060 = vmatprep.subr.bf16.mxu1 %v3059_v36  ;;  %v3331_v36 = vpack.c.bf16 %v2117_v35, %v2115_v34  ;;  %v2144_v34 = vld [vmem:[#allocation6 + $0x1640] sm:$0xff]  ;;  %v2149_v40 = vld [vmem:[#allocation6 + $0x1668] sm:$0xff] }
 0x19f   :  { %3314 = vmatpush1.bf16.msra.mxu0 %v3313_v44  ;;  %v2119_v44 = vld [vmem:[#allocation6 + $0x1578] sm:$0xff]  ;;  %v3361_v61 = vpack.c.bf16 %v2144_v34, %v2142_v32  ;;  %v2345_v32 = vld [vmem:[%s4165_s4 + $0x60] sm:$0xff]  ;;  %v2346_v34 = vld [vmem:[%s4165_s4 + $0x68] sm:$0xff] }
 0x1a0   :  { %3316 = vmatprep.subr.bf16.mxu0 %v3315_v46  ;;  %v3333_v46 = vpack.c.bf16 %v2116_v42, %v2114_v59  ;;  %v3335_v16 = vpack.c.bf16 %v2121_v45, %v2119_v44  ;;  %v2148_v59 = vld [vmem:[#allocation6 + $0x1660] sm:$0xff]  ;;  %v2153_v44 = vcombine.high %v4003_v28, %v4003_v28  ;;  %v2150_v45 = vld [vmem:[#allocation6 + $0x1670] sm:$0xff]  ;;  %v2350_v28 = vld [vmem:[%s4165_s4 + $0x88] sm:$0xff] }
 0x1a1   :  { %3062 = vmatpush1.bf16.msra.mxu1 %v3061_v53  ;;  %v2125_v53 = vld [vmem:[#allocation6 + $0x15a8] sm:$0xff] }
 0x1a2   :  { %3064 = vmatprep.subr.bf16.mxu1 %v3063_v54  ;;  %v3337_v54 = vpack.c.bf16 %v2120_v50, %v2118_v49  ;;  %v3339_v55 = vpack.c.bf16 %v2125_v53, %v2123_v52  ;;  %v2349_v50 = vld [vmem:[%s4165_s4 + $0x80] sm:$0xff] }
 0x1a3   :  { %3318 = vmatpush1.bf16.msra.mxu0 %v3317_v12  ;;  %v2124_v12 = vld [vmem:[#allocation6 + $0x15a0] sm:$0xff]  ;;  %v3367_v53 = vpack.c.bf16 %v2350_v28, %v2349_v50  ;;  %v2321_v50 = vsub.s32 0, %v3754_v37 }
 0x1a4   :  { %3320 = vmatprep.subr.bf16.mxu0 %v3319_v58  ;;  %v3341_v58 = vpack.c.bf16 %v2124_v12, %v2122_v56  ;;  %v2333_v52 = vld [vmem:[%s4165_s4] sm:$0xff]  ;;  %v2352_v56 = vld [vmem:[%s4165_s4 + $0x98] sm:$0xff] }
 0x1a5   :  { %3066 = vmatpush1.bf16.msra.mxu1 %v3065_v21  ;;  %v2133_v21 = vld [vmem:[#allocation6 + $0x15e8] sm:$0xff]  ;;  %v2317_v28 = vld [vmem:[#allocation7] sm:$0x3] }
 0x1a6   :  { %3068 = vmatprep.subr.bf16.mxu1 %v3067_v0  ;;  %v3345_v0 = vpack.c.bf16 %v2128_v5, %v2126_v62  ;;  %v3347_v23 = vpack.c.bf16 %v2133_v21, %v2131_v51  ;;  %v2354_v62 = vld [vmem:[%s4165_s4 + $0xa8] sm:$0xff]  ;;  %v2337_v51 = vld [vmem:[%s4165_s4 + $0x20] sm:$0xff] }
 0x1a7   :  { %3322 = vmatpush1.bf16.msra.mxu0 %v3321_v25  ;;  %v2132_v25 = vld [vmem:[#allocation6 + $0x15e0] sm:$0xff]  ;;  %v2338_v21 = vld [vmem:[%s4165_s4 + $0x28] sm:$0xff] }
 0x1a8   :  { %3324 = vmatprep.subr.bf16.mxu0 %v3323_v4  ;;  %v3351_v4 = vpack.c.bf16 %v2137_v27, %v2135_v2  ;;  %v2339_v2 = vld [vmem:[%s4165_s4 + $0x30] sm:$0xff]  ;;  %v2340_v27 = vld [vmem:[%s4165_s4 + $0x38] sm:$0xff] }
 0x1a9   :  { %3070 = vmatpush1.bf16.msra.mxu1 %v3069_v17  ;;  %v3353_v17 = vpack.c.bf16 %v2136_v8, %v2134_v6  ;;  %v3381_v6 = vpack.c.bf16 %v2340_v27, %v2339_v2  ;;  %v2610_v2 = vld [vmem:[#allocation10] ss:$0 sm:$0xff] }
 0x1aa   :  { %3072 = vmatprep.subr.bf16.mxu1 %v3071_v18  ;;  %v3355_v18 = vpack.c.bf16 %v2141_v10, %v2139_v9  ;;  %v2341_v9 = vld [vmem:[%s4165_s4 + $0x40] sm:$0xff]  ;;  %v2342_v10 = vld [vmem:[%s4165_s4 + $0x48] sm:$0xff] }
 0x1ab   :  { %3326 = vmatpush1.bf16.msra.mxu0 %v3325_v24  ;;  %v2143_v24 = vld [vmem:[#allocation6 + $0x1638] sm:$0xff] }
 0x1ac   :  { %3328 = vmatprep.subr.bf16.mxu0 %v3327_v31  ;;  %v3359_v31 = vpack.c.bf16 %v2145_v26, %v2143_v24  ;;  %v2343_v24 = vld [vmem:[%s4165_s4 + $0x50] sm:$0xff]  ;;  %v2344_v26 = vld [vmem:[%s4165_s4 + $0x58] sm:$0xff] }
 0x1ad   :  { %3074 = vmatpush1.bf16.msra.mxu1 %v3073_v38 }
 0x1ae   :  { %3076 = vmatprep.subr.bf16.mxu1 %v3075_v39  ;;  %v2147_v39 = vld [vmem:[#allocation6 + $0x1658] sm:$0xff] }
 0x1af   :  { %3330 = vmatpush1.bf16.msra.mxu0 %v3329_v41  ;;  %v3363_v41 = vpack.c.bf16 %v2149_v40, %v2147_v39  ;;  %v2364_v39 = vld [vmem:[%s4165_s4 + $0xf8] sm:$0xff] }
 0x1b0   :  { %3332 = vmatprep.subr.bf16.mxu0 %v3331_v36  ;;  %v2146_v36 = vld [vmem:[#allocation6 + $0x1650] sm:$0xff] }
 0x1b1   :  { %3078 = vmatpush1.bf16.msra.mxu1 %v3077_v30  ;;  %v3365_v42 = vpack.c.bf16 %v2148_v59, %v2146_v36 }
 0x1b2   :  { %3368 = vmatprep.subr.bf16.mxu1 %v3367_v53  ;;  %v2322_v53 = vrot.slane %v2317_v28, %v2321_v50 }
 0x1b3   :  { %3334 = vmatpush1.bf16.msra.mxu0 %v3333_v46 }
 0x1b4   :  { %3336 = vmatprep.subr.bf16.mxu0 %v3335_v16  ;;  %1404 = vmatmul.mubr.f32.vlgmr.msra.gmra.mrb[6].mxu1 %v3998_v3  ;;  %v3349_v3 = vpack.c.bf16 %v2132_v25, %v2130_v14  ;;  %v3377_v14 = vpack.c.bf16 %v2338_v21, %v2337_v51  ;;  %v2609_v21 = vld [vmem:[#allocation9] ss:$0 sm:$0xff] }
 0x1b7   :  { %3338 = vmatpush1.bf16.msra.mxu0 %v3337_v54  ;;  %v2334_v54 = vld [vmem:[%s4165_s4 + $0x8] sm:$0xff] }
 0x1b8   :  { %3340 = vmatprep.subr.bf16.mxu0 %v3339_v55  ;;  %v2351_v55 = vld [vmem:[%s4165_s4 + $0x90] sm:$0xff]  ;;  %v3369_v57 = vpack.c.bf16 %v2334_v54, %v2333_v52  ;;  %v2325_v52 = vsub.s32 1, %v3754_v37  ;;  %v2444_v37 = vld [vmem:[%s4167_s6 + $0x8] sm:$0xff] }
 0x1b9   :  { %v3371_v13 = vpack.c.bf16 %v2352_v56, %v2351_v55 }
 0x1ba   :  { %3370 = vmatpush3.bf16.msra.mxu1 %v3369_v57  ;;  %v2326_v55 = vrot.slane %v2317_v28, %v2325_v52 }
 0x1bb   :  { %3342 = vmatpush1.bf16.msra.mxu0 %v3341_v58  ;;  %v2336_v58 = vld [vmem:[%s4165_s4 + $0x18] sm:$0xff]  ;;  %3372 = vmatprep.subr.bf16.mxu1 %v3371_v13 }
 0x1bc   :  { %3344 = vmatprep.subr.bf16.mxu0 %v3343_v60  ;;  %v2353_v60 = vld [vmem:[%s4165_s4 + $0xa0] sm:$0xff] }
 0x1bd   :  { %v3375_v5 = vpack.c.bf16 %v2354_v62, %v2353_v60  ;;  %v3594_v60 = vmov 0.0|0.0   ;;  %v2445_v62 = vld [vmem:[%s4167_s6 + $0x10] sm:$0xff] }
 0x1be   :  { %2238 = vmatmul.mubr.f32.vlgmr.msra.gmra.mrb[6].mxu0 %v4009_v20  ;;  %v3357_v20 = vpack.c.bf16 %v2140_v22, %v2138_v19  ;;  %v3385_v19 = vpack.c.bf16 %v2342_v10, %v2341_v9 }
 0x1bf   :  { %3346 = vmatpush1.bf16.msra.mxu0 %v3345_v0  ;;  %2308 = vmatprep.mubr.f32.mxu0 %v3592_v7  ;;  %v2355_v0 = vld [vmem:[%s4165_s4 + $0xb0] sm:$0xff] }
 0x1c0   :  { %3348 = vmatprep.subr.bf16.mxu0 %v3347_v23  ;;  %v2356_v23 = vld [vmem:[%s4165_s4 + $0xb8] sm:$0xff] }
 0x1c1   :  { %v3379_v25 = vpack.c.bf16 %v2356_v23, %v2355_v0 }
 0x1c3   :  { %3350 = vmatpush1.bf16.msra.mxu0 %v3349_v3  ;;  %v2357_v3 = vld [vmem:[%s4165_s4 + $0xc0] sm:$0xff] }
 0x1c4   :  { %3352 = vmatprep.subr.bf16.mxu0 %v3351_v4  ;;  %v2358_v4 = vld [vmem:[%s4165_s4 + $0xc8] sm:$0xff] }
 0x1c5   :  { %v3383_v8 = vpack.c.bf16 %v2358_v4, %v2357_v3 }
 0x1c7   :  { %3354 = vmatpush1.bf16.msra.mxu0 %v3353_v17  ;;  %v573_v29 = vpop.f32.mrb[0].mxu1  ;;  %v2359_v17 = vld [vmem:[%s4165_s4 + $0xd0] sm:$0xff] }
 0x1c8   :  { %3356 = vmatprep.subr.bf16.mxu0 %v3355_v18  ;;  %v3405_v33 = vadd.f32 %v3967_v63, %v573_v29  ;;  %v575_v35 = vpop.f32.mrb[1].mxu1  ;;  %v2151_v63 = vld [vmem:[#allocation6 + $0x1678] sm:$0xff]  ;;  %v2361_v29 = vld [vmem:[%s4165_s4 + $0xe0] sm:$0xff] }
 0x1c9   :  { %v3412_v38 = vadd.f32 %v3969_v1, %v575_v35  ;;  %v2167_v1 = vrot.slane %v2153_v44, %v3777_v15  ;;  %v2360_v18 = vld [vmem:[%s4165_s4 + $0xd8] sm:$0xff]  ;;  %v3393_v35 = vpack.c.bf16 %v2346_v34, %v2345_v32 }
 0x1ca   :  { %v3387_v22 = vpack.c.bf16 %v2360_v18, %v2359_v17 }
 0x1cb   :  { %3358 = vmatpush1.bf16.msra.mxu0 %v3357_v20  ;;  %v3389_v20 = vpack.c.bf16 %v2344_v26, %v2343_v24 }
 0x1cc   :  { %3360 = vmatprep.subr.bf16.mxu0 %v3359_v31  ;;  %v2362_v31 = vld [vmem:[%s4165_s4 + $0xe8] sm:$0xff] }
 0x1cf   :  { %3362 = vmatpush1.bf16.msra.mxu0 %v3361_v61  ;;  %v2347_v61 = vld [vmem:[%s4165_s4 + $0x70] sm:$0xff] }
 0x1d0   :  { %3364 = vmatprep.subr.bf16.mxu0 %v3363_v41  ;;  %v2348_v41 = vld [vmem:[%s4165_s4 + $0x78] sm:$0xff] }
 0x1d1   :  { %v3397_v36 = vpack.c.bf16 %v2348_v41, %v2347_v61 }
 0x1d3   :  { %3366 = vmatpush1.bf16.msra.mxu0 %v3365_v42 }
 0x1d4   :  { %2268 = vmatprep.subr.mxu0 %v2151_v63 }
 0x1d7   :  { %2269 = vmatpush1.msra.mxu0 %v2150_v45 }
 0x1d8   :  { %2608 = vmatmul.mubr.msk.f32.vlgmr.msra.gmra.mrb[6].mxu0 %vm341_vm0, %v2167_v1  ;;  %3399 = vmatprep.subr.bf16.mxu0 %v3594_v60 }
 0x1d9   :  { %2660 = vmatprep.mubr.msk.f32.mxu0 %vm3595_vm1, %v3592_v7 }
 0x207   :  { %v849_v30 = vpop.f32.mrb[2].mxu1 }
 0x208   :  { %v3406_v46 = vadd.f32 %v3405_v33, %v849_v30  ;;  %v851_v16 = vpop.f32.mrb[3].mxu1  ;;  %v3391_v33 = vpack.c.bf16 %v2362_v31, %v2361_v29 }
 0x209   :  { %v3413_v49 = vadd.f32 %v3412_v38, %v851_v16  ;;  %v2363_v38 = vld [vmem:[%s4165_s4 + $0xf0] sm:$0xff] }
 0x20a   :  { %v4038_v15 = vadd.f32 %v3406_v46, %v3990_v43  ;;  %v2335_v43 = vld [vmem:[%s4165_s4 + $0x10] sm:$0xff]  ;;  %v3395_v40 = vpack.c.bf16 %v2364_v39, %v2363_v38 }
 0x20b   :  { %v3414_v12 = vadd.f32 %v3413_v49, %v3993_v47  ;;  %v3373_v47 = vpack.c.bf16 %v2336_v58, %v2335_v43 }
 0x20d   :  { %3374 = vmatpush3.bf16.msra.mxu1 %v3373_v47  ;;  %v2446_v47 = vld [vmem:[%s4167_s6 + $0x18] sm:$0xff] }
 0x20e   :  { %3376 = vmatprep.subr.bf16.mxu1 %v3375_v5  ;;  %v3403_v5 = vpack.c.bf16 %v2446_v47, %v2445_v62 }
 0x211   :  { %3378 = vmatpush3.bf16.msra.mxu1 %v3377_v14 }
 0x212   :  { %3380 = vmatprep.subr.bf16.mxu1 %v3379_v25 }
 0x215   :  { %3382 = vmatpush3.bf16.msra.mxu1 %v3381_v6 }
 0x216   :  { %3384 = vmatprep.subr.bf16.mxu1 %v3383_v8 }
 0x219   :  { %3386 = vmatpush3.bf16.msra.mxu1 %v3385_v19 }
 0x21a   :  { %3388 = vmatprep.subr.bf16.mxu1 %v3387_v22 }
 0x21d   :  { %3390 = vmatpush3.bf16.msra.mxu1 %v3389_v20 }
 0x21e   :  { %3392 = vmatprep.subr.bf16.mxu1 %v3391_v33 }
 0x221   :  { %3394 = vmatpush3.bf16.msra.mxu1 %v3393_v35 }
 0x222   :  { %3396 = vmatprep.subr.bf16.mxu1 %v3395_v40 }
 0x225   :  { %3398 = vmatpush3.bf16.msra.mxu1 %v3397_v36 }
 0x247   :  { %v1127_v59 = vpop.f32.mrb[4].mxu1 }
 0x248   :  { %v3408_v42 = vadd.f32 %v4038_v15, %v1127_v59  ;;  %v1129_v44 = vpop.f32.mrb[5].mxu1 }
 0x249   :  { %v3415_v63 = vadd.f32 %v3414_v12, %v1129_v44 }
 0x24a   :  { %v3409_v45 = vadd.f32 %v3408_v42, %v4015_v11 }
 0x24b   :  { %v3416_v1 = vadd.f32 %v3415_v63, %v4017_v48  ;;  %v2443_v48 = vld [vmem:[%s4167_s6] sm:$0xff]  ;;  %s3596_s6 = smov [#allocation12]  }
 0x24c   :  { %v3400_v58 = vpack.c.bf16 %v2444_v37, %v2443_v48  ;;  %s2547_s9 = sshll.u32 %s3596_s6, 4  ;;  %s2548_s9 = int_to_ptr.vmem [resolvable:$true] %s2547_s9 }
 0x24d   :  { %s3553_s10 = scalar_lea.vmem %s2548_s9, 32  ;;  %p3558_p8 = scmp.lt.s32.totalorder %s2548_s9, %s2548_s9 }
 0x24e   :  { %3401 = vmatpush3.bf16.msra.mxu0 %v3400_v58  ;;  %p3554_p7 = scmp.ne.s32.totalorder %s2548_s9, %s3553_s10  ;;  %p3559_p9 = scmp.lt.s32.totalorder %s3553_s10, %s3553_s10 }
 0x24f   :  { %3402 = vmatprep.subr.bf16.mxu0 %v3594_v60 }
 0x250   :  { %p3560_p10 = por %p3559_p9, %p3558_p8 }
 0x252   :  { %3404 = vmatpush3.bf16.msra.mxu0 %v3403_v5  ;;  %p3561_p11 = pnand %p3560_p10, %p3554_p7 }
 0x287   :  { %v1405_v30 = vpop.f32.mrb[6].mxu1 }
 0x288   :  { %v3410_v46 = vadd.f32 %v3409_v45, %v1405_v30  ;;  %v1407_v16 = vpop.f32.mrb[7].mxu1 }
 0x289   :  { %v3417_v49 = vadd.f32 %v3416_v1, %v1407_v16 }
 0x2ab   :  { %v2310_v54 = vpop.f32.mrb[6].mxu0 }
 0x2ac   :  { %v3411_v56 = vadd.f32 %v3410_v46, %v2310_v54  ;;  %v2312_v15 = vpop.f32.mrb[7].mxu0 }
 0x2ad   :  { %v3418_v57 = vadd.f32 %v3417_v49, %v2312_v15 }
 0x2ae   :  { %v2329_v12 = vadd.f32 %v3411_v56, %v2322_v53 }
 0x2af   :  { %v2330_v13 = vadd.f32 %v3418_v57, %v2326_v55 }
 0x2b0   :  { %v2331_v43 = vmax.f32 %v2329_v12, 0.0 }
 0x2b1   :  { %v2332_v11 = vmax.f32 %v2330_v13, 0.0 }
 0x2b3   :  { %2436 = vmatprep.mubr.f32.mxu1 %v2332_v11 }
 0x2b4   :  { %2437 = vmatmul.mubr.f32.vlgmr.msra.gmra.mrb[8].mxu1 %v2331_v43 }
 0x387   :  { %v2644_v51 = vpop.f32.mrb[8].mxu1 }
 0x388   :  { %v2645_v0 = vpop.f32.mrb[9].mxu1 }
 0x389   :  { %v2646_v23 = vadd.f32 %v2645_v0, %v2644_v51 }
 0x38b   :  { %v2439_v14 = vadd.f32 %v2646_v23, %v2609_v21 }
 0x38d   :  { %v2442_v25 = vmax.f32 %v2439_v14, 0.0 }
 0x38f   :  { %2661 = vmatmul.mubr.msk.f32.vlgmr.msra.gmra.mrb[8].mxu0 %vm2454_vm2, %v2442_v25 }
 0x462   :  { %v2524_v27 = vpop.f32.mrb[8].mxu0 }
 0x463   :  { %v2525_v3 = vadd.f32 %v2610_v2, %v2524_v27  ;;  %v2662_v4 = vpop.f32.mrb[9].mxu0 }
 0x465   :  { %v2529_v6 = vsel %vm2528_vm3, %v2525_v3, -inf }
 0x466   :  { %2530 = vmax.xlane.f32.xlu0 %v2529_v6 }
 0x4f3   :  { %v2531_v8 = vpop.xlane.xlu0 %2530 }
 0x4f4   :  { %v2532_v9 = vsub.f32 %v2525_v3, %v2531_v8 }
 0x4f6   :  { %v2533_v10 = vmul.f32 1.442695, %v2532_v9 }
 0x4f8   :  { %3447 = vpow2.f32 %v2533_v10 }
 0x502   :  { %v3448_v7 = vpop.eup %3447 }
 0x503   :  { %v2535_v17 = vsel %vm2528_vm3, %v3448_v7, 0.0 }
 0x504   :  { %2536 = vadd.xlane.f32.xlu0 %v2535_v17 }
 0x591   :  { %v2537_v18 = vpop.xlane.xlu0 %2536 }
 0x592   :  { %3449 = vrcp.f32 %v2537_v18 }
 0x59c   :  { %v3450_v19 = vpop.eup %3449 }
 0x59d   :  { %v2539_v22 = vmul.f32 %v3450_v19, %v3448_v7 }
 0x59f   :  { %2540 = vst.msk [vmem:[#allocation12] sm:$0x3] %vm2528_vm3, %v2539_v22 }
 0x5a0   :  { %3564 = shalt.err (!%p3561_p11)
}
 0x5a1   :  { %s3565_s13 = scalar_lea.hbm %s4169_s8, 32 }
 0x5a2   :  { %p3566_p12 = scmp.ne.s32.totalorder %s4169_s8, %s3565_s13  ;;  %p3569_p13 = scmp.lt.u32.totalorder %s3565_s13, %s4169_s8 }
 0x5a4   :  { %p3571_p0 = pnand %p3569_p13, %p3566_p12 }
 0x5a6   :  { %3574 = shalt.err (!%p3571_p0)
}
 0x5a7   :  { %2550 = dma.vmem_to_hbm [thread:$0]  %s2548_s9, 32, %s4169_s8, [#allocation4]  }
 0x5a8   :  { %3583 = dma.done.wait [#allocation4], 32  }
 0x5a9   :  { %3584 = vsyncadd [#allocation4], 4294967264 }
 0x5aa   :  { %2554 = vsyncpa [#allocation3], 1 }
 0x5ab   :  { %2555 = vsyncpa [#allocation8], 1 }
 0x5ac   :  { %2556 = vsyncpa [#allocation11], 1 }
 0x5ad   :  { %2557 = vsyncpa [#allocation4], 1 }
 0x5ae   :  { %2558 = vsyncpa [#allocation5], 1 }

</bundles_post_ra>
